<compile_context>
chip_gen: v6e
topology: v6e:2x2x1
jax: 0.10.0
libtpu: 0.0.40
codegen_flags: <defaults>
</compile_context>

<pallas_src>
import jax
import jax.numpy as jnp
from jax import lax
from jax.experimental import pallas as pl
from jax.experimental.pallas import tpu as pltpu

NEG = -1e30  # finite "minus infinity" for padded tag lanes (exp(NEG) == 0.0 exactly in f32)


def bert_crf_kernel(embed_ref, w_ref, b_ref, tags_ref, mask_ref,
                    start_ref, end_ref, trans_ref, exptrans_ref,
                    llh_ref, emission_ref,
                    score_s, accnum_s, lastoh_s, prevoh_s):
    # embed_ref    : [TB, TS, D]   bf16  (batch-major chunk of embeddings)
    # w_ref        : [D, TP]       bf16  (hidden2tag weight, tag dim padded to 128)
    # b_ref        : [1, TP]       f32
    # tags_ref     : [1, TB, TS]   i32
    # mask_ref     : [1, TB, TS]   f32   (0/1; mask[:, 0] must be 1 — torchcrf contract)
    # start_ref, end_ref : [1, TP] f32 ; trans_ref, exptrans_ref : [TP, TP] f32
    # llh_ref      : [TB, TP]      f32   (per-sequence llh broadcast across lanes)
    # emission_ref : [TB, TS, TP]  f32
    # score_s / accnum_s / lastoh_s / prevoh_s : [TB, TP] f32 scratch carried across chunks
    t_idx = pl.program_id(1)
    n_t = pl.num_programs(1)
    TB, TS, D = embed_ref.shape
    TP = w_ref.shape[1]

    # ---- hidden2tag linear (bf16 MXU, f32 accumulation) + lane-dense log_softmax ----
    x = embed_ref[...].reshape(TB * TS, D)                                    # bf16
    logits = jnp.dot(x, w_ref[...], preferred_element_type=jnp.float32)
    logits = logits + b_ref[...]                                              # [TB*TS, TP]
    mx = jnp.max(logits, axis=1, keepdims=True)
    z = logits - mx
    em2 = z - jnp.log(jnp.sum(jnp.exp(z), axis=1, keepdims=True))
    em = em2.reshape(TB, TS, TP)                                              # [TB, TS, TP]
    emission_ref[...] = em

    tags = tags_ref[0]                                                        # [TB, TS] i32
    mask = mask_ref[0]                                                        # [TB, TS] f32
    start = start_ref[...]                                                    # [1, TP]
    trans = trans_ref[...]                                                    # [TP, TP]
    expT = exptrans_ref[...]                                                  # [TP, TP]
    lane = lax.broadcasted_iota(jnp.int32, (TB, TP), 1)

    def onehot(s):
        return (tags[:, s:s + 1] == lane).astype(jnp.float32)                 # [TB, TP]

    # ---- init carried CRF state on the first time chunk of this batch tile ----
    @pl.when(t_idx == 0)
    def _():
        oh0 = onehot(0)
        em0 = em[:, 0, :]
        score_s[...] = start + em0             # forward-algorithm scores (denominator)
        accnum_s[...] = oh0 * (start + em0)    # gold-path score, lane-wise (reduced at end)
        lastoh_s[...] = oh0                    # one-hot of last valid tag so far
        prevoh_s[...] = oh0                    # one-hot of previous timestep's gold tag

    def step(s, score, accnum, lastoh, prevoh):
        em_s = em[:, s, :]                                                    # [TB, TP]
        m_s = mask[:, s:s + 1]                                                # [TB, 1]
        oh_s = onehot(s)
        # denominator: logsumexp over previous tags as a stabilized exp-matmul on the MXU
        m = jnp.max(score, axis=1, keepdims=True)
        p = jnp.exp(score - m)
        nxt = jnp.log(jnp.dot(p, expT, preferred_element_type=jnp.float32)) + m + em_s
        score = jnp.where(m_s > 0.0, nxt, score)
        # numerator: gold transition + emission, gathered via one-hot matmul, lane-wise
        trans_row = jnp.dot(prevoh, trans, preferred_element_type=jnp.float32)
        accnum = accnum + m_s * oh_s * (trans_row + em_s)
        lastoh = jnp.where(m_s > 0.0, oh_s, lastoh)
        return score, accnum, lastoh, oh_s

    # step 0 of this chunk continues the recursion from the previous chunk
    @pl.when(t_idx > 0)
    def _():
        sc, an, lo, po = step(0, score_s[...], accnum_s[...],
                              lastoh_s[...], prevoh_s[...])
        score_s[...] = sc
        accnum_s[...] = an
        lastoh_s[...] = lo
        prevoh_s[...] = po

    # remaining steps: bounded static unroll over the chunk, carries held in vregs
    score, accnum, lastoh, prevoh = (score_s[...], accnum_s[...],
                                     lastoh_s[...], prevoh_s[...])
    for s in range(1, TS):
        score, accnum, lastoh, prevoh = step(s, score, accnum, lastoh, prevoh)
    score_s[...] = score
    accnum_s[...] = accnum
    lastoh_s[...] = lastoh
    prevoh_s[...] = prevoh

    # ---- finalize on the last chunk: reduce over lanes exactly once ----
    @pl.when(t_idx == n_t - 1)
    def _():
        end = end_ref[...]                                                    # [1, TP]
        numerator = jnp.sum(accnum_s[...] + lastoh_s[...] * end,
                            axis=1, keepdims=True)                            # [TB, 1]
        final = score_s[...] + end                                            # [TB, TP]
        fmax = jnp.max(final, axis=1, keepdims=True)
        denom = jnp.log(jnp.sum(jnp.exp(final - fmax), axis=1, keepdims=True)) + fmax
        llh_ref[...] = jnp.broadcast_to(numerator - denom, llh_ref.shape)


def bert_crf_forward(embed_bsd, tags_bs, mask_bs, params, *, ts=16, tb=None):
    """Module-facing wrapper. Inputs are batch-major like the PyTorch module."""
    B, S, D = embed_bsd.shape
    T = params["w"].shape[1]
    TP = 128                                    # lane-dense padded tag dimension

    # --- tiling: batch tiles must be a multiple of 8 (or the full batch) ---
    if tb is None:
        tb = 8 if (B % 8 == 0) else B
    assert B % tb == 0, "batch must be divisible by the batch tile"
    n_b = B // tb
    s_pad = ((S + ts - 1) // ts) * ts
    n_t = s_pad // ts

    # --- pad the (tiny) CRF / linear parameters out to 128 tag lanes ---
    w_p = jnp.zeros((D, TP), jnp.float32).at[:, :T].set(params["w"]).astype(jnp.bfloat16)
    b_p = jnp.full((1, TP), NEG, jnp.float32).at[:, :T].set(params["b"])
    start_p = jnp.full((1, TP), NEG, jnp.float32).at[:, :T].set(params["start"])
    end_p = jnp.full((1, TP), NEG, jnp.float32).at[:, :T].set(params["end"])
    trans_p = jnp.full((TP, TP), NEG, jnp.float32).at[:T, :T].set(params["trans"])
    exptrans_p = jnp.exp(trans_p)               # hoisted out of the per-step recursion

    # --- embed stays batch-major (no HBM transpose of the big tensor); bf16 for the MXU ---
    embed_p = embed_bsd.astype(jnp.bfloat16)
    tags_p = tags_bs.astype(jnp.int32)
    mask_p = mask_bs.astype(jnp.float32)
    if s_pad != S:
        embed_p = jnp.pad(embed_p, ((0, 0), (0, s_pad - S), (0, 0)))
        tags_p = jnp.pad(tags_p, ((0, 0), (0, s_pad - S)))
        mask_p = jnp.pad(mask_p, ((0, 0), (0, s_pad - S)))
    # tiny glue: chunk-major layout for tags/mask so each grid step sees a full-lane block
    tags_r = tags_p.reshape(B, n_t, ts).transpose(1, 0, 2)                    # [n_t, B, ts]
    mask_r = mask_p.reshape(B, n_t, ts).transpose(1, 0, 2)                    # [n_t, B, ts]

    llh_bt, emission_pad = pl.pallas_call(
        bert_crf_kernel,
        out_shape=(jax.ShapeDtypeStruct((B, TP), jnp.float32),
                   jax.ShapeDtypeStruct((B, s_pad, TP), jnp.float32)),
        grid=(n_b, n_t),
        in_specs=[
            pl.BlockSpec((tb, ts, D), lambda b, t: (b, t, 0)),     # embed (pipelined)
            pl.BlockSpec((D, TP), lambda b, t: (0, 0)),            # hidden2tag weight
            pl.BlockSpec((1, TP), lambda b, t: (0, 0)),            # bias
            pl.BlockSpec((1, tb, ts), lambda b, t: (t, b, 0)),     # tags chunk
            pl.BlockSpec((1, tb, ts), lambda b, t: (t, b, 0)),     # mask chunk
            pl.BlockSpec((1, TP), lambda b, t: (0, 0)),            # start transitions
            pl.BlockSpec((1, TP), lambda b, t: (0, 0)),            # end transitions
            pl.BlockSpec((TP, TP), lambda b, t: (0, 0)),           # transitions
            pl.BlockSpec((TP, TP), lambda b, t: (0, 0)),           # exp(transitions)
        ],
        out_specs=(
            pl.BlockSpec((tb, TP), lambda b, t: (b, 0)),           # per-sequence llh
            pl.BlockSpec((tb, ts, TP), lambda b, t: (b, t, 0)),    # emission (lane-dense)
        ),
        scratch_shapes=[pltpu.VMEM((tb, TP), jnp.float32)] * 4,
        compiler_params=pltpu.CompilerParams(
            dimension_semantics=("parallel", "arbitrary")),
    )(embed_p, w_p, b_p, tags_r, mask_r, start_p, end_p, trans_p, exptrans_p)

    llh = jnp.sum(llh_bt[:, 0])                 # torchcrf reduction='sum'; .mean() is a no-op
    emission = emission_pad[:, :S, :T]
    return llh, emission


def reference_forward(embed, tags, mask, params):
    """Pure-JAX reference mirroring the PyTorch module (torchcrf semantics).

    The hidden2tag matmul uses bf16-rounded inputs + f32 accumulation to match the
    kernel's MXU precision; everything else is f32.
    """
    W = params["w"].astype(jnp.bfloat16).astype(jnp.float32)
    x = embed.astype(jnp.bfloat16).astype(jnp.float32)
    b = params["b"][0]
    start, end, trans = params["start"][0], params["end"][0], params["trans"]
    tag_space = jnp.einsum("bsd,dt->bst", x, W) + b
    emission = jax.nn.log_softmax(tag_space, axis=2)
    B, S, T = emission.shape
    maskf = mask.astype(jnp.float32)
    ar = jnp.arange(B)

    num = start[tags[:, 0]] + emission[ar, 0, tags[:, 0]]
    for t in range(1, S):
        num = num + maskf[:, t] * (trans[tags[:, t - 1], tags[:, t]] +
                                   emission[ar, t, tags[:, t]])
    seq_ends = maskf.sum(1).astype(jnp.int32) - 1
    num = num + end[tags[ar, seq_ends]]

    score = start[None, :] + emission[:, 0, :]
    for t in range(1, S):
        nxt = jax.scipy.special.logsumexp(
            score[:, :, None] + trans[None] + emission[:, t, :][:, None, :], axis=1)
        score = jnp.where(maskf[:, t][:, None] > 0, nxt, score)
    denom = jax.scipy.special.logsumexp(score + end[None], axis=1)

    llh = jnp.sum(num - denom)
    return llh, emission


if __name__ == "__main__":
    # Small synthetic shapes exercising: tag padding (T=5 -> 128), time padding
    # (S=20 -> 32), multi-chunk recursion carry (2 chunks), variable-length masks.
    B, S, D, T = 4, 20, 32, 5
    key = jax.random.PRNGKey(0)
    ks = jax.random.split(key, 7)

    embed = jax.random.normal(ks[0], (B, S, D), jnp.float32)
    tags = jax.random.randint(ks[1], (B, S), 0, T, dtype=jnp.int32)
    lengths = jnp.array([S, 9, 14, 1], dtype=jnp.int32)   # mask[:, 0] == 1 (torchcrf contract)
    mask = (jnp.arange(S)[None, :] < lengths[:, None]).astype(jnp.float32)

    bound = 1.0 / (D ** 0.5)
    params = dict(
        w=jax.random.uniform(ks[2], (D, T), jnp.float32, -bound, bound),
        b=jax.random.uniform(ks[3], (1, T), jnp.float32, -bound, bound),
        start=jax.random.uniform(ks[4], (1, T), jnp.float32, -0.1, 0.1),
        end=jax.random.uniform(ks[5], (1, T), jnp.float32, -0.1, 0.1),
        trans=jax.random.uniform(ks[6], (T, T), jnp.float32, -0.1, 0.1),
    )

    llh, emission = bert_crf_forward(embed, tags, mask, params, ts=16)
    jax.block_until_ready((llh, emission))

    llh_ref, em_ref = reference_forward(embed, tags, mask, params)
    assert emission.shape == em_ref.shape
    assert jnp.allclose(emission, em_ref, atol=1e-4, rtol=1e-4), \
        float(jnp.max(jnp.abs(emission - em_ref)))
    assert jnp.allclose(llh, llh_ref, atol=1e-2, rtol=1e-3), (float(llh), float(llh_ref))

    print("KERNEL_OK")
</pallas_src>

<mosaic_0001>
module attributes {stable_mosaic.version = 11 : i64} {
  func.func @bert_crf_kernel(%arg0: i32, %arg1: i32, %arg2: memref<4x16x32xbf16, #tpu.memory_space<vmem>>, %arg3: memref<32x128xbf16, #tpu.memory_space<vmem>>, %arg4: memref<1x128xf32, #tpu.memory_space<vmem>>, %arg5: memref<1x4x16xi32, #tpu.memory_space<vmem>>, %arg6: memref<1x4x16xf32, #tpu.memory_space<vmem>>, %arg7: memref<1x128xf32, #tpu.memory_space<vmem>>, %arg8: memref<1x128xf32, #tpu.memory_space<vmem>>, %arg9: memref<128x128xf32, #tpu.memory_space<vmem>>, %arg10: memref<128x128xf32, #tpu.memory_space<vmem>>, %arg11: memref<4x128xf32, #tpu.memory_space<vmem>>, %arg12: memref<4x16x128xf32, #tpu.memory_space<vmem>>, %arg13: memref<4x128xf32, #tpu.memory_space<vmem>>, %arg14: memref<4x128xf32, #tpu.memory_space<vmem>>, %arg15: memref<4x128xf32, #tpu.memory_space<vmem>>, %arg16: memref<4x128xf32, #tpu.memory_space<vmem>>) attributes {dimension_semantics = [#tpu.dimension_semantics<parallel>, #tpu.dimension_semantics<arbitrary>], iteration_bounds = array<i64: 1, 2>, scalar_prefetch = 0 : i64, scratch_operands = 4 : i64, tpu.core_type = #tpu.core_type<tc>, window_params = [{transform_indices = @transform_0, window_bounds = array<i64: 4, 16, 32>}, {pipeline_mode = #tpu.pipeline_mode<synchronous>, transform_indices = @transform_1, window_bounds = array<i64: 32, 128>}, {pipeline_mode = #tpu.pipeline_mode<synchronous>, transform_indices = @transform_2, window_bounds = array<i64: 1, 128>}, {transform_indices = @transform_3, window_bounds = array<i64: 1, 4, 16>}, {transform_indices = @transform_4, window_bounds = array<i64: 1, 4, 16>}, {pipeline_mode = #tpu.pipeline_mode<synchronous>, transform_indices = @transform_5, window_bounds = array<i64: 1, 128>}, {pipeline_mode = #tpu.pipeline_mode<synchronous>, transform_indices = @transform_6, window_bounds = array<i64: 1, 128>}, {pipeline_mode = #tpu.pipeline_mode<synchronous>, transform_indices = @transform_7, window_bounds = array<i64: 128, 128>}, {pipeline_mode = #tpu.pipeline_mode<synchronous>, transform_indices = @transform_8, window_bounds = array<i64: 128, 128>}, {transform_indices = @transform_9, window_bounds = array<i64: 4, 128>}, {transform_indices = @transform_10, window_bounds = array<i64: 4, 16, 128>}]} {
    %c0 = arith.constant 0 : index
    %c0_0 = arith.constant 0 : index
    %c0_1 = arith.constant 0 : index
    %0 = vector.load %arg2[%c0, %c0_0, %c0_1] : memref<4x16x32xbf16, #tpu.memory_space<vmem>>, vector<4x16x32xbf16>
    %1 = vector.shape_cast %0 : vector<4x16x32xbf16> to vector<64x32xbf16>
    %c0_2 = arith.constant 0 : index
    %c0_3 = arith.constant 0 : index
    %2 = vector.load %arg3[%c0_2, %c0_3] : memref<32x128xbf16, #tpu.memory_space<vmem>>, vector<32x128xbf16>
    %cst = arith.constant dense<0.000000e+00> : vector<64x128xf32>
    %3 = tpu.matmul %1, %2, %cst {dimension_numbers = #tpu.dot_dimension_numbers<[1], [0], [0], [1], [0, 0, 1, 1], [], []>} : vector<64x32xbf16>, vector<32x128xbf16>, vector<64x128xf32> -> vector<64x128xf32>
    %c0_4 = arith.constant 0 : index
    %c0_5 = arith.constant 0 : index
    %4 = vector.load %arg4[%c0_4, %c0_5] : memref<1x128xf32, #tpu.memory_space<vmem>>, vector<1x128xf32>
    %5 = vector.broadcast %4 : vector<1x128xf32> to vector<64x128xf32>
    %6 = arith.addf %3, %5 : vector<64x128xf32>
    %cst_6 = arith.constant dense<0xFF800000> : vector<64xf32>
    %7 = vector.multi_reduction <maximumf>, %6, %cst_6 [1] : vector<64x128xf32> to vector<64xf32>
    %8 = vector.shape_cast %7 : vector<64xf32> to vector<64x1xf32>
    %9 = vector.broadcast %8 : vector<64x1xf32> to vector<64x128xf32>
    %10 = arith.subf %6, %9 : vector<64x128xf32>
    %11 = math.exp %10 : vector<64x128xf32>
    %cst_7 = arith.constant dense<0.000000e+00> : vector<64xf32>
    %12 = vector.multi_reduction <add>, %11, %cst_7 [1] : vector<64x128xf32> to vector<64xf32>
    %13 = vector.shape_cast %12 : vector<64xf32> to vector<64x1xf32>
    %14 = math.log %13 : vector<64x1xf32>
    %15 = vector.broadcast %14 : vector<64x1xf32> to vector<64x128xf32>
    %16 = arith.subf %10, %15 : vector<64x128xf32>
    %17 = vector.shape_cast %16 : vector<64x128xf32> to vector<4x16x128xf32>
    %c0_8 = arith.constant 0 : index
    %c0_9 = arith.constant 0 : index
    %c0_10 = arith.constant 0 : index
    %18 = vector.load %arg12[%c0_8, %c0_9, %c0_10] : memref<4x16x128xf32, #tpu.memory_space<vmem>>, vector<4x16x128xf32>
    tpu.vector_store %arg12[%c0_8, %c0_9, %c0_10], %17 {strides = array<i32>} : memref<4x16x128xf32, #tpu.memory_space<vmem>>, vector<4x16x128xf32>,
    %c0_11 = arith.constant 0 : index
    %c0_12 = arith.constant 0 : index
    %c0_13 = arith.constant 0 : index
    %19 = vector.load %arg5[%c0_11, %c0_12, %c0_13] : memref<1x4x16xi32, #tpu.memory_space<vmem>>, vector<1x4x16xi32>
    %20 = vector.shape_cast %19 : vector<1x4x16xi32> to vector<4x16xi32>
    %c0_14 = arith.constant 0 : index
    %c0_15 = arith.constant 0 : index
    %c0_16 = arith.constant 0 : index
    %21 = vector.load %arg6[%c0_14, %c0_15, %c0_16] : memref<1x4x16xf32, #tpu.memory_space<vmem>>, vector<1x4x16xf32>
    %22 = vector.shape_cast %21 : vector<1x4x16xf32> to vector<4x16xf32>
    %c0_17 = arith.constant 0 : index
    %c0_18 = arith.constant 0 : index
    %23 = vector.load %arg7[%c0_17, %c0_18] : memref<1x128xf32, #tpu.memory_space<vmem>>, vector<1x128xf32>
    %c0_19 = arith.constant 0 : index
    %c0_20 = arith.constant 0 : index
    %24 = vector.load %arg9[%c0_19, %c0_20] : memref<128x128xf32, #tpu.memory_space<vmem>>, vector<128x128xf32>
    %c0_21 = arith.constant 0 : index
    %c0_22 = arith.constant 0 : index
    %25 = vector.load %arg10[%c0_21, %c0_22] : memref<128x128xf32, #tpu.memory_space<vmem>>, vector<128x128xf32>
    %26 = tpu.iota {dimensions = array<i32: 1>} : vector<4x128xi32>
    %c0_i32 = arith.constant 0 : i32
    %27 = arith.cmpi eq, %arg1, %c0_i32 : i32
    %28 = arith.extui %27 : i1 to i32
    %c0_i32_23 = arith.constant 0 : i32
    %29 = arith.cmpi ne, %28, %c0_i32_23 : i32
    scf.if %29 {
      %554 = vector.extract_strided_slice %20 {offsets = [0, 0], sizes = [4, 1], strides = [1, 1]} : vector<4x16xi32> to vector<4x1xi32>
      %555 = vector.broadcast %554 : vector<4x1xi32> to vector<4x128xi32>
      %556 = arith.cmpi eq, %555, %26 : vector<4x128xi32>
      %557 = arith.extui %556 : vector<4x128xi1> to vector<4x128xi32>
      %558 = arith.sitofp %557 : vector<4x128xi32> to vector<4x128xf32>
      %559 = vector.extract_strided_slice %17 {offsets = [0, 0, 0], sizes = [4, 1, 128], strides = [1, 1, 1]} : vector<4x16x128xf32> to vector<4x1x128xf32>
      %560 = vector.shape_cast %559 : vector<4x1x128xf32> to vector<4x128xf32>
      %561 = vector.broadcast %23 : vector<1x128xf32> to vector<4x128xf32>
      %562 = arith.addf %561, %560 : vector<4x128xf32>
      %c0_118 = arith.constant 0 : index
      %c0_119 = arith.constant 0 : index
      %563 = vector.load %arg13[%c0_118, %c0_119] : memref<4x128xf32, #tpu.memory_space<vmem>>, vector<4x128xf32>
      tpu.vector_store %arg13[%c0_118, %c0_119], %562 {strides = array<i32>} : memref<4x128xf32, #tpu.memory_space<vmem>>, vector<4x128xf32>,
      %564 = vector.broadcast %23 : vector<1x128xf32> to vector<4x128xf32>
      %565 = arith.addf %564, %560 : vector<4x128xf32>
      %566 = arith.mulf %558, %565 : vector<4x128xf32>
      %c0_120 = arith.constant 0 : index
      %c0_121 = arith.constant 0 : index
      %567 = vector.load %arg14[%c0_120, %c0_121] : memref<4x128xf32, #tpu.memory_space<vmem>>, vector<4x128xf32>
      tpu.vector_store %arg14[%c0_120, %c0_121], %566 {strides = array<i32>} : memref<4x128xf32, #tpu.memory_space<vmem>>, vector<4x128xf32>,
      %c0_122 = arith.constant 0 : index
      %c0_123 = arith.constant 0 : index
      %568 = vector.load %arg15[%c0_122, %c0_123] : memref<4x128xf32, #tpu.memory_space<vmem>>, vector<4x128xf32>
      tpu.vector_store %arg15[%c0_122, %c0_123], %558 {strides = array<i32>} : memref<4x128xf32, #tpu.memory_space<vmem>>, vector<4x128xf32>,
      %c0_124 = arith.constant 0 : index
      %c0_125 = arith.constant 0 : index
      %569 = vector.load %arg16[%c0_124, %c0_125] : memref<4x128xf32, #tpu.memory_space<vmem>>, vector<4x128xf32>
      tpu.vector_store %arg16[%c0_124, %c0_125], %558 {strides = array<i32>} : memref<4x128xf32, #tpu.memory_space<vmem>>, vector<4x128xf32>,
    } else {
    }
    %c0_i32_24 = arith.constant 0 : i32
    %30 = arith.cmpi sgt, %arg1, %c0_i32_24 : i32
    %31 = arith.extui %30 : i1 to i32
    %c0_i32_25 = arith.constant 0 : i32
    %32 = arith.cmpi ne, %31, %c0_i32_25 : i32
    scf.if %32 {
      %c0_118 = arith.constant 0 : index
      %c0_119 = arith.constant 0 : index
      %554 = vector.load %arg13[%c0_118, %c0_119] : memref<4x128xf32, #tpu.memory_space<vmem>>, vector<4x128xf32>
      %c0_120 = arith.constant 0 : index
      %c0_121 = arith.constant 0 : index
      %555 = vector.load %arg14[%c0_120, %c0_121] : memref<4x128xf32, #tpu.memory_space<vmem>>, vector<4x128xf32>
      %c0_122 = arith.constant 0 : index
      %c0_123 = arith.constant 0 : index
      %556 = vector.load %arg15[%c0_122, %c0_123] : memref<4x128xf32, #tpu.memory_space<vmem>>, vector<4x128xf32>
      %c0_124 = arith.constant 0 : index
      %c0_125 = arith.constant 0 : index
      %557 = vector.load %arg16[%c0_124, %c0_125] : memref<4x128xf32, #tpu.memory_space<vmem>>, vector<4x128xf32>
      %558 = vector.extract_strided_slice %17 {offsets = [0, 0, 0], sizes = [4, 1, 128], strides = [1, 1, 1]} : vector<4x16x128xf32> to vector<4x1x128xf32>
      %559 = vector.shape_cast %558 : vector<4x1x128xf32> to vector<4x128xf32>
      %560 = vector.extract_strided_slice %22 {offsets = [0, 0], sizes = [4, 1], strides = [1, 1]} : vector<4x16xf32> to vector<4x1xf32>
      %561 = vector.extract_strided_slice %20 {offsets = [0, 0], sizes = [4, 1], strides = [1, 1]} : vector<4x16xi32> to vector<4x1xi32>
      %562 = vector.broadcast %561 : vector<4x1xi32> to vector<4x128xi32>
      %563 = arith.cmpi eq, %562, %26 : vector<4x128xi32>
      %564 = arith.extui %563 : vector<4x128xi1> to vector<4x128xi32>
      %565 = arith.sitofp %564 : vector<4x128xi32> to vector<4x128xf32>
      %cst_126 = arith.constant dense<0xFF800000> : vector<4xf32>
      %566 = vector.multi_reduction <maximumf>, %554, %cst_126 [1] : vector<4x128xf32> to vector<4xf32>
      %567 = vector.shape_cast %566 : vector<4xf32> to vector<4x1xf32>
      %568 = vector.broadcast %567 : vector<4x1xf32> to vector<4x128xf32>
      %569 = arith.subf %554, %568 : vector<4x128xf32>
      %570 = math.exp %569 : vector<4x128xf32>
      %cst_127 = arith.constant dense<0.000000e+00> : vector<4x128xf32>
      %571 = tpu.matmul %570, %25, %cst_127 {dimension_numbers = #tpu.dot_dimension_numbers<[1], [0], [0], [1], [0, 0, 1, 1], [], []>} : vector<4x128xf32>, vector<128x128xf32>, vector<4x128xf32> -> vector<4x128xf32>
      %572 = math.log %571 : vector<4x128xf32>
      %573 = vector.broadcast %567 : vector<4x1xf32> to vector<4x128xf32>
      %574 = arith.addf %572, %573 : vector<4x128xf32>
      %575 = arith.addf %574, %559 : vector<4x128xf32>
      %cst_128 = arith.constant 0.000000e+00 : f32
      %576 = vector.broadcast %cst_128 : f32 to vector<4x1xf32>
      %577 = arith.cmpf ogt, %560, %576 : vector<4x1xf32>
      %578 = vector.shape_cast %577 : vector<4x1xi1> to vector<4x1xi1>
      %579 = vector.broadcast %578 : vector<4x1xi1> to vector<4x128xi1>
      %580 = arith.select %579, %575, %554 : vector<4x128xi1>, vector<4x128xf32>
      %cst_129 = arith.constant dense<0.000000e+00> : vector<4x128xf32>
      %581 = tpu.matmul %557, %24, %cst_129 {dimension_numbers = #tpu.dot_dimension_numbers<[1], [0], [0], [1], [0, 0, 1, 1], [], []>} : vector<4x128xf32>, vector<128x128xf32>, vector<4x128xf32> -> vector<4x128xf32>
      %582 = vector.broadcast %560 : vector<4x1xf32> to vector<4x128xf32>
      %583 = arith.mulf %582, %565 : vector<4x128xf32>
      %584 = arith.addf %581, %559 : vector<4x128xf32>
      %585 = arith.mulf %583, %584 : vector<4x128xf32>
      %586 = arith.addf %555, %585 : vector<4x128xf32>
      %cst_130 = arith.constant 0.000000e+00 : f32
      %587 = vector.broadcast %cst_130 : f32 to vector<4x1xf32>
      %588 = arith.cmpf ogt, %560, %587 : vector<4x1xf32>
      %589 = vector.shape_cast %588 : vector<4x1xi1> to vector<4x1xi1>
      %590 = vector.broadcast %589 : vector<4x1xi1> to vector<4x128xi1>
      %591 = arith.select %590, %565, %556 : vector<4x128xi1>, vector<4x128xf32>
      %c0_131 = arith.constant 0 : index
      %c0_132 = arith.constant 0 : index
      %592 = vector.load %arg13[%c0_131, %c0_132] : memref<4x128xf32, #tpu.memory_space<vmem>>, vector<4x128xf32>
      tpu.vector_store %arg13[%c0_131, %c0_132], %580 {strides = array<i32>} : memref<4x128xf32, #tpu.memory_space<vmem>>, vector<4x128xf32>,
      %c0_133 = arith.constant 0 : index
      %c0_134 = arith.constant 0 : index
      %593 = vector.load %arg14[%c0_133, %c0_134] : memref<4x128xf32, #tpu.memory_space<vmem>>, vector<4x128xf32>
      tpu.vector_store %arg14[%c0_133, %c0_134], %586 {strides = array<i32>} : memref<4x128xf32, #tpu.memory_space<vmem>>, vector<4x128xf32>,
      %c0_135 = arith.constant 0 : index
      %c0_136 = arith.constant 0 : index
      %594 = vector.load %arg15[%c0_135, %c0_136] : memref<4x128xf32, #tpu.memory_space<vmem>>, vector<4x128xf32>
      tpu.vector_store %arg15[%c0_135, %c0_136], %591 {strides = array<i32>} : memref<4x128xf32, #tpu.memory_space<vmem>>, vector<4x128xf32>,
      %c0_137 = arith.constant 0 : index
      %c0_138 = arith.constant 0 : index
      %595 = vector.load %arg16[%c0_137, %c0_138] : memref<4x128xf32, #tpu.memory_space<vmem>>, vector<4x128xf32>
      tpu.vector_store %arg16[%c0_137, %c0_138], %565 {strides = array<i32>} : memref<4x128xf32, #tpu.memory_space<vmem>>, vector<4x128xf32>,
    } else {
    }
    %c0_26 = arith.constant 0 : index
    %c0_27 = arith.constant 0 : index
    %33 = vector.load %arg13[%c0_26, %c0_27] : memref<4x128xf32, #tpu.memory_space<vmem>>, vector<4x128xf32>
    %c0_28 = arith.constant 0 : index
    %c0_29 = arith.constant 0 : index
    %34 = vector.load %arg14[%c0_28, %c0_29] : memref<4x128xf32, #tpu.memory_space<vmem>>, vector<4x128xf32>
    %c0_30 = arith.constant 0 : index
    %c0_31 = arith.constant 0 : index
    %35 = vector.load %arg15[%c0_30, %c0_31] : memref<4x128xf32, #tpu.memory_space<vmem>>, vector<4x128xf32>
    %c0_32 = arith.constant 0 : index
    %c0_33 = arith.constant 0 : index
    %36 = vector.load %arg16[%c0_32, %c0_33] : memref<4x128xf32, #tpu.memory_space<vmem>>, vector<4x128xf32>
    %37 = vector.extract_strided_slice %17 {offsets = [0, 1, 0], sizes = [4, 1, 128], strides = [1, 1, 1]} : vector<4x16x128xf32> to vector<4x1x128xf32>
    %38 = vector.shape_cast %37 : vector<4x1x128xf32> to vector<4x128xf32>
    %39 = vector.extract_strided_slice %22 {offsets = [0, 1], sizes = [4, 1], strides = [1, 1]} : vector<4x16xf32> to vector<4x1xf32>
    %40 = vector.extract_strided_slice %20 {offsets = [0, 1], sizes = [4, 1], strides = [1, 1]} : vector<4x16xi32> to vector<4x1xi32>
    %41 = vector.broadcast %40 : vector<4x1xi32> to vector<4x128xi32>
    %42 = arith.cmpi eq, %41, %26 : vector<4x128xi32>
    %43 = arith.extui %42 : vector<4x128xi1> to vector<4x128xi32>
    %44 = arith.sitofp %43 : vector<4x128xi32> to vector<4x128xf32>
    %cst_34 = arith.constant dense<0xFF800000> : vector<4xf32>
    %45 = vector.multi_reduction <maximumf>, %33, %cst_34 [1] : vector<4x128xf32> to vector<4xf32>
    %46 = vector.shape_cast %45 : vector<4xf32> to vector<4x1xf32>
    %47 = vector.broadcast %46 : vector<4x1xf32> to vector<4x128xf32>
    %48 = arith.subf %33, %47 : vector<4x128xf32>
    %49 = math.exp %48 : vector<4x128xf32>
    %cst_35 = arith.constant dense<0.000000e+00> : vector<4x128xf32>
    %50 = tpu.matmul %49, %25, %cst_35 {dimension_numbers = #tpu.dot_dimension_numbers<[1], [0], [0], [1], [0, 0, 1, 1], [], []>} : vector<4x128xf32>, vector<128x128xf32>, vector<4x128xf32> -> vector<4x128xf32>
    %51 = math.log %50 : vector<4x128xf32>
    %52 = vector.broadcast %46 : vector<4x1xf32> to vector<4x128xf32>
    %53 = arith.addf %51, %52 : vector<4x128xf32>
    %54 = arith.addf %53, %38 : vector<4x128xf32>
    %cst_36 = arith.constant 0.000000e+00 : f32
    %55 = vector.broadcast %cst_36 : f32 to vector<4x1xf32>
    %56 = arith.cmpf ogt, %39, %55 : vector<4x1xf32>
    %57 = vector.shape_cast %56 : vector<4x1xi1> to vector<4x1xi1>
    %58 = vector.broadcast %57 : vector<4x1xi1> to vector<4x128xi1>
    %59 = arith.select %58, %54, %33 : vector<4x128xi1>, vector<4x128xf32>
    %cst_37 = arith.constant dense<0.000000e+00> : vector<4x128xf32>
    %60 = tpu.matmul %36, %24, %cst_37 {dimension_numbers = #tpu.dot_dimension_numbers<[1], [0], [0], [1], [0, 0, 1, 1], [], []>} : vector<4x128xf32>, vector<128x128xf32>, vector<4x128xf32> -> vector<4x128xf32>
    %61 = vector.broadcast %39 : vector<4x1xf32> to vector<4x128xf32>
    %62 = arith.mulf %61, %44 : vector<4x128xf32>
    %63 = arith.addf %60, %38 : vector<4x128xf32>
    %64 = arith.mulf %62, %63 : vector<4x128xf32>
    %65 = arith.addf %34, %64 : vector<4x128xf32>
    %cst_38 = arith.constant 0.000000e+00 : f32
    %66 = vector.broadcast %cst_38 : f32 to vector<4x1xf32>
    %67 = arith.cmpf ogt, %39, %66 : vector<4x1xf32>
    %68 = vector.shape_cast %67 : vector<4x1xi1> to vector<4x1xi1>
    %69 = vector.broadcast %68 : vector<4x1xi1> to vector<4x128xi1>
    %70 = arith.select %69, %44, %35 : vector<4x128xi1>, vector<4x128xf32>
    %71 = vector.extract_strided_slice %17 {offsets = [0, 2, 0], sizes = [4, 1, 128], strides = [1, 1, 1]} : vector<4x16x128xf32> to vector<4x1x128xf32>
    %72 = vector.shape_cast %71 : vector<4x1x128xf32> to vector<4x128xf32>
    %73 = vector.extract_strided_slice %22 {offsets = [0, 2], sizes = [4, 1], strides = [1, 1]} : vector<4x16xf32> to vector<4x1xf32>
    %74 = vector.extract_strided_slice %20 {offsets = [0, 2], sizes = [4, 1], strides = [1, 1]} : vector<4x16xi32> to vector<4x1xi32>
    %75 = vector.broadcast %74 : vector<4x1xi32> to vector<4x128xi32>
    %76 = arith.cmpi eq, %75, %26 : vector<4x128xi32>
    %77 = arith.extui %76 : vector<4x128xi1> to vector<4x128xi32>
    %78 = arith.sitofp %77 : vector<4x128xi32> to vector<4x128xf32>
    %cst_39 = arith.constant dense<0xFF800000> : vector<4xf32>
    %79 = vector.multi_reduction <maximumf>, %59, %cst_39 [1] : vector<4x128xf32> to vector<4xf32>
    %80 = vector.shape_cast %79 : vector<4xf32> to vector<4x1xf32>
    %81 = vector.broadcast %80 : vector<4x1xf32> to vector<4x128xf32>
    %82 = arith.subf %59, %81 : vector<4x128xf32>
    %83 = math.exp %82 : vector<4x128xf32>
    %cst_40 = arith.constant dense<0.000000e+00> : vector<4x128xf32>
    %84 = tpu.matmul %83, %25, %cst_40 {dimension_numbers = #tpu.dot_dimension_numbers<[1], [0], [0], [1], [0, 0, 1, 1], [], []>} : vector<4x128xf32>, vector<128x128xf32>, vector<4x128xf32> -> vector<4x128xf32>
    %85 = math.log %84 : vector<4x128xf32>
    %86 = vector.broadcast %80 : vector<4x1xf32> to vector<4x128xf32>
    %87 = arith.addf %85, %86 : vector<4x128xf32>
    %88 = arith.addf %87, %72 : vector<4x128xf32>
    %cst_41 = arith.constant 0.000000e+00 : f32
    %89 = vector.broadcast %cst_41 : f32 to vector<4x1xf32>
    %90 = arith.cmpf ogt, %73, %89 : vector<4x1xf32>
    %91 = vector.shape_cast %90 : vector<4x1xi1> to vector<4x1xi1>
    %92 = vector.broadcast %91 : vector<4x1xi1> to vector<4x128xi1>
    %93 = arith.select %92, %88, %59 : vector<4x128xi1>, vector<4x128xf32>
    %cst_42 = arith.constant dense<0.000000e+00> : vector<4x128xf32>
    %94 = tpu.matmul %44, %24, %cst_42 {dimension_numbers = #tpu.dot_dimension_numbers<[1], [0], [0], [1], [0, 0, 1, 1], [], []>} : vector<4x128xf32>, vector<128x128xf32>, vector<4x128xf32> -> vector<4x128xf32>
    %95 = vector.broadcast %73 : vector<4x1xf32> to vector<4x128xf32>
    %96 = arith.mulf %95, %78 : vector<4x128xf32>
    %97 = arith.addf %94, %72 : vector<4x128xf32>
    %98 = arith.mulf %96, %97 : vector<4x128xf32>
    %99 = arith.addf %65, %98 : vector<4x128xf32>
    %cst_43 = arith.constant 0.000000e+00 : f32
    %100 = vector.broadcast %cst_43 : f32 to vector<4x1xf32>
    %101 = arith.cmpf ogt, %73, %100 : vector<4x1xf32>
    %102 = vector.shape_cast %101 : vector<4x1xi1> to vector<4x1xi1>
    %103 = vector.broadcast %102 : vector<4x1xi1> to vector<4x128xi1>
    %104 = arith.select %103, %78, %70 : vector<4x128xi1>, vector<4x128xf32>
    %105 = vector.extract_strided_slice %17 {offsets = [0, 3, 0], sizes = [4, 1, 128], strides = [1, 1, 1]} : vector<4x16x128xf32> to vector<4x1x128xf32>
    %106 = vector.shape_cast %105 : vector<4x1x128xf32> to vector<4x128xf32>
    %107 = vector.extract_strided_slice %22 {offsets = [0, 3], sizes = [4, 1], strides = [1, 1]} : vector<4x16xf32> to vector<4x1xf32>
    %108 = vector.extract_strided_slice %20 {offsets = [0, 3], sizes = [4, 1], strides = [1, 1]} : vector<4x16xi32> to vector<4x1xi32>
    %109 = vector.broadcast %108 : vector<4x1xi32> to vector<4x128xi32>
    %110 = arith.cmpi eq, %109, %26 : vector<4x128xi32>
    %111 = arith.extui %110 : vector<4x128xi1> to vector<4x128xi32>
    %112 = arith.sitofp %111 : vector<4x128xi32> to vector<4x128xf32>
    %cst_44 = arith.constant dense<0xFF800000> : vector<4xf32>
    %113 = vector.multi_reduction <maximumf>, %93, %cst_44 [1] : vector<4x128xf32> to vector<4xf32>
    %114 = vector.shape_cast %113 : vector<4xf32> to vector<4x1xf32>
    %115 = vector.broadcast %114 : vector<4x1xf32> to vector<4x128xf32>
    %116 = arith.subf %93, %115 : vector<4x128xf32>
    %117 = math.exp %116 : vector<4x128xf32>
    %cst_45 = arith.constant dense<0.000000e+00> : vector<4x128xf32>
    %118 = tpu.matmul %117, %25, %cst_45 {dimension_numbers = #tpu.dot_dimension_numbers<[1], [0], [0], [1], [0, 0, 1, 1], [], []>} : vector<4x128xf32>, vector<128x128xf32>, vector<4x128xf32> -> vector<4x128xf32>
    %119 = math.log %118 : vector<4x128xf32>
    %120 = vector.broadcast %114 : vector<4x1xf32> to vector<4x128xf32>
    %121 = arith.addf %119, %120 : vector<4x128xf32>
    %122 = arith.addf %121, %106 : vector<4x128xf32>
    %cst_46 = arith.constant 0.000000e+00 : f32
    %123 = vector.broadcast %cst_46 : f32 to vector<4x1xf32>
    %124 = arith.cmpf ogt, %107, %123 : vector<4x1xf32>
    %125 = vector.shape_cast %124 : vector<4x1xi1> to vector<4x1xi1>
    %126 = vector.broadcast %125 : vector<4x1xi1> to vector<4x128xi1>
    %127 = arith.select %126, %122, %93 : vector<4x128xi1>, vector<4x128xf32>
    %cst_47 = arith.constant dense<0.000000e+00> : vector<4x128xf32>
    %128 = tpu.matmul %78, %24, %cst_47 {dimension_numbers = #tpu.dot_dimension_numbers<[1], [0], [0], [1], [0, 0, 1, 1], [], []>} : vector<4x128xf32>, vector<128x128xf32>, vector<4x128xf32> -> vector<4x128xf32>
    %129 = vector.broadcast %107 : vector<4x1xf32> to vector<4x128xf32>
    %130 = arith.mulf %129, %112 : vector<4x128xf32>
    %131 = arith.addf %128, %106 : vector<4x128xf32>
    %132 = arith.mulf %130, %131 : vector<4x128xf32>
    %133 = arith.addf %99, %132 : vector<4x128xf32>
    %cst_48 = arith.constant 0.000000e+00 : f32
    %134 = vector.broadcast %cst_48 : f32 to vector<4x1xf32>
    %135 = arith.cmpf ogt, %107, %134 : vector<4x1xf32>
    %136 = vector.shape_cast %135 : vector<4x1xi1> to vector<4x1xi1>
    %137 = vector.broadcast %136 : vector<4x1xi1> to vector<4x128xi1>
    %138 = arith.select %137, %112, %104 : vector<4x128xi1>, vector<4x128xf32>
    %139 = vector.extract_strided_slice %17 {offsets = [0, 4, 0], sizes = [4, 1, 128], strides = [1, 1, 1]} : vector<4x16x128xf32> to vector<4x1x128xf32>
    %140 = vector.shape_cast %139 : vector<4x1x128xf32> to vector<4x128xf32>
    %141 = vector.extract_strided_slice %22 {offsets = [0, 4], sizes = [4, 1], strides = [1, 1]} : vector<4x16xf32> to vector<4x1xf32>
    %142 = vector.extract_strided_slice %20 {offsets = [0, 4], sizes = [4, 1], strides = [1, 1]} : vector<4x16xi32> to vector<4x1xi32>
    %143 = vector.broadcast %142 : vector<4x1xi32> to vector<4x128xi32>
    %144 = arith.cmpi eq, %143, %26 : vector<4x128xi32>
    %145 = arith.extui %144 : vector<4x128xi1> to vector<4x128xi32>
    %146 = arith.sitofp %145 : vector<4x128xi32> to vector<4x128xf32>
    %cst_49 = arith.constant dense<0xFF800000> : vector<4xf32>
    %147 = vector.multi_reduction <maximumf>, %127, %cst_49 [1] : vector<4x128xf32> to vector<4xf32>
    %148 = vector.shape_cast %147 : vector<4xf32> to vector<4x1xf32>
    %149 = vector.broadcast %148 : vector<4x1xf32> to vector<4x128xf32>
    %150 = arith.subf %127, %149 : vector<4x128xf32>
    %151 = math.exp %150 : vector<4x128xf32>
    %cst_50 = arith.constant dense<0.000000e+00> : vector<4x128xf32>
    %152 = tpu.matmul %151, %25, %cst_50 {dimension_numbers = #tpu.dot_dimension_numbers<[1], [0], [0], [1], [0, 0, 1, 1], [], []>} : vector<4x128xf32>, vector<128x128xf32>, vector<4x128xf32> -> vector<4x128xf32>
    %153 = math.log %152 : vector<4x128xf32>
    %154 = vector.broadcast %148 : vector<4x1xf32> to vector<4x128xf32>
    %155 = arith.addf %153, %154 : vector<4x128xf32>
    %156 = arith.addf %155, %140 : vector<4x128xf32>
    %cst_51 = arith.constant 0.000000e+00 : f32
    %157 = vector.broadcast %cst_51 : f32 to vector<4x1xf32>
    %158 = arith.cmpf ogt, %141, %157 : vector<4x1xf32>
    %159 = vector.shape_cast %158 : vector<4x1xi1> to vector<4x1xi1>
    %160 = vector.broadcast %159 : vector<4x1xi1> to vector<4x128xi1>
    %161 = arith.select %160, %156, %127 : vector<4x128xi1>, vector<4x128xf32>
    %cst_52 = arith.constant dense<0.000000e+00> : vector<4x128xf32>
    %162 = tpu.matmul %112, %24, %cst_52 {dimension_numbers = #tpu.dot_dimension_numbers<[1], [0], [0], [1], [0, 0, 1, 1], [], []>} : vector<4x128xf32>, vector<128x128xf32>, vector<4x128xf32> -> vector<4x128xf32>
    %163 = vector.broadcast %141 : vector<4x1xf32> to vector<4x128xf32>
    %164 = arith.mulf %163, %146 : vector<4x128xf32>
    %165 = arith.addf %162, %140 : vector<4x128xf32>
    %166 = arith.mulf %164, %165 : vector<4x128xf32>
    %167 = arith.addf %133, %166 : vector<4x128xf32>
    %cst_53 = arith.constant 0.000000e+00 : f32
    %168 = vector.broadcast %cst_53 : f32 to vector<4x1xf32>
    %169 = arith.cmpf ogt, %141, %168 : vector<4x1xf32>
    %170 = vector.shape_cast %169 : vector<4x1xi1> to vector<4x1xi1>
    %171 = vector.broadcast %170 : vector<4x1xi1> to vector<4x128xi1>
    %172 = arith.select %171, %146, %138 : vector<4x128xi1>, vector<4x128xf32>
    %173 = vector.extract_strided_slice %17 {offsets = [0, 5, 0], sizes = [4, 1, 128], strides = [1, 1, 1]} : vector<4x16x128xf32> to vector<4x1x128xf32>
    %174 = vector.shape_cast %173 : vector<4x1x128xf32> to vector<4x128xf32>
    %175 = vector.extract_strided_slice %22 {offsets = [0, 5], sizes = [4, 1], strides = [1, 1]} : vector<4x16xf32> to vector<4x1xf32>
    %176 = vector.extract_strided_slice %20 {offsets = [0, 5], sizes = [4, 1], strides = [1, 1]} : vector<4x16xi32> to vector<4x1xi32>
    %177 = vector.broadcast %176 : vector<4x1xi32> to vector<4x128xi32>
    %178 = arith.cmpi eq, %177, %26 : vector<4x128xi32>
    %179 = arith.extui %178 : vector<4x128xi1> to vector<4x128xi32>
    %180 = arith.sitofp %179 : vector<4x128xi32> to vector<4x128xf32>
    %cst_54 = arith.constant dense<0xFF800000> : vector<4xf32>
    %181 = vector.multi_reduction <maximumf>, %161, %cst_54 [1] : vector<4x128xf32> to vector<4xf32>
    %182 = vector.shape_cast %181 : vector<4xf32> to vector<4x1xf32>
    %183 = vector.broadcast %182 : vector<4x1xf32> to vector<4x128xf32>
    %184 = arith.subf %161, %183 : vector<4x128xf32>
    %185 = math.exp %184 : vector<4x128xf32>
    %cst_55 = arith.constant dense<0.000000e+00> : vector<4x128xf32>
    %186 = tpu.matmul %185, %25, %cst_55 {dimension_numbers = #tpu.dot_dimension_numbers<[1], [0], [0], [1], [0, 0, 1, 1], [], []>} : vector<4x128xf32>, vector<128x128xf32>, vector<4x128xf32> -> vector<4x128xf32>
    %187 = math.log %186 : vector<4x128xf32>
    %188 = vector.broadcast %182 : vector<4x1xf32> to vector<4x128xf32>
    %189 = arith.addf %187, %188 : vector<4x128xf32>
    %190 = arith.addf %189, %174 : vector<4x128xf32>
    %cst_56 = arith.constant 0.000000e+00 : f32
    %191 = vector.broadcast %cst_56 : f32 to vector<4x1xf32>
    %192 = arith.cmpf ogt, %175, %191 : vector<4x1xf32>
    %193 = vector.shape_cast %192 : vector<4x1xi1> to vector<4x1xi1>
    %194 = vector.broadcast %193 : vector<4x1xi1> to vector<4x128xi1>
    %195 = arith.select %194, %190, %161 : vector<4x128xi1>, vector<4x128xf32>
    %cst_57 = arith.constant dense<0.000000e+00> : vector<4x128xf32>
    %196 = tpu.matmul %146, %24, %cst_57 {dimension_numbers = #tpu.dot_dimension_numbers<[1], [0], [0], [1], [0, 0, 1, 1], [], []>} : vector<4x128xf32>, vector<128x128xf32>, vector<4x128xf32> -> vector<4x128xf32>
    %197 = vector.broadcast %175 : vector<4x1xf32> to vector<4x128xf32>
    %198 = arith.mulf %197, %180 : vector<4x128xf32>
    %199 = arith.addf %196, %174 : vector<4x128xf32>
    %200 = arith.mulf %198, %199 : vector<4x128xf32>
    %201 = arith.addf %167, %200 : vector<4x128xf32>
    %cst_58 = arith.constant 0.000000e+00 : f32
    %202 = vector.broadcast %cst_58 : f32 to vector<4x1xf32>
    %203 = arith.cmpf ogt, %175, %202 : vector<4x1xf32>
    %204 = vector.shape_cast %203 : vector<4x1xi1> to vector<4x1xi1>
    %205 = vector.broadcast %204 : vector<4x1xi1> to vector<4x128xi1>
    %206 = arith.select %205, %180, %172 : vector<4x128xi1>, vector<4x128xf32>
    %207 = vector.extract_strided_slice %17 {offsets = [0, 6, 0], sizes = [4, 1, 128], strides = [1, 1, 1]} : vector<4x16x128xf32> to vector<4x1x128xf32>
    %208 = vector.shape_cast %207 : vector<4x1x128xf32> to vector<4x128xf32>
    %209 = vector.extract_strided_slice %22 {offsets = [0, 6], sizes = [4, 1], strides = [1, 1]} : vector<4x16xf32> to vector<4x1xf32>
    %210 = vector.extract_strided_slice %20 {offsets = [0, 6], sizes = [4, 1], strides = [1, 1]} : vector<4x16xi32> to vector<4x1xi32>
    %211 = vector.broadcast %210 : vector<4x1xi32> to vector<4x128xi32>
    %212 = arith.cmpi eq, %211, %26 : vector<4x128xi32>
    %213 = arith.extui %212 : vector<4x128xi1> to vector<4x128xi32>
    %214 = arith.sitofp %213 : vector<4x128xi32> to vector<4x128xf32>
    %cst_59 = arith.constant dense<0xFF800000> : vector<4xf32>
    %215 = vector.multi_reduction <maximumf>, %195, %cst_59 [1] : vector<4x128xf32> to vector<4xf32>
    %216 = vector.shape_cast %215 : vector<4xf32> to vector<4x1xf32>
    %217 = vector.broadcast %216 : vector<4x1xf32> to vector<4x128xf32>
    %218 = arith.subf %195, %217 : vector<4x128xf32>
    %219 = math.exp %218 : vector<4x128xf32>
    %cst_60 = arith.constant dense<0.000000e+00> : vector<4x128xf32>
    %220 = tpu.matmul %219, %25, %cst_60 {dimension_numbers = #tpu.dot_dimension_numbers<[1], [0], [0], [1], [0, 0, 1, 1], [], []>} : vector<4x128xf32>, vector<128x128xf32>, vector<4x128xf32> -> vector<4x128xf32>
    %221 = math.log %220 : vector<4x128xf32>
    %222 = vector.broadcast %216 : vector<4x1xf32> to vector<4x128xf32>
    %223 = arith.addf %221, %222 : vector<4x128xf32>
    %224 = arith.addf %223, %208 : vector<4x128xf32>
    %cst_61 = arith.constant 0.000000e+00 : f32
    %225 = vector.broadcast %cst_61 : f32 to vector<4x1xf32>
    %226 = arith.cmpf ogt, %209, %225 : vector<4x1xf32>
    %227 = vector.shape_cast %226 : vector<4x1xi1> to vector<4x1xi1>
    %228 = vector.broadcast %227 : vector<4x1xi1> to vector<4x128xi1>
    %229 = arith.select %228, %224, %195 : vector<4x128xi1>, vector<4x128xf32>
    %cst_62 = arith.constant dense<0.000000e+00> : vector<4x128xf32>
    %230 = tpu.matmul %180, %24, %cst_62 {dimension_numbers = #tpu.dot_dimension_numbers<[1], [0], [0], [1], [0, 0, 1, 1], [], []>} : vector<4x128xf32>, vector<128x128xf32>, vector<4x128xf32> -> vector<4x128xf32>
    %231 = vector.broadcast %209 : vector<4x1xf32> to vector<4x128xf32>
    %232 = arith.mulf %231, %214 : vector<4x128xf32>
    %233 = arith.addf %230, %208 : vector<4x128xf32>
    %234 = arith.mulf %232, %233 : vector<4x128xf32>
    %235 = arith.addf %201, %234 : vector<4x128xf32>
    %cst_63 = arith.constant 0.000000e+00 : f32
    %236 = vector.broadcast %cst_63 : f32 to vector<4x1xf32>
    %237 = arith.cmpf ogt, %209, %236 : vector<4x1xf32>
    %238 = vector.shape_cast %237 : vector<4x1xi1> to vector<4x1xi1>
    %239 = vector.broadcast %238 : vector<4x1xi1> to vector<4x128xi1>
    %240 = arith.select %239, %214, %206 : vector<4x128xi1>, vector<4x128xf32>
    %241 = vector.extract_strided_slice %17 {offsets = [0, 7, 0], sizes = [4, 1, 128], strides = [1, 1, 1]} : vector<4x16x128xf32> to vector<4x1x128xf32>
    %242 = vector.shape_cast %241 : vector<4x1x128xf32> to vector<4x128xf32>
    %243 = vector.extract_strided_slice %22 {offsets = [0, 7], sizes = [4, 1], strides = [1, 1]} : vector<4x16xf32> to vector<4x1xf32>
    %244 = vector.extract_strided_slice %20 {offsets = [0, 7], sizes = [4, 1], strides = [1, 1]} : vector<4x16xi32> to vector<4x1xi32>
    %245 = vector.broadcast %244 : vector<4x1xi32> to vector<4x128xi32>
    %246 = arith.cmpi eq, %245, %26 : vector<4x128xi32>
    %247 = arith.extui %246 : vector<4x128xi1> to vector<4x128xi32>
    %248 = arith.sitofp %247 : vector<4x128xi32> to vector<4x128xf32>
    %cst_64 = arith.constant dense<0xFF800000> : vector<4xf32>
    %249 = vector.multi_reduction <maximumf>, %229, %cst_64 [1] : vector<4x128xf32> to vector<4xf32>
    %250 = vector.shape_cast %249 : vector<4xf32> to vector<4x1xf32>
    %251 = vector.broadcast %250 : vector<4x1xf32> to vector<4x128xf32>
    %252 = arith.subf %229, %251 : vector<4x128xf32>
    %253 = math.exp %252 : vector<4x128xf32>
    %cst_65 = arith.constant dense<0.000000e+00> : vector<4x128xf32>
    %254 = tpu.matmul %253, %25, %cst_65 {dimension_numbers = #tpu.dot_dimension_numbers<[1], [0], [0], [1], [0, 0, 1, 1], [], []>} : vector<4x128xf32>, vector<128x128xf32>, vector<4x128xf32> -> vector<4x128xf32>
    %255 = math.log %254 : vector<4x128xf32>
    %256 = vector.broadcast %250 : vector<4x1xf32> to vector<4x128xf32>
    %257 = arith.addf %255, %256 : vector<4x128xf32>
    %258 = arith.addf %257, %242 : vector<4x128xf32>
    %cst_66 = arith.constant 0.000000e+00 : f32
    %259 = vector.broadcast %cst_66 : f32 to vector<4x1xf32>
    %260 = arith.cmpf ogt, %243, %259 : vector<4x1xf32>
    %261 = vector.shape_cast %260 : vector<4x1xi1> to vector<4x1xi1>
    %262 = vector.broadcast %261 : vector<4x1xi1> to vector<4x128xi1>
    %263 = arith.select %262, %258, %229 : vector<4x128xi1>, vector<4x128xf32>
    %cst_67 = arith.constant dense<0.000000e+00> : vector<4x128xf32>
    %264 = tpu.matmul %214, %24, %cst_67 {dimension_numbers = #tpu.dot_dimension_numbers<[1], [0], [0], [1], [0, 0, 1, 1], [], []>} : vector<4x128xf32>, vector<128x128xf32>, vector<4x128xf32> -> vector<4x128xf32>
    %265 = vector.broadcast %243 : vector<4x1xf32> to vector<4x128xf32>
    %266 = arith.mulf %265, %248 : vector<4x128xf32>
    %267 = arith.addf %264, %242 : vector<4x128xf32>
    %268 = arith.mulf %266, %267 : vector<4x128xf32>
    %269 = arith.addf %235, %268 : vector<4x128xf32>
    %cst_68 = arith.constant 0.000000e+00 : f32
    %270 = vector.broadcast %cst_68 : f32 to vector<4x1xf32>
    %271 = arith.cmpf ogt, %243, %270 : vector<4x1xf32>
    %272 = vector.shape_cast %271 : vector<4x1xi1> to vector<4x1xi1>
    %273 = vector.broadcast %272 : vector<4x1xi1> to vector<4x128xi1>
    %274 = arith.select %273, %248, %240 : vector<4x128xi1>, vector<4x128xf32>
    %275 = vector.extract_strided_slice %17 {offsets = [0, 8, 0], sizes = [4, 1, 128], strides = [1, 1, 1]} : vector<4x16x128xf32> to vector<4x1x128xf32>
    %276 = vector.shape_cast %275 : vector<4x1x128xf32> to vector<4x128xf32>
    %277 = vector.extract_strided_slice %22 {offsets = [0, 8], sizes = [4, 1], strides = [1, 1]} : vector<4x16xf32> to vector<4x1xf32>
    %278 = vector.extract_strided_slice %20 {offsets = [0, 8], sizes = [4, 1], strides = [1, 1]} : vector<4x16xi32> to vector<4x1xi32>
    %279 = vector.broadcast %278 : vector<4x1xi32> to vector<4x128xi32>
    %280 = arith.cmpi eq, %279, %26 : vector<4x128xi32>
    %281 = arith.extui %280 : vector<4x128xi1> to vector<4x128xi32>
    %282 = arith.sitofp %281 : vector<4x128xi32> to vector<4x128xf32>
    %cst_69 = arith.constant dense<0xFF800000> : vector<4xf32>
    %283 = vector.multi_reduction <maximumf>, %263, %cst_69 [1] : vector<4x128xf32> to vector<4xf32>
    %284 = vector.shape_cast %283 : vector<4xf32> to vector<4x1xf32>
    %285 = vector.broadcast %284 : vector<4x1xf32> to vector<4x128xf32>
    %286 = arith.subf %263, %285 : vector<4x128xf32>
    %287 = math.exp %286 : vector<4x128xf32>
    %cst_70 = arith.constant dense<0.000000e+00> : vector<4x128xf32>
    %288 = tpu.matmul %287, %25, %cst_70 {dimension_numbers = #tpu.dot_dimension_numbers<[1], [0], [0], [1], [0, 0, 1, 1], [], []>} : vector<4x128xf32>, vector<128x128xf32>, vector<4x128xf32> -> vector<4x128xf32>
    %289 = math.log %288 : vector<4x128xf32>
    %290 = vector.broadcast %284 : vector<4x1xf32> to vector<4x128xf32>
    %291 = arith.addf %289, %290 : vector<4x128xf32>
    %292 = arith.addf %291, %276 : vector<4x128xf32>
    %cst_71 = arith.constant 0.000000e+00 : f32
    %293 = vector.broadcast %cst_71 : f32 to vector<4x1xf32>
    %294 = arith.cmpf ogt, %277, %293 : vector<4x1xf32>
    %295 = vector.shape_cast %294 : vector<4x1xi1> to vector<4x1xi1>
    %296 = vector.broadcast %295 : vector<4x1xi1> to vector<4x128xi1>
    %297 = arith.select %296, %292, %263 : vector<4x128xi1>, vector<4x128xf32>
    %cst_72 = arith.constant dense<0.000000e+00> : vector<4x128xf32>
    %298 = tpu.matmul %248, %24, %cst_72 {dimension_numbers = #tpu.dot_dimension_numbers<[1], [0], [0], [1], [0, 0, 1, 1], [], []>} : vector<4x128xf32>, vector<128x128xf32>, vector<4x128xf32> -> vector<4x128xf32>
    %299 = vector.broadcast %277 : vector<4x1xf32> to vector<4x128xf32>
    %300 = arith.mulf %299, %282 : vector<4x128xf32>
    %301 = arith.addf %298, %276 : vector<4x128xf32>
    %302 = arith.mulf %300, %301 : vector<4x128xf32>
    %303 = arith.addf %269, %302 : vector<4x128xf32>
    %cst_73 = arith.constant 0.000000e+00 : f32
    %304 = vector.broadcast %cst_73 : f32 to vector<4x1xf32>
    %305 = arith.cmpf ogt, %277, %304 : vector<4x1xf32>
    %306 = vector.shape_cast %305 : vector<4x1xi1> to vector<4x1xi1>
    %307 = vector.broadcast %306 : vector<4x1xi1> to vector<4x128xi1>
    %308 = arith.select %307, %282, %274 : vector<4x128xi1>, vector<4x128xf32>
    %309 = vector.extract_strided_slice %17 {offsets = [0, 9, 0], sizes = [4, 1, 128], strides = [1, 1, 1]} : vector<4x16x128xf32> to vector<4x1x128xf32>
    %310 = vector.shape_cast %309 : vector<4x1x128xf32> to vector<4x128xf32>
    %311 = vector.extract_strided_slice %22 {offsets = [0, 9], sizes = [4, 1], strides = [1, 1]} : vector<4x16xf32> to vector<4x1xf32>
    %312 = vector.extract_strided_slice %20 {offsets = [0, 9], sizes = [4, 1], strides = [1, 1]} : vector<4x16xi32> to vector<4x1xi32>
    %313 = vector.broadcast %312 : vector<4x1xi32> to vector<4x128xi32>
    %314 = arith.cmpi eq, %313, %26 : vector<4x128xi32>
    %315 = arith.extui %314 : vector<4x128xi1> to vector<4x128xi32>
    %316 = arith.sitofp %315 : vector<4x128xi32> to vector<4x128xf32>
    %cst_74 = arith.constant dense<0xFF800000> : vector<4xf32>
    %317 = vector.multi_reduction <maximumf>, %297, %cst_74 [1] : vector<4x128xf32> to vector<4xf32>
    %318 = vector.shape_cast %317 : vector<4xf32> to vector<4x1xf32>
    %319 = vector.broadcast %318 : vector<4x1xf32> to vector<4x128xf32>
    %320 = arith.subf %297, %319 : vector<4x128xf32>
    %321 = math.exp %320 : vector<4x128xf32>
    %cst_75 = arith.constant dense<0.000000e+00> : vector<4x128xf32>
    %322 = tpu.matmul %321, %25, %cst_75 {dimension_numbers = #tpu.dot_dimension_numbers<[1], [0], [0], [1], [0, 0, 1, 1], [], []>} : vector<4x128xf32>, vector<128x128xf32>, vector<4x128xf32> -> vector<4x128xf32>
    %323 = math.log %322 : vector<4x128xf32>
    %324 = vector.broadcast %318 : vector<4x1xf32> to vector<4x128xf32>
    %325 = arith.addf %323, %324 : vector<4x128xf32>
    %326 = arith.addf %325, %310 : vector<4x128xf32>
    %cst_76 = arith.constant 0.000000e+00 : f32
    %327 = vector.broadcast %cst_76 : f32 to vector<4x1xf32>
    %328 = arith.cmpf ogt, %311, %327 : vector<4x1xf32>
    %329 = vector.shape_cast %328 : vector<4x1xi1> to vector<4x1xi1>
    %330 = vector.broadcast %329 : vector<4x1xi1> to vector<4x128xi1>
    %331 = arith.select %330, %326, %297 : vector<4x128xi1>, vector<4x128xf32>
    %cst_77 = arith.constant dense<0.000000e+00> : vector<4x128xf32>
    %332 = tpu.matmul %282, %24, %cst_77 {dimension_numbers = #tpu.dot_dimension_numbers<[1], [0], [0], [1], [0, 0, 1, 1], [], []>} : vector<4x128xf32>, vector<128x128xf32>, vector<4x128xf32> -> vector<4x128xf32>
    %333 = vector.broadcast %311 : vector<4x1xf32> to vector<4x128xf32>
    %334 = arith.mulf %333, %316 : vector<4x128xf32>
    %335 = arith.addf %332, %310 : vector<4x128xf32>
    %336 = arith.mulf %334, %335 : vector<4x128xf32>
    %337 = arith.addf %303, %336 : vector<4x128xf32>
    %cst_78 = arith.constant 0.000000e+00 : f32
    %338 = vector.broadcast %cst_78 : f32 to vector<4x1xf32>
    %339 = arith.cmpf ogt, %311, %338 : vector<4x1xf32>
    %340 = vector.shape_cast %339 : vector<4x1xi1> to vector<4x1xi1>
    %341 = vector.broadcast %340 : vector<4x1xi1> to vector<4x128xi1>
    %342 = arith.select %341, %316, %308 : vector<4x128xi1>, vector<4x128xf32>
    %343 = vector.extract_strided_slice %17 {offsets = [0, 10, 0], sizes = [4, 1, 128], strides = [1, 1, 1]} : vector<4x16x128xf32> to vector<4x1x128xf32>
    %344 = vector.shape_cast %343 : vector<4x1x128xf32> to vector<4x128xf32>
    %345 = vector.extract_strided_slice %22 {offsets = [0, 10], sizes = [4, 1], strides = [1, 1]} : vector<4x16xf32> to vector<4x1xf32>
    %346 = vector.extract_strided_slice %20 {offsets = [0, 10], sizes = [4, 1], strides = [1, 1]} : vector<4x16xi32> to vector<4x1xi32>
    %347 = vector.broadcast %346 : vector<4x1xi32> to vector<4x128xi32>
    %348 = arith.cmpi eq, %347, %26 : vector<4x128xi32>
    %349 = arith.extui %348 : vector<4x128xi1> to vector<4x128xi32>
    %350 = arith.sitofp %349 : vector<4x128xi32> to vector<4x128xf32>
    %cst_79 = arith.constant dense<0xFF800000> : vector<4xf32>
    %351 = vector.multi_reduction <maximumf>, %331, %cst_79 [1] : vector<4x128xf32> to vector<4xf32>
    %352 = vector.shape_cast %351 : vector<4xf32> to vector<4x1xf32>
    %353 = vector.broadcast %352 : vector<4x1xf32> to vector<4x128xf32>
    %354 = arith.subf %331, %353 : vector<4x128xf32>
    %355 = math.exp %354 : vector<4x128xf32>
    %cst_80 = arith.constant dense<0.000000e+00> : vector<4x128xf32>
    %356 = tpu.matmul %355, %25, %cst_80 {dimension_numbers = #tpu.dot_dimension_numbers<[1], [0], [0], [1], [0, 0, 1, 1], [], []>} : vector<4x128xf32>, vector<128x128xf32>, vector<4x128xf32> -> vector<4x128xf32>
    %357 = math.log %356 : vector<4x128xf32>
    %358 = vector.broadcast %352 : vector<4x1xf32> to vector<4x128xf32>
    %359 = arith.addf %357, %358 : vector<4x128xf32>
    %360 = arith.addf %359, %344 : vector<4x128xf32>
    %cst_81 = arith.constant 0.000000e+00 : f32
    %361 = vector.broadcast %cst_81 : f32 to vector<4x1xf32>
    %362 = arith.cmpf ogt, %345, %361 : vector<4x1xf32>
    %363 = vector.shape_cast %362 : vector<4x1xi1> to vector<4x1xi1>
    %364 = vector.broadcast %363 : vector<4x1xi1> to vector<4x128xi1>
    %365 = arith.select %364, %360, %331 : vector<4x128xi1>, vector<4x128xf32>
    %cst_82 = arith.constant dense<0.000000e+00> : vector<4x128xf32>
    %366 = tpu.matmul %316, %24, %cst_82 {dimension_numbers = #tpu.dot_dimension_numbers<[1], [0], [0], [1], [0, 0, 1, 1], [], []>} : vector<4x128xf32>, vector<128x128xf32>, vector<4x128xf32> -> vector<4x128xf32>
    %367 = vector.broadcast %345 : vector<4x1xf32> to vector<4x128xf32>
    %368 = arith.mulf %367, %350 : vector<4x128xf32>
    %369 = arith.addf %366, %344 : vector<4x128xf32>
    %370 = arith.mulf %368, %369 : vector<4x128xf32>
    %371 = arith.addf %337, %370 : vector<4x128xf32>
    %cst_83 = arith.constant 0.000000e+00 : f32
    %372 = vector.broadcast %cst_83 : f32 to vector<4x1xf32>
    %373 = arith.cmpf ogt, %345, %372 : vector<4x1xf32>
    %374 = vector.shape_cast %373 : vector<4x1xi1> to vector<4x1xi1>
    %375 = vector.broadcast %374 : vector<4x1xi1> to vector<4x128xi1>
    %376 = arith.select %375, %350, %342 : vector<4x128xi1>, vector<4x128xf32>
    %377 = vector.extract_strided_slice %17 {offsets = [0, 11, 0], sizes = [4, 1, 128], strides = [1, 1, 1]} : vector<4x16x128xf32> to vector<4x1x128xf32>
    %378 = vector.shape_cast %377 : vector<4x1x128xf32> to vector<4x128xf32>
    %379 = vector.extract_strided_slice %22 {offsets = [0, 11], sizes = [4, 1], strides = [1, 1]} : vector<4x16xf32> to vector<4x1xf32>
    %380 = vector.extract_strided_slice %20 {offsets = [0, 11], sizes = [4, 1], strides = [1, 1]} : vector<4x16xi32> to vector<4x1xi32>
    %381 = vector.broadcast %380 : vector<4x1xi32> to vector<4x128xi32>
    %382 = arith.cmpi eq, %381, %26 : vector<4x128xi32>
    %383 = arith.extui %382 : vector<4x128xi1> to vector<4x128xi32>
    %384 = arith.sitofp %383 : vector<4x128xi32> to vector<4x128xf32>
    %cst_84 = arith.constant dense<0xFF800000> : vector<4xf32>
    %385 = vector.multi_reduction <maximumf>, %365, %cst_84 [1] : vector<4x128xf32> to vector<4xf32>
    %386 = vector.shape_cast %385 : vector<4xf32> to vector<4x1xf32>
    %387 = vector.broadcast %386 : vector<4x1xf32> to vector<4x128xf32>
    %388 = arith.subf %365, %387 : vector<4x128xf32>
    %389 = math.exp %388 : vector<4x128xf32>
    %cst_85 = arith.constant dense<0.000000e+00> : vector<4x128xf32>
    %390 = tpu.matmul %389, %25, %cst_85 {dimension_numbers = #tpu.dot_dimension_numbers<[1], [0], [0], [1], [0, 0, 1, 1], [], []>} : vector<4x128xf32>, vector<128x128xf32>, vector<4x128xf32> -> vector<4x128xf32>
    %391 = math.log %390 : vector<4x128xf32>
    %392 = vector.broadcast %386 : vector<4x1xf32> to vector<4x128xf32>
    %393 = arith.addf %391, %392 : vector<4x128xf32>
    %394 = arith.addf %393, %378 : vector<4x128xf32>
    %cst_86 = arith.constant 0.000000e+00 : f32
    %395 = vector.broadcast %cst_86 : f32 to vector<4x1xf32>
    %396 = arith.cmpf ogt, %379, %395 : vector<4x1xf32>
    %397 = vector.shape_cast %396 : vector<4x1xi1> to vector<4x1xi1>
    %398 = vector.broadcast %397 : vector<4x1xi1> to vector<4x128xi1>
    %399 = arith.select %398, %394, %365 : vector<4x128xi1>, vector<4x128xf32>
    %cst_87 = arith.constant dense<0.000000e+00> : vector<4x128xf32>
    %400 = tpu.matmul %350, %24, %cst_87 {dimension_numbers = #tpu.dot_dimension_numbers<[1], [0], [0], [1], [0, 0, 1, 1], [], []>} : vector<4x128xf32>, vector<128x128xf32>, vector<4x128xf32> -> vector<4x128xf32>
    %401 = vector.broadcast %379 : vector<4x1xf32> to vector<4x128xf32>
    %402 = arith.mulf %401, %384 : vector<4x128xf32>
    %403 = arith.addf %400, %378 : vector<4x128xf32>
    %404 = arith.mulf %402, %403 : vector<4x128xf32>
    %405 = arith.addf %371, %404 : vector<4x128xf32>
    %cst_88 = arith.constant 0.000000e+00 : f32
    %406 = vector.broadcast %cst_88 : f32 to vector<4x1xf32>
    %407 = arith.cmpf ogt, %379, %406 : vector<4x1xf32>
    %408 = vector.shape_cast %407 : vector<4x1xi1> to vector<4x1xi1>
    %409 = vector.broadcast %408 : vector<4x1xi1> to vector<4x128xi1>
    %410 = arith.select %409, %384, %376 : vector<4x128xi1>, vector<4x128xf32>
    %411 = vector.extract_strided_slice %17 {offsets = [0, 12, 0], sizes = [4, 1, 128], strides = [1, 1, 1]} : vector<4x16x128xf32> to vector<4x1x128xf32>
    %412 = vector.shape_cast %411 : vector<4x1x128xf32> to vector<4x128xf32>
    %413 = vector.extract_strided_slice %22 {offsets = [0, 12], sizes = [4, 1], strides = [1, 1]} : vector<4x16xf32> to vector<4x1xf32>
    %414 = vector.extract_strided_slice %20 {offsets = [0, 12], sizes = [4, 1], strides = [1, 1]} : vector<4x16xi32> to vector<4x1xi32>
    %415 = vector.broadcast %414 : vector<4x1xi32> to vector<4x128xi32>
    %416 = arith.cmpi eq, %415, %26 : vector<4x128xi32>
    %417 = arith.extui %416 : vector<4x128xi1> to vector<4x128xi32>
    %418 = arith.sitofp %417 : vector<4x128xi32> to vector<4x128xf32>
    %cst_89 = arith.constant dense<0xFF800000> : vector<4xf32>
    %419 = vector.multi_reduction <maximumf>, %399, %cst_89 [1] : vector<4x128xf32> to vector<4xf32>
    %420 = vector.shape_cast %419 : vector<4xf32> to vector<4x1xf32>
    %421 = vector.broadcast %420 : vector<4x1xf32> to vector<4x128xf32>
    %422 = arith.subf %399, %421 : vector<4x128xf32>
    %423 = math.exp %422 : vector<4x128xf32>
    %cst_90 = arith.constant dense<0.000000e+00> : vector<4x128xf32>
    %424 = tpu.matmul %423, %25, %cst_90 {dimension_numbers = #tpu.dot_dimension_numbers<[1], [0], [0], [1], [0, 0, 1, 1], [], []>} : vector<4x128xf32>, vector<128x128xf32>, vector<4x128xf32> -> vector<4x128xf32>
    %425 = math.log %424 : vector<4x128xf32>
    %426 = vector.broadcast %420 : vector<4x1xf32> to vector<4x128xf32>
    %427 = arith.addf %425, %426 : vector<4x128xf32>
    %428 = arith.addf %427, %412 : vector<4x128xf32>
    %cst_91 = arith.constant 0.000000e+00 : f32
    %429 = vector.broadcast %cst_91 : f32 to vector<4x1xf32>
    %430 = arith.cmpf ogt, %413, %429 : vector<4x1xf32>
    %431 = vector.shape_cast %430 : vector<4x1xi1> to vector<4x1xi1>
    %432 = vector.broadcast %431 : vector<4x1xi1> to vector<4x128xi1>
    %433 = arith.select %432, %428, %399 : vector<4x128xi1>, vector<4x128xf32>
    %cst_92 = arith.constant dense<0.000000e+00> : vector<4x128xf32>
    %434 = tpu.matmul %384, %24, %cst_92 {dimension_numbers = #tpu.dot_dimension_numbers<[1], [0], [0], [1], [0, 0, 1, 1], [], []>} : vector<4x128xf32>, vector<128x128xf32>, vector<4x128xf32> -> vector<4x128xf32>
    %435 = vector.broadcast %413 : vector<4x1xf32> to vector<4x128xf32>
    %436 = arith.mulf %435, %418 : vector<4x128xf32>
    %437 = arith.addf %434, %412 : vector<4x128xf32>
    %438 = arith.mulf %436, %437 : vector<4x128xf32>
    %439 = arith.addf %405, %438 : vector<4x128xf32>
    %cst_93 = arith.constant 0.000000e+00 : f32
    %440 = vector.broadcast %cst_93 : f32 to vector<4x1xf32>
    %441 = arith.cmpf ogt, %413, %440 : vector<4x1xf32>
    %442 = vector.shape_cast %441 : vector<4x1xi1> to vector<4x1xi1>
    %443 = vector.broadcast %442 : vector<4x1xi1> to vector<4x128xi1>
    %444 = arith.select %443, %418, %410 : vector<4x128xi1>, vector<4x128xf32>
    %445 = vector.extract_strided_slice %17 {offsets = [0, 13, 0], sizes = [4, 1, 128], strides = [1, 1, 1]} : vector<4x16x128xf32> to vector<4x1x128xf32>
    %446 = vector.shape_cast %445 : vector<4x1x128xf32> to vector<4x128xf32>
    %447 = vector.extract_strided_slice %22 {offsets = [0, 13], sizes = [4, 1], strides = [1, 1]} : vector<4x16xf32> to vector<4x1xf32>
    %448 = vector.extract_strided_slice %20 {offsets = [0, 13], sizes = [4, 1], strides = [1, 1]} : vector<4x16xi32> to vector<4x1xi32>
    %449 = vector.broadcast %448 : vector<4x1xi32> to vector<4x128xi32>
    %450 = arith.cmpi eq, %449, %26 : vector<4x128xi32>
    %451 = arith.extui %450 : vector<4x128xi1> to vector<4x128xi32>
    %452 = arith.sitofp %451 : vector<4x128xi32> to vector<4x128xf32>
    %cst_94 = arith.constant dense<0xFF800000> : vector<4xf32>
    %453 = vector.multi_reduction <maximumf>, %433, %cst_94 [1] : vector<4x128xf32> to vector<4xf32>
    %454 = vector.shape_cast %453 : vector<4xf32> to vector<4x1xf32>
    %455 = vector.broadcast %454 : vector<4x1xf32> to vector<4x128xf32>
    %456 = arith.subf %433, %455 : vector<4x128xf32>
    %457 = math.exp %456 : vector<4x128xf32>
    %cst_95 = arith.constant dense<0.000000e+00> : vector<4x128xf32>
    %458 = tpu.matmul %457, %25, %cst_95 {dimension_numbers = #tpu.dot_dimension_numbers<[1], [0], [0], [1], [0, 0, 1, 1], [], []>} : vector<4x128xf32>, vector<128x128xf32>, vector<4x128xf32> -> vector<4x128xf32>
    %459 = math.log %458 : vector<4x128xf32>
    %460 = vector.broadcast %454 : vector<4x1xf32> to vector<4x128xf32>
    %461 = arith.addf %459, %460 : vector<4x128xf32>
    %462 = arith.addf %461, %446 : vector<4x128xf32>
    %cst_96 = arith.constant 0.000000e+00 : f32
    %463 = vector.broadcast %cst_96 : f32 to vector<4x1xf32>
    %464 = arith.cmpf ogt, %447, %463 : vector<4x1xf32>
    %465 = vector.shape_cast %464 : vector<4x1xi1> to vector<4x1xi1>
    %466 = vector.broadcast %465 : vector<4x1xi1> to vector<4x128xi1>
    %467 = arith.select %466, %462, %433 : vector<4x128xi1>, vector<4x128xf32>
    %cst_97 = arith.constant dense<0.000000e+00> : vector<4x128xf32>
    %468 = tpu.matmul %418, %24, %cst_97 {dimension_numbers = #tpu.dot_dimension_numbers<[1], [0], [0], [1], [0, 0, 1, 1], [], []>} : vector<4x128xf32>, vector<128x128xf32>, vector<4x128xf32> -> vector<4x128xf32>
    %469 = vector.broadcast %447 : vector<4x1xf32> to vector<4x128xf32>
    %470 = arith.mulf %469, %452 : vector<4x128xf32>
    %471 = arith.addf %468, %446 : vector<4x128xf32>
    %472 = arith.mulf %470, %471 : vector<4x128xf32>
    %473 = arith.addf %439, %472 : vector<4x128xf32>
    %cst_98 = arith.constant 0.000000e+00 : f32
    %474 = vector.broadcast %cst_98 : f32 to vector<4x1xf32>
    %475 = arith.cmpf ogt, %447, %474 : vector<4x1xf32>
    %476 = vector.shape_cast %475 : vector<4x1xi1> to vector<4x1xi1>
    %477 = vector.broadcast %476 : vector<4x1xi1> to vector<4x128xi1>
    %478 = arith.select %477, %452, %444 : vector<4x128xi1>, vector<4x128xf32>
    %479 = vector.extract_strided_slice %17 {offsets = [0, 14, 0], sizes = [4, 1, 128], strides = [1, 1, 1]} : vector<4x16x128xf32> to vector<4x1x128xf32>
    %480 = vector.shape_cast %479 : vector<4x1x128xf32> to vector<4x128xf32>
    %481 = vector.extract_strided_slice %22 {offsets = [0, 14], sizes = [4, 1], strides = [1, 1]} : vector<4x16xf32> to vector<4x1xf32>
    %482 = vector.extract_strided_slice %20 {offsets = [0, 14], sizes = [4, 1], strides = [1, 1]} : vector<4x16xi32> to vector<4x1xi32>
    %483 = vector.broadcast %482 : vector<4x1xi32> to vector<4x128xi32>
    %484 = arith.cmpi eq, %483, %26 : vector<4x128xi32>
    %485 = arith.extui %484 : vector<4x128xi1> to vector<4x128xi32>
    %486 = arith.sitofp %485 : vector<4x128xi32> to vector<4x128xf32>
    %cst_99 = arith.constant dense<0xFF800000> : vector<4xf32>
    %487 = vector.multi_reduction <maximumf>, %467, %cst_99 [1] : vector<4x128xf32> to vector<4xf32>
    %488 = vector.shape_cast %487 : vector<4xf32> to vector<4x1xf32>
    %489 = vector.broadcast %488 : vector<4x1xf32> to vector<4x128xf32>
    %490 = arith.subf %467, %489 : vector<4x128xf32>
    %491 = math.exp %490 : vector<4x128xf32>
    %cst_100 = arith.constant dense<0.000000e+00> : vector<4x128xf32>
    %492 = tpu.matmul %491, %25, %cst_100 {dimension_numbers = #tpu.dot_dimension_numbers<[1], [0], [0], [1], [0, 0, 1, 1], [], []>} : vector<4x128xf32>, vector<128x128xf32>, vector<4x128xf32> -> vector<4x128xf32>
    %493 = math.log %492 : vector<4x128xf32>
    %494 = vector.broadcast %488 : vector<4x1xf32> to vector<4x128xf32>
    %495 = arith.addf %493, %494 : vector<4x128xf32>
    %496 = arith.addf %495, %480 : vector<4x128xf32>
    %cst_101 = arith.constant 0.000000e+00 : f32
    %497 = vector.broadcast %cst_101 : f32 to vector<4x1xf32>
    %498 = arith.cmpf ogt, %481, %497 : vector<4x1xf32>
    %499 = vector.shape_cast %498 : vector<4x1xi1> to vector<4x1xi1>
    %500 = vector.broadcast %499 : vector<4x1xi1> to vector<4x128xi1>
    %501 = arith.select %500, %496, %467 : vector<4x128xi1>, vector<4x128xf32>
    %cst_102 = arith.constant dense<0.000000e+00> : vector<4x128xf32>
    %502 = tpu.matmul %452, %24, %cst_102 {dimension_numbers = #tpu.dot_dimension_numbers<[1], [0], [0], [1], [0, 0, 1, 1], [], []>} : vector<4x128xf32>, vector<128x128xf32>, vector<4x128xf32> -> vector<4x128xf32>
    %503 = vector.broadcast %481 : vector<4x1xf32> to vector<4x128xf32>
    %504 = arith.mulf %503, %486 : vector<4x128xf32>
    %505 = arith.addf %502, %480 : vector<4x128xf32>
    %506 = arith.mulf %504, %505 : vector<4x128xf32>
    %507 = arith.addf %473, %506 : vector<4x128xf32>
    %cst_103 = arith.constant 0.000000e+00 : f32
    %508 = vector.broadcast %cst_103 : f32 to vector<4x1xf32>
    %509 = arith.cmpf ogt, %481, %508 : vector<4x1xf32>
    %510 = vector.shape_cast %509 : vector<4x1xi1> to vector<4x1xi1>
    %511 = vector.broadcast %510 : vector<4x1xi1> to vector<4x128xi1>
    %512 = arith.select %511, %486, %478 : vector<4x128xi1>, vector<4x128xf32>
    %513 = vector.extract_strided_slice %17 {offsets = [0, 15, 0], sizes = [4, 1, 128], strides = [1, 1, 1]} : vector<4x16x128xf32> to vector<4x1x128xf32>
    %514 = vector.shape_cast %513 : vector<4x1x128xf32> to vector<4x128xf32>
    %515 = vector.extract_strided_slice %22 {offsets = [0, 15], sizes = [4, 1], strides = [1, 1]} : vector<4x16xf32> to vector<4x1xf32>
    %516 = vector.extract_strided_slice %20 {offsets = [0, 15], sizes = [4, 1], strides = [1, 1]} : vector<4x16xi32> to vector<4x1xi32>
    %517 = vector.broadcast %516 : vector<4x1xi32> to vector<4x128xi32>
    %518 = arith.cmpi eq, %517, %26 : vector<4x128xi32>
    %519 = arith.extui %518 : vector<4x128xi1> to vector<4x128xi32>
    %520 = arith.sitofp %519 : vector<4x128xi32> to vector<4x128xf32>
    %cst_104 = arith.constant dense<0xFF800000> : vector<4xf32>
    %521 = vector.multi_reduction <maximumf>, %501, %cst_104 [1] : vector<4x128xf32> to vector<4xf32>
    %522 = vector.shape_cast %521 : vector<4xf32> to vector<4x1xf32>
    %523 = vector.broadcast %522 : vector<4x1xf32> to vector<4x128xf32>
    %524 = arith.subf %501, %523 : vector<4x128xf32>
    %525 = math.exp %524 : vector<4x128xf32>
    %cst_105 = arith.constant dense<0.000000e+00> : vector<4x128xf32>
    %526 = tpu.matmul %525, %25, %cst_105 {dimension_numbers = #tpu.dot_dimension_numbers<[1], [0], [0], [1], [0, 0, 1, 1], [], []>} : vector<4x128xf32>, vector<128x128xf32>, vector<4x128xf32> -> vector<4x128xf32>
    %527 = math.log %526 : vector<4x128xf32>
    %528 = vector.broadcast %522 : vector<4x1xf32> to vector<4x128xf32>
    %529 = arith.addf %527, %528 : vector<4x128xf32>
    %530 = arith.addf %529, %514 : vector<4x128xf32>
    %cst_106 = arith.constant 0.000000e+00 : f32
    %531 = vector.broadcast %cst_106 : f32 to vector<4x1xf32>
    %532 = arith.cmpf ogt, %515, %531 : vector<4x1xf32>
    %533 = vector.shape_cast %532 : vector<4x1xi1> to vector<4x1xi1>
    %534 = vector.broadcast %533 : vector<4x1xi1> to vector<4x128xi1>
    %535 = arith.select %534, %530, %501 : vector<4x128xi1>, vector<4x128xf32>
    %cst_107 = arith.constant dense<0.000000e+00> : vector<4x128xf32>
    %536 = tpu.matmul %486, %24, %cst_107 {dimension_numbers = #tpu.dot_dimension_numbers<[1], [0], [0], [1], [0, 0, 1, 1], [], []>} : vector<4x128xf32>, vector<128x128xf32>, vector<4x128xf32> -> vector<4x128xf32>
    %537 = vector.broadcast %515 : vector<4x1xf32> to vector<4x128xf32>
    %538 = arith.mulf %537, %520 : vector<4x128xf32>
    %539 = arith.addf %536, %514 : vector<4x128xf32>
    %540 = arith.mulf %538, %539 : vector<4x128xf32>
    %541 = arith.addf %507, %540 : vector<4x128xf32>
    %cst_108 = arith.constant 0.000000e+00 : f32
    %542 = vector.broadcast %cst_108 : f32 to vector<4x1xf32>
    %543 = arith.cmpf ogt, %515, %542 : vector<4x1xf32>
    %544 = vector.shape_cast %543 : vector<4x1xi1> to vector<4x1xi1>
    %545 = vector.broadcast %544 : vector<4x1xi1> to vector<4x128xi1>
    %546 = arith.select %545, %520, %512 : vector<4x128xi1>, vector<4x128xf32>
    %c0_109 = arith.constant 0 : index
    %c0_110 = arith.constant 0 : index
    %547 = vector.load %arg13[%c0_109, %c0_110] : memref<4x128xf32, #tpu.memory_space<vmem>>, vector<4x128xf32>
    tpu.vector_store %arg13[%c0_109, %c0_110], %535 {strides = array<i32>} : memref<4x128xf32, #tpu.memory_space<vmem>>, vector<4x128xf32>,
    %c0_111 = arith.constant 0 : index
    %c0_112 = arith.constant 0 : index
    %548 = vector.load %arg14[%c0_111, %c0_112] : memref<4x128xf32, #tpu.memory_space<vmem>>, vector<4x128xf32>
    tpu.vector_store %arg14[%c0_111, %c0_112], %541 {strides = array<i32>} : memref<4x128xf32, #tpu.memory_space<vmem>>, vector<4x128xf32>,
    %c0_113 = arith.constant 0 : index
    %c0_114 = arith.constant 0 : index
    %549 = vector.load %arg15[%c0_113, %c0_114] : memref<4x128xf32, #tpu.memory_space<vmem>>, vector<4x128xf32>
    tpu.vector_store %arg15[%c0_113, %c0_114], %546 {strides = array<i32>} : memref<4x128xf32, #tpu.memory_space<vmem>>, vector<4x128xf32>,
    %c0_115 = arith.constant 0 : index
    %c0_116 = arith.constant 0 : index
    %550 = vector.load %arg16[%c0_115, %c0_116] : memref<4x128xf32, #tpu.memory_space<vmem>>, vector<4x128xf32>
    tpu.vector_store %arg16[%c0_115, %c0_116], %520 {strides = array<i32>} : memref<4x128xf32, #tpu.memory_space<vmem>>, vector<4x128xf32>,
    %c1_i32 = arith.constant 1 : i32
    %551 = arith.cmpi eq, %arg1, %c1_i32 : i32
    %552 = arith.extui %551 : i1 to i32
    %c0_i32_117 = arith.constant 0 : i32
    %553 = arith.cmpi ne, %552, %c0_i32_117 : i32
    scf.if %553 {
      %c0_118 = arith.constant 0 : index
      %c0_119 = arith.constant 0 : index
      %554 = vector.load %arg8[%c0_118, %c0_119] : memref<1x128xf32, #tpu.memory_space<vmem>>, vector<1x128xf32>
      %c0_120 = arith.constant 0 : index
      %c0_121 = arith.constant 0 : index
      %555 = vector.load %arg14[%c0_120, %c0_121] : memref<4x128xf32, #tpu.memory_space<vmem>>, vector<4x128xf32>
      %c0_122 = arith.constant 0 : index
      %c0_123 = arith.constant 0 : index
      %556 = vector.load %arg15[%c0_122, %c0_123] : memref<4x128xf32, #tpu.memory_space<vmem>>, vector<4x128xf32>
      %557 = vector.broadcast %554 : vector<1x128xf32> to vector<4x128xf32>
      %558 = arith.mulf %556, %557 : vector<4x128xf32>
      %559 = arith.addf %555, %558 : vector<4x128xf32>
      %cst_124 = arith.constant dense<0.000000e+00> : vector<4xf32>
      %560 = vector.multi_reduction <add>, %559, %cst_124 [1] : vector<4x128xf32> to vector<4xf32>
      %561 = vector.shape_cast %560 : vector<4xf32> to vector<4x1xf32>
      %c0_125 = arith.constant 0 : index
      %c0_126 = arith.constant 0 : index
      %562 = vector.load %arg13[%c0_125, %c0_126] : memref<4x128xf32, #tpu.memory_space<vmem>>, vector<4x128xf32>
      %563 = vector.broadcast %554 : vector<1x128xf32> to vector<4x128xf32>
      %564 = arith.addf %562, %563 : vector<4x128xf32>
      %cst_127 = arith.constant dense<0xFF800000> : vector<4xf32>
      %565 = vector.multi_reduction <maximumf>, %564, %cst_127 [1] : vector<4x128xf32> to vector<4xf32>
      %566 = vector.shape_cast %565 : vector<4xf32> to vector<4x1xf32>
      %567 = vector.broadcast %566 : vector<4x1xf32> to vector<4x128xf32>
      %568 = arith.subf %564, %567 : vector<4x128xf32>
      %569 = math.exp %568 : vector<4x128xf32>
      %cst_128 = arith.constant dense<0.000000e+00> : vector<4xf32>
      %570 = vector.multi_reduction <add>, %569, %cst_128 [1] : vector<4x128xf32> to vector<4xf32>
      %571 = vector.shape_cast %570 : vector<4xf32> to vector<4x1xf32>
      %572 = math.log %571 : vector<4x1xf32>
      %573 = arith.addf %572, %566 : vector<4x1xf32>
      %574 = arith.subf %561, %573 : vector<4x1xf32>
      %575 = vector.shape_cast %574 : vector<4x1xf32> to vector<4x1xf32>
      %576 = vector.broadcast %575 : vector<4x1xf32> to vector<4x128xf32>
      %c0_129 = arith.constant 0 : index
      %c0_130 = arith.constant 0 : index
      %577 = vector.load %arg11[%c0_129, %c0_130] : memref<4x128xf32, #tpu.memory_space<vmem>>, vector<4x128xf32>
      tpu.vector_store %arg11[%c0_129, %c0_130], %576 {strides = array<i32>} : memref<4x128xf32, #tpu.memory_space<vmem>>, vector<4x128xf32>,
    } else {
    }
    return
  }
  func.func @transform_0(%arg0: i32, %arg1: i32) -> (i32, i32, i32) {
    %c0_i32 = arith.constant 0 : i32
    %c0_i32_0 = arith.constant 0 : i32
    return %arg0, %arg1, %c0_i32 : i32, i32, i32
  }
  func.func @transform_1(%arg0: i32, %arg1: i32) -> (i32, i32) {
    %c0_i32 = arith.constant 0 : i32
    %c0_i32_0 = arith.constant 0 : i32
    %c0_i32_1 = arith.constant 0 : i32
    return %c0_i32, %c0_i32_0 : i32, i32
  }
  func.func @transform_2(%arg0: i32, %arg1: i32) -> (i32, i32) {
    %c0_i32 = arith.constant 0 : i32
    %c0_i32_0 = arith.constant 0 : i32
    %c0_i32_1 = arith.constant 0 : i32
    return %c0_i32, %c0_i32_0 : i32, i32
  }
  func.func @transform_3(%arg0: i32, %arg1: i32) -> (i32, i32, i32) {
    %c0_i32 = arith.constant 0 : i32
    %c0_i32_0 = arith.constant 0 : i32
    return %arg1, %arg0, %c0_i32 : i32, i32, i32
  }
  func.func @transform_4(%arg0: i32, %arg1: i32) -> (i32, i32, i32) {
    %c0_i32 = arith.constant 0 : i32
    %c0_i32_0 = arith.constant 0 : i32
    return %arg1, %arg0, %c0_i32 : i32, i32, i32
  }
  func.func @transform_5(%arg0: i32, %arg1: i32) -> (i32, i32) {
    %c0_i32 = arith.constant 0 : i32
    %c0_i32_0 = arith.constant 0 : i32
    %c0_i32_1 = arith.constant 0 : i32
    return %c0_i32, %c0_i32_0 : i32, i32
  }
  func.func @transform_6(%arg0: i32, %arg1: i32) -> (i32, i32) {
    %c0_i32 = arith.constant 0 : i32
    %c0_i32_0 = arith.constant 0 : i32
    %c0_i32_1 = arith.constant 0 : i32
    return %c0_i32, %c0_i32_0 : i32, i32
  }
  func.func @transform_7(%arg0: i32, %arg1: i32) -> (i32, i32) {
    %c0_i32 = arith.constant 0 : i32
    %c0_i32_0 = arith.constant 0 : i32
    %c0_i32_1 = arith.constant 0 : i32
    return %c0_i32, %c0_i32_0 : i32, i32
  }
  func.func @transform_8(%arg0: i32, %arg1: i32) -> (i32, i32) {
    %c0_i32 = arith.constant 0 : i32
    %c0_i32_0 = arith.constant 0 : i32
    %c0_i32_1 = arith.constant 0 : i32
    return %c0_i32, %c0_i32_0 : i32, i32
  }
  func.func @transform_9(%arg0: i32, %arg1: i32) -> (i32, i32) {
    %c0_i32 = arith.constant 0 : i32
    %c0_i32_0 = arith.constant 0 : i32
    return %arg0, %c0_i32 : i32, i32
  }
  func.func @transform_10(%arg0: i32, %arg1: i32) -> (i32, i32, i32) {
    %c0_i32 = arith.constant 0 : i32
    %c0_i32_0 = arith.constant 0 : i32
    return %arg0, %arg1, %c0_i32 : i32, i32, i32
  }
}

</mosaic_0001>

<bundles_post_ra>
// kernel: tpu_custom_call.1
= control target key start
LH: loop header
LB: loop body
LE: loop exit
PB: predicated region body
PF: predicated region fallthrough
CT: control target
= control target key end

     0   :  { %s8497_s0 = inlined_call_operand.hbm [shape: bf16[4,32,32], index: 0, kind: input, shape index: {}]   ;;  %s8498_s1 = inlined_call_operand.hbm [shape: bf16[32,128], index: 1, kind: input, shape index: {}]   ;;  %s8499_s2 = inlined_call_operand.vmem [shape: f32[1,128], index: 2, kind: input, shape index: {}]   ;;  %s8500_s3 = inlined_call_operand.hbm [shape: s32[2,4,16], index: 3, kind: input, shape index: {}]   ;;  %s8501_s4 = inlined_call_operand.hbm [shape: f32[2,4,16], index: 4, kind: input, shape index: {}]   ;;  %s8502_s5 = inlined_call_operand.vmem [shape: f32[1,128], index: 5, kind: input, shape index: {}]   ;;  %s8503_s6 = inlined_call_operand.vmem [shape: f32[1,128], index: 6, kind: input, shape index: {}]   ;;  %s8504_s7 = inlined_call_operand.hbm [shape: f32[128,128], index: 7, kind: input, shape index: {}]   ;;  %s8505_s8 = inlined_call_operand.hbm [shape: f32[128,128], index: 8, kind: input, shape index: {}]   ;;  %s8506_s9 = inlined_call_operand.hbm [shape: f32[4,128], index: 9, kind: output, shape index: {0}]   ;;  %s8507_s10 = inlined_call_operand.hbm [shape: f32[4,32,128], index: 10, kind: output, shape index: {1}]  }
   0x1   :  { %8585 = sst [smem:[#allocation70_spill]] %s8497_s0 }
   0x2   :  { %8586 = sst [smem:[#allocation71_spill]] %s8498_s1 }
   0x3   :  { %8587 = sst [smem:[#allocation72_spill]] %s8504_s7 }
   0x4   :  { %8588 = sst [smem:[#allocation73_spill]] %s8505_s8 }
   0x5   :  { %8589 = sst [smem:[#allocation74_spill]] %s8507_s10 }
   0x6   :  { %16 = vsyncpa [#allocation7], 0 }
   0x7   :  { %18 = vsyncpa [#allocation7 + $0x1], 0 }
   0x8   :  { %19 = vsyncpa [#allocation10], 0 }
   0x9   :  { %20 = vsyncpa [#allocation15], 0 }
   0xa   :  { %21 = vsyncpa [#allocation8], 0 }
   0xb   :  { %22 = vsyncpa [#allocation18], 0 }
   0xc   :  { %24 = vsyncpa [#allocation18 + $0x1], 0  ;;  %s6373_s13 = smov 0   ;;  %s6375_s14 = smov 0  }
   0xd   :  { %s6377_s15 = smov 0   ;;  %s6379_s16 = smov 0  }
   0xe   :  { %s6381_s17 = smov 0   ;;  %s6383_s18 = smov 0  }
   0xf LB: > { %8590 = sst [smem:[#allocation31_spill]] %s6249_s13  ;;  %s6404_s19 = sadd.s32 4294967295, %s6269_s18   ;;  %s6269_s18 = sphi %s6383_s18, %s30_s18   ;;  %s6265_s17 = sphi %s6381_s17, %s8716_s17   ;;  %s6261_s16 = sphi %s6379_s16, %s8715_s16   ;;  %s6257_s15 = sphi %s6377_s15, %s8711_s15   ;;  %s6253_s14 = sphi %s6375_s14, %s8714_s14   ;;  %s6249_s13 = sphi %s6373_s13, %s8713_s13  }
  0x10   : > { %8591 = sst [smem:[#allocation32_spill]] %s6257_s15  ;;  %s3970_s20 = sadd.s32 4294967294, %s6269_s18  }
  0x11   : > { %8592 = sst [smem:[#allocation33_spill]] %s6269_s18  ;;  %s39_s21 = sadd.s32 1, %s6265_s17 }
  0x12   : > { %s51_s22 = sadd.s32 1, %s6257_s15  ;;  %p40_p0 = scmp.ge.s32.totalorder %s39_s21, 2 }
  0x13   : > { %p58_p1 = scmp.ne.s32.totalorder %s6257_s15, %s6253_s14  ;;  %p59_p2 = scmp.eq.s32.totalorder %s6269_s18, 0 }
  0x14   : > { %p64_p3 = scmp.ne.s32.totalorder %s6253_s14, %s6249_s13  ;;  %s8718_s21 = smov (%p40_p0, %s39_s21), 0 }
  0x15   : > { %8593 = sst [smem:[#allocation34_spill]] %s8718_s21  ;;  %p6416_p4 = por %p59_p2, %p58_p1 }
  0x16   : > { %p8510_p5 = scmp.eq.s32.totalorder %s6404_s19, 0  ;;  %s47_s24 = ssub.s32 %s6265_s17, %s8718_s21 }
  0x17   : > { %p8509_p6 = scmp.eq.s32.totalorder %s6404_s19, 1  ;;  %p49_p7 = scmp.eq.s32.totalorder %s47_s24, 0 }
  0x18   : > { %p6426_p8 = por %p8510_p5, %p64_p3  ;;  %p304_p10 = scmp.eq.s32.totalorder %s3970_s20, 1 }
  0x19   : > { %p6432_p9 = por %p8509_p6, %p58_p1  ;;  %p3971_p12 = scmp.ge.s32.totalorder %s6269_s18, 1 }
  0x1a   : > { %s6437_s27 = scalar_select %p49_p7, %s6257_s15, %s51_s22  }
  0x1b   : > { %p6439_p11 = por %p304_p10, %p64_p3  ;;  %p311_p13 = scmp.lt.s32.totalorder %s6269_s18, 3 }
  0x1c   : > { %8597 = sst [smem:[#allocation35_spill]] %s6437_s27  ;;  %s6271_s30 = smov [#allocation9]  }
  0x1d   : > { %s8598_s28 = scalar_select %p6439_p11, 1, 0 }
  0x1e   : > { %p6445_p0 = pnand %p3971_p12, %p311_p13  ;;  %s323_s11 = sshll.u32 %s6271_s30, 4  ;;  %s324_s11 = int_to_ptr.vmem [resolvable:$true] %s323_s11 }
  0x1f   : > { %8599 = sst [smem:[#allocation36_spill]] %s8598_s28  ;;  %s6272_s12 = smov [#allocation13]  }
  0x20   : > { %p5772_p1 = pneg %p6445_p0  ;;  %s345_s20 = sshll.u32 %s6272_s12, 4  ;;  %s6457_s20 = int_to_ptr.vmem [resolvable:$true] %s345_s20 }
  0x21   : > { %s6273_s24 = smov [#allocation14]   ;;  %s6052_s30 = scalar_lea.vmem %s324_s11, 256 }
  0x22   : > { %p6453_p2 = pnand %p5772_p1, %p8510_p5  ;;  %s6459_s21 = sshll.u32 %s6273_s24, 4  ;;  %s359_s21 = int_to_ptr.vmem [resolvable:$true] %s6459_s21 }
  0x23   : > { %p6053_p7 = scmp.ne.s32.totalorder %s324_s11, %s6052_s30  ;;  %p6060_p13 = scmp.lt.s32.totalorder %s324_s11, %s324_s11 }
  0x24   : > { %p6043_p3 = pneg %p6453_p2  ;;  %p6061_p1 = scmp.lt.s32.totalorder %s6052_s30, %s6052_s30 }
  0x26   : > { %p6055_p10 = pnand %p6053_p7, %p6043_p3  ;;  %p6062_p6 = por %p6061_p1, %p6060_p13 }
  0x28   : > { %p6056_p12 = pneg %p6055_p10 }
  0x2a   : > { %p6063_p5 = pnand %p6062_p6, %p6056_p12 }
  0x2c   : > { %6066 = shalt.err (!%p6063_p5)
}
  0x2d   : > { %s6274_s12 = smov 64   ;;  %s6275_s24 = smov 4  }
  0x2e   : > { %s8602_s1 = sld [smem:[#allocation71_spill]]  ;;  %s6078_s13 = scalar_lea.vmem %s6457_s20, 2048 }
  0x2f   : > { %p6079_p7 = scmp.ne.s32.totalorder %s6457_s20, %s6078_s13  ;;  %p6086_p5 = scmp.lt.s32.totalorder %s6457_s20, %s6457_s20 }
  0x30   : > { %p6087_p6 = scmp.lt.s32.totalorder %s6078_s13, %s6078_s13 }
  0x31   : > { %p6081_p10 = pnand %p6079_p7, %p6043_p3 }
  0x32   : > { %p6088_p12 = por %p6087_p6, %p6086_p5 }
  0x33   : > { %p6082_p13 = pneg %p6081_p10 }
  0x34   : > { %5775 = dma.hbm_to_vmem [thread:$0]  (!%p6453_p2), %s8602_s1, 256, %s324_s11, [#allocation10], %s6274_s12, %s6274_s12, %s6275_s24  }
  0x35   : > { %p6089_p1 = pnand %p6088_p12, %p6082_p13 }
  0x37   : > { %6092 = shalt.err (!%p6089_p1)
}
  0x38   : > { %s6276_s30 = smov 128   ;;  %s6277_s10 = smov 8  }
  0x39   : > { %s8603_s7 = sld [smem:[#allocation72_spill]]  ;;  %s6104_s11 = scalar_lea.vmem %s359_s21, 2048 }
  0x3a   : > { %p6105_p7 = scmp.ne.s32.totalorder %s359_s21, %s6104_s11  ;;  %p6112_p13 = scmp.lt.s32.totalorder %s359_s21, %s359_s21 }
  0x3b   : > { %p6113_p6 = scmp.lt.s32.totalorder %s6104_s11, %s6104_s11 }
  0x3c   : > { %p6107_p10 = pnand %p6105_p7, %p6043_p3 }
  0x3d   : > { %p6114_p12 = por %p6113_p6, %p6112_p13 }
  0x3e   : > { %p6108_p5 = pneg %p6107_p10 }
  0x3f   : > { %5778 = dma.hbm_to_vmem [thread:$0]  (!%p6453_p2), %s8603_s7, 2048, %s6457_s20, [#allocation10], %s6276_s30, %s6276_s30, %s6277_s10  }
  0x40   : > { %p6115_p1 = pnand %p6114_p12, %p6108_p5 }
  0x42   : > { %6118 = shalt.err (!%p6115_p1)
}
  0x43   : > { %s8604_s8 = sld [smem:[#allocation73_spill]]  ;;  %p3975_p11 = scmp.ge.s32.totalorder %s6269_s18, 2 }
  0x45   : > { %368 = sbr.rel (%p3975_p11) target bundleno = 115 (0x73), region = 40 }
  0x49   : > { %5781 = dma.hbm_to_vmem [thread:$0]  (!%p6453_p2), %s8604_s8, 2048, %s359_s21, [#allocation15], %s6276_s30, %s6276_s30, %s6277_s10  }
  0x4a   : > { %s372_s20 = sand.u32 1, %s6269_s18   ;;  %s374_s24 = sand.u32 1, %s6257_s15  }
  0x4b   : > { %s3976_s22 = sshll.u32 %s374_s24, 5  ;;  %s4047_s27 = sshll.u32 %s6265_s17, 7 }
  0x4c   : > { %s8605_s0 = sld [smem:[#allocation70_spill]]  ;;  %s376_s11 = scalar_lea.vmem [#allocation6], %s3976_s22 }
  0x4d   : > { %s5741_s30 = scalar_select %p6416_p4, [#allocation0], [#allocation23] }
  0x4e   : > { %s398_s13 = sshll.u32 %s376_s11, 4  ;;  %s6278_s1 = smov 256   ;;  %s399_s13 = int_to_ptr.vmem [resolvable:$true] %s398_s13 }
  0x4f   : > { %s390_s12 = sld [smem:[%s5741_s30]]   ;;  %s6279_s7 = smov 128  }
  0x50   : > { %5742 = sst [smem:[#allocation20]] (%p6416_p4), %s6278_s1  ;;  %s6280_s8 = smov 2  }
  0x51   : > { %5743 = sst [smem:[#allocation20 + $0x1]] (%p6416_p4), %s6279_s7  ;;  %s6281_s15 = smov 64  }
  0x52   : > { %s385_s21 = scalar_lea.hbm %s8605_s0, %s4047_s27  ;;  %5744 = sst [smem:[#allocation20 + $0x2]] (%p6416_p4), %s6280_s8 }
  0x53   : > { %5745 = sst [smem:[#allocation20 + $0x3]] (%p6416_p4), %s6281_s15  ;;  %s6282_s22 = smov 4  }
  0x54   : > { %5746 = sst [smem:[#allocation20 + $0x4]] (%p6416_p4), %s6281_s15  ;;  %s6516_s10 = scalar_lea.sflag [#allocation7], %s372_s20 }
  0x55   : > { %s3979_s27 = sshll.u32 %s390_s12, 26  ;;  %5747 = sst [smem:[#allocation20 + $0x5]] (%p6416_p4), %s6282_s22 }
  0x56   : > { %s3980_s28 = sadd.s32 134217728, %s3979_s27  ;;  %s6283_s1 = smov 131072  }
  0x57   : > { %5748 = dma.general (%p6416_p4), %s385_s21, 512, %s399_s13, %s6516_s10, %s6283_s1, [#allocation20], %s3980_s28, 0  }
  0x58   : > { %s3981_s7 = sshll.u32 %s374_s24, 2  ;;  %s3982_s8 = sshll.u32 %s6265_s17, 6 }
  0x59   : > { %s431_s0 = scalar_lea.hbm %s8500_s3, %s3982_s8  ;;  %s425_s15 = scalar_lea.vmem [#allocation11], %s3981_s7 }
  0x5a   : > { %s433_s12 = sshll.u32 %s425_s15, 4  ;;  %s6528_s20 = scalar_lea.hbm %s8501_s4, %s3982_s8  ;;  %s434_s12 = int_to_ptr.vmem [resolvable:$true] %s433_s12 }
  0x5b   : > { %s6131_s27 = scalar_lea.vmem %s434_s12, 64  ;;  %s6284_s24 = smov [#allocation11]  }
  0x5c   : > { %p6132_p2 = scmp.ne.s32.totalorder %s434_s12, %s6131_s27  ;;  %s6135_s21 = sshll.u32 %s6284_s24, 4  ;;  %s6136_s21 = int_to_ptr.vmem [resolvable:$false] %s6135_s21 }
  0x5d   : > { %s6137_s13 = scalar_lea.vmem %s6136_s21, 128  ;;  %p6138_p10 = scmp.lt.s32.totalorder %s434_s12, %s6136_s21 }
  0x5e   : > { %p6133_p3 = pnand %p6132_p2, %p6416_p4  ;;  %p6139_p5 = scmp.lt.s32.totalorder %s6137_s13, %s6131_s27 }
  0x60   : > { %p6134_p7 = pneg %p6133_p3  ;;  %p6140_p13 = por %p6139_p5, %p6138_p10 }
  0x62   : > { %p6141_p6 = pnand %p6140_p13, %p6134_p7 }
  0x64   : > { %6144 = shalt.err (!%p6141_p6)
}
  0x65   : > { %5749 = dma.hbm_to_vmem [thread:$0]  (%p6416_p4), %s431_s0, 64, %s434_s12, %s6516_s10  }
  0x66   : > { %s444_s18 = scalar_lea.vmem [#allocation12], %s3981_s7  ;;  %s6285_s8 = smov [#allocation12]  }
  0x67   : > { %s452_s28 = sshll.u32 %s444_s18, 4  ;;  %s6161_s30 = sshll.u32 %s6285_s8, 4  ;;  %s453_s28 = int_to_ptr.vmem [resolvable:$true] %s452_s28  ;;  %s6162_s30 = int_to_ptr.vmem [resolvable:$false] %s6161_s30 }
  0x68   : > { %s6157_s1 = scalar_lea.vmem %s453_s28, 64  ;;  %s6163_s11 = scalar_lea.vmem %s6162_s30, 128 }
  0x69   : > { %p6158_p12 = scmp.ne.s32.totalorder %s453_s28, %s6157_s1  ;;  %p6164_p3 = scmp.lt.s32.totalorder %s453_s28, %s6162_s30 }
  0x6a   : > { %p6165_p7 = scmp.lt.s32.totalorder %s6163_s11, %s6157_s1 }
  0x6b   : > { %p6159_p1 = pnand %p6158_p12, %p6416_p4 }
  0x6c   : > { %p6166_p10 = por %p6165_p7, %p6164_p3 }
  0x6d   : > { %p6160_p2 = pneg %p6159_p1 }
  0x6f   : > { %p6167_p5 = pnand %p6166_p10, %p6160_p2 }
  0x71   : > { %6170 = shalt.err (!%p6167_p5)
}
  0x72   : > { %5750 = dma.hbm_to_vmem [thread:$0]  (%p6416_p4), %s6528_s20, 64, %s453_s28, %s6516_s10  }
  0x73 PF: > { %461 = sbr.rel (%p6445_p0) target bundleno = 7121 (0x1bd1), region = 56 }
  0x78   : > { %s463_s0 = sand.u32 1, %s6404_s19   ;;  %s6545_s7 = sand.u32 1, %s6253_s14  }
  0x79   : > { %s3986_s15 = sshll.u32 %s6545_s7, 5  ;;  %s464_s12 = scalar_lea.sflag [#allocation7], %s463_s0 }
  0x7a   : > { %s6548_s22 = scalar_lea.vmem [#allocation6], %s3986_s15 }
  0x7b   : > { %6220 = dma.done.wait (%p6426_p8), %s464_s12, 512  }
  0x7c   : > { %6222 = vsyncadd (%p6426_p8), %s464_s12, 4294966784  ;;  %p8606_p4 = scmp.eq.s32.totalorder %s6404_s19, 0 }
  0x7e   : > { %6224 = dma.done.wait (%p8606_p4), [#allocation10], 256   ;;  %p8607_p0 = pmov %p8606_p4 }
  0x7f   : > { %s3988_s23 = sshll.u32 %s6545_s7, 2 }
  0x80   : > { %6226 = vsyncadd (%p8607_p0), [#allocation10], 4294967040  ;;  %s480_s29 = scalar_lea.vmem [#allocation11], %s3988_s23 }
  0x81   : > { %6228 = dma.done.wait (%p6426_p8), %s464_s12, 128  }
  0x82   : > { %6230 = vsyncadd (%p6426_p8), %s464_s12, 4294967168  ;;  %s489_s10 = scalar_lea.vmem [#allocation12], %s3988_s23  ;;  %p8608_p13 = pmov %p8607_p0 }
  0x83   : > { %p8609_p6 = pmov %p8607_p0 }
  0x84   : > { %6232 = dma.done.wait (%p8608_p13), [#allocation10], 2048  }
  0x85   : > { %6234 = vsyncadd (%p8609_p6), [#allocation10], 4294965248  ;;  %p8610_p12 = pmov %p8607_p0 }
  0x86   : > { %p8611_p1 = pmov %p8607_p0 }
  0x87   : > { %6236 = dma.done.wait (%p8610_p12), [#allocation15], 2048  }
  0x88   : > { %6238 = vsyncadd (%p8611_p1), [#allocation15], 4294965248  ;;  %v6571_v0 = vld [vmem:[%s480_s29] sm:$0xf]  ;;  %v6573_v1 = vld [vmem:[%s489_s10] sm:$0xf] }
  0x89   : > { %8612 = vst [vmem:[#allocation37_spill] sm:$0xff] %v6573_v1  ;;  %v6578_v2 = vld [vmem:[%s8502_s5] ss:$0 sm:$0xff]  ;;  %v6580_v3 = vld [vmem:[#allocation13] sm:$0xff]  ;;  %v6582_v4 = vld [vmem:[#allocation13 + $0x8] sm:$0xff]  ;;  %vm600_vm0 = vcmask 261120  }
  0x8a   : > { %v6584_v5 = vld [vmem:[#allocation13 + $0x10] sm:$0xff]  ;;  %v6586_v6 = vld [vmem:[#allocation13 + $0x18] sm:$0xff]  ;;  %v6588_v7 = vld [vmem:[#allocation13 + $0x20] sm:$0xff]  ;;  %s3992_s21 = sshll.u32 %s6545_s7, 6  ;;  %p4004_p8 = scmp.ne.s32.totalorder %s6261_s16, 0 }
  0x8b   : > { %v6590_v8 = vld [vmem:[#allocation13 + $0x28] sm:$0xff]  ;;  %v6592_v9 = vld [vmem:[#allocation13 + $0x30] sm:$0xff]  ;;  %v6594_v10 = vld [vmem:[#allocation13 + $0x38] sm:$0xff]  ;;  %s6681_s13 = scalar_lea.vmem [#allocation17], %s3992_s21 }
  0x8c   : > { %v6596_v11 = vld [vmem:[#allocation13 + $0x40] sm:$0xff]  ;;  %v6598_v12 = vld [vmem:[#allocation13 + $0x48] sm:$0xff]  ;;  %v6600_v13 = vld [vmem:[#allocation13 + $0x50] sm:$0xff] }
  0x8d   : > { %v6602_v14 = vld [vmem:[#allocation13 + $0x58] sm:$0xff]  ;;  %v6604_v15 = vld [vmem:[#allocation13 + $0x60] sm:$0xff]  ;;  %v6606_v16 = vld [vmem:[#allocation13 + $0x68] sm:$0xff] }
  0x8e   : > { %v6608_v17 = vld [vmem:[#allocation13 + $0x70] sm:$0xff]  ;;  %v6610_v18 = vld [vmem:[#allocation13 + $0x78] sm:$0xff]  ;;  %v6612_v19 = vld [vmem:[#allocation14] sm:$0xff] }
  0x8f   : > { %8613 = vst [vmem:[#allocation38_spill] sm:$0xff] %v6612_v19  ;;  %v6614_v20 = vld [vmem:[#allocation14 + $0x8] sm:$0xff]  ;;  %v6616_v21 = vld [vmem:[#allocation14 + $0x10] sm:$0xff]  ;;  %v6618_v22 = vld [vmem:[#allocation14 + $0x18] sm:$0xff] }
  0x90   : > { %8614 = vst [vmem:[#allocation39_spill] sm:$0xff] %v6614_v20  ;;  %8615 = vst [vmem:[#allocation40_spill] sm:$0xff] %v6616_v21  ;;  %v6620_v23 = vld [vmem:[#allocation14 + $0x20] sm:$0xff]  ;;  %v6622_v24 = vld [vmem:[#allocation14 + $0x28] sm:$0xff] }
  0x91   : > { %v6624_v25 = vld [vmem:[#allocation14 + $0x30] sm:$0xff]  ;;  %v6626_v26 = vld [vmem:[#allocation14 + $0x38] sm:$0xff]  ;;  %v6628_v27 = vld [vmem:[#allocation14 + $0x40] sm:$0xff] }
  0x92   : > { %v6630_v28 = vld [vmem:[#allocation14 + $0x48] sm:$0xff]  ;;  %v6632_v29 = vld [vmem:[#allocation14 + $0x50] sm:$0xff]  ;;  %v6634_v30 = vld [vmem:[#allocation14 + $0x58] sm:$0xff] }
  0x93   : > { %v6636_v31 = vld [vmem:[#allocation14 + $0x60] sm:$0xff]  ;;  %v6638_v32 = vld [vmem:[#allocation14 + $0x68] sm:$0xff]  ;;  %v6640_v33 = vld [vmem:[#allocation14 + $0x70] sm:$0xff] }
  0x94   : > { %v6642_v34 = vld [vmem:[#allocation14 + $0x78] sm:$0xff]  ;;  %v5888_v35 = vld [vmem:[#allocation9 + $0x8] sm:$0xff]   ;;  %v5889_v36 = vld [vmem:[#allocation9] sm:$0xff]  }
  0x95   : > { %4599 = vmatprep.subr.bf16.mxu0 %v5888_v35  ;;  %5731 = vmatprep.subr.bf16.mxu1 %v5888_v35  ;;  %v5890_v37 = vld [vmem:[%s6548_s22] sm:$0xff]   ;;  %v5891_v38 = vld [vmem:[%s6548_s22 + $0x10] sm:$0xff]   ;;  %v5892_v39 = vld [vmem:[%s6548_s22 + $0x8] sm:$0xff]  }
  0x96   : > { %4600 = vmatpush3.bf16.msra.mxu0 %v5888_v35  ;;  %5733 = vmatpush3.bf16.msra.mxu1 %v5888_v35  ;;  %v5893_v40 = vld [vmem:[%s6548_s22 + $0x18] sm:$0xff]   ;;  %v3993_v41 = vld [vmem:[%s8499_s2] ss:$0 sm:$0xff] }
  0x97   : > { %4601 = vmatprep.subr.bf16.mxu0 %v5889_v36  ;;  %5732 = vmatprep.subr.bf16.mxu1 %v5889_v36 }
  0x98   : > { %4603 = vmatprep.mubr.msk.bf16.mxu0 %vm600_vm0, %v5890_v37  ;;  %4607 = vmatprep.mubr.msk.bf16.mxu1 %vm600_vm0, %v5891_v38 }
  0x9a   : > { %4602 = vmatpush3.bf16.msra.mxu0 %v5889_v36  ;;  %5734 = vmatpush3.bf16.msra.mxu1 %v5889_v36 }
  0x9d   : > { %4604 = vmatmul.mubr.msk.bf16.vlgmr.msra.gmra.mxu0 %vm600_vm0, %v5892_v39  ;;  %4608 = vmatmul.mubr.msk.bf16.vlgmr.msra.gmra.mxu1 %vm600_vm0, %v5893_v40 }
 0x15d   : > { %v4605_v42 = vpop.f32.mrf.mxu0  ;;  %v4609_v43 = vpop.f32.mrf.mxu1 }
 0x15e   : > { %v656_v44 = vadd.f32 %v4605_v42, %v3993_v41  ;;  %v672_v57 = vadd.f32 %v4609_v43, %v3993_v41 }
 0x15f   : > { %v647_v45 = vpop.f32.mrf.mxu0  ;;  %v663_v46 = vpop.f32.mrf.mxu1 }
 0x160   : > { %v648_v47 = vadd.f32 %v3993_v41, %v647_v45  ;;  %682 = vmax.xlane.f32.xlu1 %v656_v44  ;;  %v664_v52 = vadd.f32 %v3993_v41, %v663_v46 }
 0x161   : > { %v4606_v48 = vpop.f32.mrf.mxu0  ;;  %v4610_v49 = vpop.f32.mrf.mxu1 }
 0x162   : > { %v659_v50 = vadd.f32 %v4606_v48, %v3993_v41  ;;  %678 = vmax.xlane.f32.xlu0 %v648_v47  ;;  %v675_v56 = vadd.f32 %v4610_v49, %v3993_v41 }
 0x163   : > { %v666_v51 = vpop.f32.mrf.mxu1  ;;  %v650_v53 = vpop.f32.mrf.mxu0 }
 0x164   : > { %684 = vmax.xlane.f32.xlu1 %v659_v50  ;;  %v667_v54 = vadd.f32 %v3993_v41, %v666_v51  ;;  %v651_v55 = vadd.f32 %v3993_v41, %v650_v53 }
 0x166   : > { %686 = vmax.xlane.f32.xlu0 %v664_v52 }
 0x168   : > { %688 = vmax.xlane.f32.xlu1 %v667_v54 }
 0x16a   : > { %680 = vmax.xlane.f32.xlu0 %v651_v55 }
 0x16c   : > { %692 = vmax.xlane.f32.xlu1 %v675_v56 }
 0x16e   : > { %690 = vmax.xlane.f32.xlu0 %v672_v57 }
 0x1e9   : > { %v683_v58 = vpop.xlane.xlu1 %682 }
 0x1ea   : > { %v6651_v59 = vsub.f32 %v656_v44, %v683_v58 }
 0x1eb   : > { %v679_v60 = vpop.xlane.xlu0 %678 }
 0x1ec   : > { %v706_v61 = vmul.f32 1.442695, %v6651_v59  ;;  %v6654_v62 = vsub.f32 %v648_v47, %v679_v60 }
 0x1ed   : > { %v685_v63 = vpop.xlane.xlu1 %684 }
 0x1ee   : > { %5894 = vpow2.f32 %v706_v61  ;;  %v702_v35 = vmul.f32 1.442695, %v6654_v62  ;;  %v6657_v36 = vsub.f32 %v659_v50, %v685_v63  ;;  %v801_v63 = vlaneseq }
 0x1ef   : > { %v687_v37 = vpop.xlane.xlu0 %686 }
 0x1f0   : > { %v708_v38 = vmul.f32 1.442695, %v6657_v36  ;;  %v6660_v39 = vsub.f32 %v664_v52, %v687_v37  ;;  %5896 = vpow2.f32 %v702_v35  ;;  %v6675_v35 = vand.u32 127, %v801_v63 }
 0x1f1   : > { %v689_v40 = vpop.xlane.xlu1 %688 }
 0x1f2   : > { %5898 = vpow2.f32 %v708_v38  ;;  %v710_v41 = vmul.f32 1.442695, %v6660_v39  ;;  %v6663_v42 = vsub.f32 %v667_v54, %v689_v40 }
 0x1f3   : > { %v681_v43 = vpop.xlane.xlu0 %680 }
 0x1f4   : > { %v6665_v44 = vsub.f32 %v651_v55, %v681_v43  ;;  %5900 = vpow2.f32 %v710_v41  ;;  %v712_v47 = vmul.f32 1.442695, %v6663_v42 }
 0x1f5   : > { %v693_v45 = vpop.xlane.xlu1 %692 }
 0x1f6   : > { %v704_v46 = vmul.f32 1.442695, %v6665_v44  ;;  %v6669_v49 = vsub.f32 %v675_v56, %v693_v45 }
 0x1f7   : > { %v691_v48 = vpop.xlane.xlu0 %690 }
 0x1f8   : > { %5902 = vpow2.f32 %v704_v46  ;;  %v6671_v50 = vsub.f32 %v672_v57, %v691_v48  ;;  %v716_v53 = vmul.f32 1.442695, %v6669_v49 }
 0x1f9   : > { %5904 = vpow2.f32 %v712_v47 }
 0x1fa   : > { %v714_v51 = vmul.f32 1.442695, %v6671_v50 }
 0x1fb   : > { %v5895_v52 = vpop.eup %5894 }
 0x1fc   : > { %5906 = vpow2.f32 %v714_v51  ;;  %722 = vadd.xlane.f32.xlu0 %v5895_v52 }
 0x1fd   : > { %v5897_v54 = vpop.eup %5896  ;;  %5908 = vpow2.f32 %v716_v53 }
 0x1ff   : > { %v5899_v55 = vpop.eup %5898 }
 0x200   : > { %724 = vadd.xlane.f32.xlu1 %v5899_v55  ;;  %718 = vadd.xlane.f32.xlu0 %v5897_v54 }
 0x201   : > { %v5901_v58 = vpop.eup %5900 }
 0x204   : > { %726 = vadd.xlane.f32.xlu0 %v5901_v58 }
 0x205   : > { %v5903_v60 = vpop.eup %5902 }
 0x206   : > { %720 = vadd.xlane.f32.xlu1 %v5903_v60  ;;  %v5905_v56 = vpop.eup %5904 }
 0x209   : > { %v5907_v57 = vpop.eup %5906 }
 0x20a   : > { %728 = vadd.xlane.f32.xlu1 %v5905_v56  ;;  %730 = vadd.xlane.f32.xlu0 %v5907_v57  ;;  %v5909_v61 = vpop.eup %5908 }
 0x20e   : > { %732 = vadd.xlane.f32.xlu1 %v5909_v61 }
 0x285   : > { %v723_v37 = vpop.xlane.xlu0 %722 }
 0x286   : > { %5910 = vlog2.f32 %v723_v37 }
 0x289   : > { %v725_v38 = vpop.xlane.xlu1 %724  ;;  %v719_v40 = vpop.xlane.xlu0 %718 }
 0x28a   : > { %5912 = vlog2.f32 %v725_v38 }
 0x28b   : > { %5914 = vlog2.f32 %v719_v40 }
 0x28d   : > { %v727_v41 = vpop.xlane.xlu0 %726 }
 0x28e   : > { %5916 = vlog2.f32 %v727_v41 }
 0x28f   : > { %v721_v43 = vpop.xlane.xlu1 %720 }
 0x290   : > { %5918 = vlog2.f32 %v721_v43 }
 0x293   : > { %v5911_v45 = vpop.eup %5910  ;;  %v729_v46 = vpop.xlane.xlu1 %728 }
 0x294   : > { %v731_v47 = vpop.xlane.xlu0 %730  ;;  %v739_v48 = vmul.f32 0.6931472, %v5911_v45  ;;  %5920 = vlog2.f32 %v729_v46 }
 0x295   : > { %5922 = vlog2.f32 %v731_v47 }
 0x296   : > { %v6679_v51 = vsub.f32 %v6651_v59, %v739_v48 }
 0x297   : > { %v5913_v52 = vpop.eup %5912  ;;  %v733_v53 = vpop.xlane.xlu1 %732 }
 0x298   : > { %v5915_v54 = vpop.eup %5914  ;;  %760 = vst [vmem:[%s6681_s13 + $0x10] sm:$0xff] %v6679_v51  ;;  %v741_v55 = vmul.f32 0.6931472, %v5913_v52  ;;  %5924 = vlog2.f32 %v733_v53 }
 0x299   : > { %v735_v58 = vmul.f32 0.6931472, %v5915_v54 }
 0x29a   : > { %v6686_v60 = vsub.f32 %v6657_v36, %v741_v55 }
 0x29b   : > { %v5917_v59 = vpop.eup %5916  ;;  %v6689_v56 = vsub.f32 %v6654_v62, %v735_v58 }
 0x29c   : > { %761 = vst [vmem:[%s6681_s13 + $0x18] sm:$0xff] %v6686_v60  ;;  %v743_v57 = vmul.f32 0.6931472, %v5917_v59 }
 0x29d   : > { %v5919_v61 = vpop.eup %5918  ;;  %758 = vst [vmem:[%s6681_s13] sm:$0xff] %v6689_v56 }
 0x29e   : > { %v6696_v63 = vsub.f32 %v6660_v39, %v743_v57  ;;  %v737_v37 = vmul.f32 0.6931472, %v5919_v61 }
 0x2a0   : > { %762 = vst [vmem:[%s6681_s13 + $0x20] sm:$0xff] %v6696_v63  ;;  %v6701_v36 = vsub.f32 %v6665_v44, %v737_v37 }
 0x2a1   : > { %v5921_v62 = vpop.eup %5920 }
 0x2a2   : > { %v5923_v38 = vpop.eup %5922  ;;  %759 = vst [vmem:[%s6681_s13 + $0x8] sm:$0xff] %v6701_v36  ;;  %v745_v40 = vmul.f32 0.6931472, %v5921_v62 }
 0x2a3   : > { %v747_v41 = vmul.f32 0.6931472, %v5923_v38 }
 0x2a4   : > { %v6706_v43 = vsub.f32 %v6663_v42, %v745_v40 }
 0x2a5   : > { %v5925_v45 = vpop.eup %5924  ;;  %v6709_v39 = vsub.f32 %v6671_v50, %v747_v41 }
 0x2a6   : > { %763 = vst [vmem:[%s6681_s13 + $0x28] sm:$0xff] %v6706_v43  ;;  %v749_v46 = vmul.f32 0.6931472, %v5925_v45  ;;  %806 = sbr.rel (%p4004_p8) target bundleno = 814 (0x32e), region = 84 }
 0x2a7   : > { %764 = vst [vmem:[%s6681_s13 + $0x30] sm:$0xff] %v6709_v39 }
 0x2a8   : > { %v6716_v44 = vsub.f32 %v6669_v49, %v749_v46 }
 0x2aa   : > { %765 = vst [vmem:[%s6681_s13 + $0x38] sm:$0xff] %v6716_v44 }
 0x2ab   : > { %v823_v42 = vrot.slane %v6679_v51, 7  ;;  %vm824_vm1 = vcmask 1041409   ;;  %v6286_v47 = vmov 0   ;;  %v826_v50 = vrot.slane %v6696_v63, 6 }
 0x2ac   : > { %5926 = vset.pattern.permute.xlu0 %v6286_v47  ;;  %vm827_vm2 = vcmask 1042434   ;;  %v829_v48 = vrot.slane %v6709_v39, 5  ;;  %vm830_vm3 = vcmask 1043459   ;;  %v6287_v58 = vmov 0.0  }
 0x2ad   : > { %808 = vperm.xlu0 %5926, %v6571_v0   ;;  %v825_v49 = vsel %vm824_vm1, %v823_v42, %v6689_v56 }
 0x2ae   : > { %v828_v52 = vsel %vm827_vm2, %v826_v50, %v825_v49 }
 0x2af   : > { %v831_v53 = vsel %vm830_vm3, %v829_v48, %v828_v52 }
 0x2b0   : > { %v833_v54 = vadd.f32 %v6578_v2, %v831_v53 }
 0x2b2   : > { %834 = vst [vmem:[#allocation2] sm:$0xf] %v833_v54 }
 0x328   : > { %v809_v55 = vpop.permute.xlu0 %808 }
 0x329   : > { %vm810_vm4 = vcmp.eq.s32.totalorder %v809_v55, %v6675_v35 }
 0x32a   : > { %v4005_v59 = vsel %vm810_vm4, 1.0, %v6287_v58 }
 0x32b   : > { %v835_v57 = vmul.f32 %v4005_v59, %v833_v54  ;;  %837 = vst [vmem:[#allocation4] sm:$0xf] %v4005_v59  ;;  %838 = vst [vmem:[#allocation5] sm:$0xf] %v4005_v59 }
 0x32d   : > { %836 = vst [vmem:[#allocation3] sm:$0xf] %v835_v57 }
 0x32e PF: > { %p4007_p2 = scmp.le.s32.totalorder %s6261_s16, 0 }
 0x330   : > { %842 = sbr.rel (%p4007_p2) target bundleno = 1194 (0x4aa), region = 88 }
 0x335   : > { %v6729_v61 = vld [vmem:[#allocation2] sm:$0xf]  ;;  %vm853_vm5 = vcmask 1043456   ;;  %v6288_v2 = vmov 0.0   ;;  %vm6289_vm6 = vmmov 0   ;;  %vm948_vm7 = vcmp.gt.f32.partialorder %v6573_v1, 0.0 }
 0x336   : > { %v854_v37 = vsel %vm853_vm5, %v6729_v61, -inf  ;;  %4611 = vmatprep.subr.mxu0 %v6288_v2  ;;  %4646 = vmatprep.subr.mxu1 %v6288_v2  ;;  %v846_v62 = vld [vmem:[#allocation5] sm:$0xf]  ;;  %v6290_v38 = vmov 0   ;;  %v937_v50 = vrot.slane %v6679_v51, 7  ;;  %vm938_vm8 = vcmask 1041409  }
 0x337   : > { %855 = vmax.xlane.f32.xlu0 %v854_v37  ;;  %4612 = vmatpush3.msra.mxu0 %v6642_v34  ;;  %v949_v40 = vsel %vm948_vm7, 1, %v6290_v38  ;;  %v940_v48 = vrot.slane %v6696_v63, 6  ;;  %vm941_vm9 = vcmask 1042434   ;;  %v943_v52 = vrot.slane %v6709_v39, 5  ;;  %v845_v37 = vld [vmem:[#allocation4] sm:$0xf] }
 0x338   : > { %4613 = vmatprep.subr.mxu0 %v6288_v2  ;;  %4647 = vmatpush3.msra.mxu1 %v6610_v18  ;;  %v939_v49 = vsel %vm938_vm8, %v937_v50, %v6689_v56  ;;  %vm944_vm10 = vcmask 1043459  }
 0x339   : > { %4614 = vmatpush3.msra.mxu0 %v6640_v33  ;;  %4648 = vmatprep.subr.mxu1 %v6288_v2  ;;  %v942_v55 = vsel %vm941_vm9, %v940_v48, %v939_v49 }
 0x33a   : > { %4615 = vmatprep.subr.mxu0 %v6288_v2  ;;  %4649 = vmatpush3.msra.mxu1 %v6608_v17  ;;  %v945_v59 = vsel %vm944_vm10, %v943_v52, %v942_v55 }
 0x33b   : > { %4616 = vmatpush3.msra.mxu0 %v6638_v32  ;;  %4650 = vmatprep.subr.mxu1 %v6288_v2 }
 0x33c   : > { %4617 = vmatprep.subr.mxu0 %v6288_v2  ;;  %4651 = vmatpush3.msra.mxu1 %v6606_v16 }
 0x33d   : > { %4618 = vmatpush3.msra.mxu0 %v6636_v31  ;;  %4652 = vmatprep.subr.mxu1 %v6288_v2 }
 0x33e   : > { %4619 = vmatprep.subr.mxu0 %v6288_v2  ;;  %4653 = vmatpush3.msra.mxu1 %v6604_v15 }
 0x33f   : > { %4620 = vmatpush3.msra.mxu0 %v6634_v30  ;;  %4654 = vmatprep.subr.mxu1 %v6288_v2 }
 0x340   : > { %4621 = vmatprep.subr.mxu0 %v6288_v2  ;;  %4655 = vmatpush3.msra.mxu1 %v6602_v14 }
 0x341   : > { %4622 = vmatpush3.msra.mxu0 %v6632_v29  ;;  %4656 = vmatprep.subr.mxu1 %v6288_v2 }
 0x342   : > { %4623 = vmatprep.subr.mxu0 %v6288_v2  ;;  %4657 = vmatpush3.msra.mxu1 %v6600_v13 }
 0x343   : > { %4624 = vmatpush3.msra.mxu0 %v6630_v28  ;;  %4658 = vmatprep.subr.mxu1 %v6288_v2 }
 0x344   : > { %4625 = vmatprep.subr.mxu0 %v6288_v2  ;;  %4659 = vmatpush3.msra.mxu1 %v6598_v12 }
 0x345   : > { %4626 = vmatpush3.msra.mxu0 %v6628_v27  ;;  %4660 = vmatprep.subr.mxu1 %v6288_v2 }
 0x346   : > { %4627 = vmatprep.subr.mxu0 %v6288_v2  ;;  %4661 = vmatpush3.msra.mxu1 %v6596_v11 }
 0x347   : > { %4628 = vmatpush3.msra.mxu0 %v6626_v26  ;;  %4662 = vmatprep.subr.mxu1 %v6288_v2 }
 0x348   : > { %4629 = vmatprep.subr.mxu0 %v6288_v2  ;;  %4663 = vmatpush3.msra.mxu1 %v6594_v10 }
 0x349   : > { %4630 = vmatpush3.msra.mxu0 %v6624_v25  ;;  %4643 = vmatprep.mubr.msk.f32.mxu0 %vm6289_vm6, %v6288_v2 }
 0x34a   : > { %4631 = vmatprep.subr.mxu0 %v6288_v2  ;;  %4664 = vmatprep.subr.mxu1 %v6288_v2 }
 0x34b   : > { %4632 = vmatpush3.msra.mxu0 %v6622_v24  ;;  %4665 = vmatpush3.msra.mxu1 %v6592_v9 }
 0x34c   : > { %4633 = vmatprep.subr.mxu0 %v6288_v2  ;;  %4666 = vmatprep.subr.mxu1 %v6288_v2 }
 0x34d   : > { %4634 = vmatpush3.msra.mxu0 %v6620_v23  ;;  %4667 = vmatpush3.msra.mxu1 %v6590_v8 }
 0x34e   : > { %4635 = vmatprep.subr.mxu0 %v6288_v2  ;;  %4668 = vmatprep.subr.mxu1 %v6288_v2 }
 0x34f   : > { %4636 = vmatpush3.msra.mxu0 %v6618_v22  ;;  %4669 = vmatpush3.msra.mxu1 %v6588_v7 }
 0x350   : > { %4637 = vmatprep.subr.mxu0 %v6288_v2  ;;  %4670 = vmatprep.subr.mxu1 %v6288_v2 }
 0x351   : > { %4638 = vmatpush3.msra.mxu0 %v6616_v21  ;;  %4671 = vmatpush3.msra.mxu1 %v6586_v6 }
 0x352   : > { %4639 = vmatprep.subr.mxu0 %v6288_v2  ;;  %4672 = vmatprep.subr.mxu1 %v6288_v2 }
 0x353   : > { %4640 = vmatpush3.msra.mxu0 %v6614_v20  ;;  %4673 = vmatpush3.msra.mxu1 %v6584_v5 }
 0x354   : > { %4641 = vmatprep.subr.mxu0 %v6288_v2  ;;  %4674 = vmatprep.subr.mxu1 %v6288_v2 }
 0x355   : > { %4642 = vmatpush3.msra.mxu0 %v6612_v19  ;;  %4675 = vmatpush3.msra.mxu1 %v6582_v4 }
 0x356   : > { %4676 = vmatprep.subr.mxu1 %v6288_v2  ;;  %4678 = vmatprep.mubr.msk.f32.mxu1 %vm6289_vm6, %v6288_v2 }
 0x357   : > { %4677 = vmatpush3.msra.mxu1 %v6580_v3  ;;  %5928 = vset.pattern.permute.xlu1 %v6290_v38 }
 0x358   : > { %4679 = vmatmul.mubr.f32.vlgmr.msra.gmra.mxu1 %v846_v62  ;;  %957 = vperm.xlu1 %5928, %v6573_v1  }
 0x359   : > { %5927 = vset.pattern.permute.xlu0 %v6290_v38 }
 0x35a   : > { %848 = vperm.xlu0 %5927, %v6571_v0  }
 0x35c   : > { %951 = vperm.xlu1 %5928, %v949_v40  }
 0x3c0   : > { %v856_v41 = vpop.xlane.xlu0 %855 }
 0x3c1   : > { %v857_v45 = vsub.f32 %v6729_v61, %v856_v41 }
 0x3c3   : > { %v858_v46 = vmul.f32 1.442695, %v857_v45 }
 0x3c5   : > { %5929 = vpow2.f32 %v858_v46 }
 0x3d2   : > { %v5930_v42 = vpop.eup %5929 }
 0x3d3   : > { %4644 = vmatmul.mubr.f32.vlgmr.msra.gmra.mxu0 %v5930_v42  ;;  %v958_v47 = vpop.permute.xlu1 %957  ;;  %v844_v42 = vld [vmem:[#allocation3] sm:$0xf] }
 0x3d5   : > { %v849_v54 = vpop.permute.xlu0 %848 }
 0x3d6   : > { %vm850_vm11 = vcmp.eq.s32.totalorder %v849_v54, %v6675_v35 }
 0x3d7   : > { %v952_v58 = vpop.permute.xlu1 %951  ;;  %v4008_v57 = vsel %vm850_vm11, 1.0, %v6288_v2 }
 0x3d8   : > { %vm953_vm12 = vcmp.eq.s32.totalorder %v952_v58, 1  ;;  %v960_v40 = vmul.f32 %v4008_v57, %v958_v47  ;;  %1037 = vst [vmem:[#allocation5] sm:$0xf] %v4008_v57 }
 0x3d9   : > { %v1033_v45 = vsel %vm953_vm12, %v4008_v57, %v845_v37 }
 0x3da   : > { %1036 = vst [vmem:[#allocation4] sm:$0xf] %v1033_v45 }
 0x418   : > { %v1027_v53 = vpop.f32.mrf.mxu1 }
 0x419   : > { %v1028_v38 = vadd.f32 %v1027_v53, %v945_v59 }
 0x41a   : > { %v4680_v62 = vpop.f32.mrf.mxu1 }
 0x41b   : > { %v1031_v46 = vmul.f32 %v1028_v38, %v960_v40 }
 0x41d   : > { %v1032_v50 = vadd.f32 %v1031_v46, %v844_v42 }
 0x41f   : > { %1035 = vst [vmem:[#allocation3] sm:$0xf] %v1032_v50 }
 0x493   : > { %v926_v48 = vpop.f32.mrf.mxu0 }
 0x494   : > { %5931 = vlog2.f32 %v926_v48 }
 0x495   : > { %v4645_v49 = vpop.f32.mrf.mxu0 }
 0x4a1   : > { %v5932_v54 = vpop.eup %5931 }
 0x4a2   : > { %v931_v52 = vmul.f32 0.6931472, %v5932_v54 }
 0x4a4   : > { %v932_v55 = vadd.f32 %v931_v52, %v856_v41 }
 0x4a6   : > { %v947_v2 = vadd.f32 %v945_v59, %v932_v55 }
 0x4a8   : > { %v954_v62 = vsel %vm953_vm12, %v947_v2, %v6729_v61 }
 0x4a9   : > { %1034 = vst [vmem:[#allocation2] sm:$0xf] %v954_v62 }
 0x4aa PF: > { %vm1048_vm13 = vcmask 1043456   ;;  %v8524_v57 = vmov 0.0   ;;  %vm6292_vm14 = vmmov 0   ;;  %vm1143_vm15 = vcmp.gt.f32.partialorder %v6573_v1, 0.0  ;;  %p4038_p3 = scmp.ne.s32.totalorder %s6261_s16, 1 }
 0x4ab   : > { %4681 = vmatprep.subr.mxu0 %v8524_v57  ;;  %4716 = vmatprep.subr.mxu1 %v8524_v57  ;;  %v8522_v61 = vmov 1   ;;  %v6294_v41 = vmov 0   ;;  %v1132_v42 = vrot.slane %v6689_v56, 1  ;;  %vm1133_vm0 = vcmask 1041409  }
 0x4ac   : > { %4682 = vmatpush3.msra.mxu0 %v6642_v34  ;;  %4717 = vmatpush3.msra.mxu1 %v6610_v18  ;;  %v6880_v58 = vsel %vm1143_vm15, 1, %v6294_v41  ;;  %v1135_v50 = vrot.slane %v6696_v63, 7  ;;  %vm1136_vm1 = vcmask 1042434   ;;  %v1138_v49 = vrot.slane %v6709_v39, 6 }
 0x4ad   : > { %4683 = vmatprep.subr.mxu0 %v8524_v57  ;;  %4718 = vmatprep.subr.mxu1 %v8524_v57  ;;  %v1134_v48 = vsel %vm1133_vm0, %v6679_v51, %v1132_v42  ;;  %vm1139_vm2 = vcmask 1043459  }
 0x4ae   : > { %4684 = vmatpush3.msra.mxu0 %v6640_v33  ;;  %4719 = vmatpush3.msra.mxu1 %v6608_v17  ;;  %v1137_v54 = vsel %vm1136_vm1, %v1135_v50, %v1134_v48  ;;  %v1314_v48 = vrot.slane %v6689_v56, 2 }
 0x4af   : > { %4685 = vmatprep.subr.mxu0 %v8524_v57  ;;  %4720 = vmatprep.subr.mxu1 %v8524_v57  ;;  %v6936_v62 = vsel %vm1139_vm2, %v1138_v49, %v1137_v54  ;;  %v1315_v49 = vrot.slane %v6679_v51, 1 }
 0x4b0   : > { %v6813_v47 = vld [vmem:[#allocation2] sm:$0xf]  ;;  %4686 = vmatpush3.msra.mxu0 %v6638_v32  ;;  %4721 = vmatpush3.msra.mxu1 %v6606_v16 }
 0x4b1   : > { %v1049_v53 = vsel %vm1048_vm13, %v6813_v47, -inf  ;;  %4687 = vmatprep.subr.mxu0 %v8524_v57  ;;  %4722 = vmatprep.subr.mxu1 %v8524_v57  ;;  %v1316_v54 = vsel %vm1133_vm0, %v1315_v49, %v1314_v48  ;;  %v8516_v48 = vmov 3  }
 0x4b2   : > { %1050 = vmax.xlane.f32.xlu0 %v1049_v53  ;;  %4688 = vmatpush3.msra.mxu0 %v6636_v31 }
 0x4b3   : > { %4689 = vmatprep.subr.mxu0 %v8524_v57  ;;  %4723 = vmatpush3.msra.mxu1 %v6604_v15 }
 0x4b4   : > { %4690 = vmatpush3.msra.mxu0 %v6634_v30  ;;  %4724 = vmatprep.subr.mxu1 %v8524_v57 }
 0x4b5   : > { %4691 = vmatprep.subr.mxu0 %v8524_v57  ;;  %4725 = vmatpush3.msra.mxu1 %v6602_v14 }
 0x4b6   : > { %4692 = vmatpush3.msra.mxu0 %v6632_v29  ;;  %4726 = vmatprep.subr.mxu1 %v8524_v57 }
 0x4b7   : > { %4693 = vmatprep.subr.mxu0 %v8524_v57  ;;  %4727 = vmatpush3.msra.mxu1 %v6600_v13 }
 0x4b8   : > { %4694 = vmatpush3.msra.mxu0 %v6630_v28  ;;  %4728 = vmatprep.subr.mxu1 %v8524_v57 }
 0x4b9   : > { %4695 = vmatprep.subr.mxu0 %v8524_v57  ;;  %4729 = vmatpush3.msra.mxu1 %v6598_v12 }
 0x4ba   : > { %4696 = vmatpush3.msra.mxu0 %v6628_v27  ;;  %4730 = vmatprep.subr.mxu1 %v8524_v57 }
 0x4bb   : > { %4697 = vmatprep.subr.mxu0 %v8524_v57  ;;  %4713 = vmatprep.mubr.msk.f32.mxu0 %vm6292_vm14, %v8524_v57 }
 0x4bc   : > { %4698 = vmatpush3.msra.mxu0 %v6626_v26  ;;  %4731 = vmatpush3.msra.mxu1 %v6596_v11 }
 0x4bd   : > { %4699 = vmatprep.subr.mxu0 %v8524_v57  ;;  %4732 = vmatprep.subr.mxu1 %v8524_v57 }
 0x4be   : > { %4700 = vmatpush3.msra.mxu0 %v6624_v25  ;;  %4733 = vmatpush3.msra.mxu1 %v6594_v10 }
 0x4bf   : > { %4701 = vmatprep.subr.mxu0 %v8524_v57  ;;  %4734 = vmatprep.subr.mxu1 %v8524_v57 }
 0x4c0   : > { %4702 = vmatpush3.msra.mxu0 %v6622_v24  ;;  %4735 = vmatpush3.msra.mxu1 %v6592_v9 }
 0x4c1   : > { %4703 = vmatprep.subr.mxu0 %v8524_v57  ;;  %4736 = vmatprep.subr.mxu1 %v8524_v57 }
 0x4c2   : > { %4704 = vmatpush3.msra.mxu0 %v6620_v23  ;;  %4737 = vmatpush3.msra.mxu1 %v6590_v8 }
 0x4c3   : > { %4705 = vmatprep.subr.mxu0 %v8524_v57  ;;  %4738 = vmatprep.subr.mxu1 %v8524_v57 }
 0x4c4   : > { %4706 = vmatpush3.msra.mxu0 %v6618_v22  ;;  %4739 = vmatpush3.msra.mxu1 %v6588_v7 }
 0x4c5   : > { %4707 = vmatprep.subr.mxu0 %v8524_v57  ;;  %4740 = vmatprep.subr.mxu1 %v8524_v57 }
 0x4c6   : > { %4708 = vmatpush3.msra.mxu0 %v6616_v21  ;;  %4741 = vmatpush3.msra.mxu1 %v6586_v6 }
 0x4c7   : > { %4709 = vmatprep.subr.mxu0 %v8524_v57  ;;  %4742 = vmatprep.subr.mxu1 %v8524_v57 }
 0x4c8   : > { %4710 = vmatpush3.msra.mxu0 %v6614_v20  ;;  %4743 = vmatpush3.msra.mxu1 %v6584_v5 }
 0x4c9   : > { %4711 = vmatprep.subr.mxu0 %v8524_v57  ;;  %5933 = vset.pattern.permute.xlu0 %v8522_v61 }
 0x4ca   : > { %4712 = vmatpush3.msra.mxu0 %v6612_v19  ;;  %1146 = vperm.xlu0 %5933, %v6880_v58  }
 0x4cb   : > { %4751 = vmatprep.subr.mxu0 %v8524_v57  ;;  %4744 = vmatprep.subr.mxu1 %v8524_v57 }
 0x4cc   : > { %4745 = vmatpush3.msra.mxu1 %v6582_v4  ;;  %4748 = vmatprep.mubr.msk.f32.mxu1 %vm6292_vm14, %v8524_v57 }
 0x4cd   : > { %4746 = vmatprep.subr.mxu1 %v8524_v57 }
 0x4ce   : > { %4747 = vmatpush3.msra.mxu1 %v6580_v3  ;;  %5935 = vset.pattern.permute.xlu0 %v8516_v48 }
 0x4cf   : > { %4786 = vmatprep.subr.mxu1 %v8524_v57  ;;  %1499 = vperm.xlu0 %5935, %v6880_v58  }
 0x53b   : > { %v1051_v59 = vpop.xlane.xlu0 %1050 }
 0x53c   : > { %v1052_v37 = vsub.f32 %v6813_v47, %v1051_v59 }
 0x53e   : > { %v1053_v38 = vmul.f32 1.442695, %v1052_v37 }
 0x540   : > { %5977 = vpow2.f32 %v1053_v38 }
 0x545   : > { %v6933_v2 = vpop.permute.xlu0 %1146 }
 0x546   : > { %vm1148_vm3 = vcmp.eq.s32.totalorder %v6933_v2, 1 }
 0x54d   : > { %v5978_v40 = vpop.eup %5977 }
 0x54e   : > { %4714 = vmatmul.mubr.f32.vlgmr.msra.gmra.mxu0 %v5978_v40  ;;  %v8518_v40 = vmov 2  }
 0x54f   : > { %4752 = vmatpush3.msra.mxu0 %v6642_v34  ;;  %4783 = vmatprep.mubr.msk.f32.mxu0 %vm6292_vm14, %v8524_v57 }
 0x550   : > { %4753 = vmatprep.subr.mxu0 %v8524_v57  ;;  %5934 = vset.pattern.permute.xlu1 %v8518_v40 }
 0x551   : > { %4754 = vmatpush3.msra.mxu0 %v6640_v33 }
 0x552   : > { %4755 = vmatprep.subr.mxu0 %v8524_v57 }
 0x553   : > { %4756 = vmatpush3.msra.mxu0 %v6638_v32 }
 0x554   : > { %4757 = vmatprep.subr.mxu0 %v8524_v57 }
 0x555   : > { %4758 = vmatpush3.msra.mxu0 %v6636_v31 }
 0x556   : > { %4759 = vmatprep.subr.mxu0 %v8524_v57 }
 0x557   : > { %4760 = vmatpush3.msra.mxu0 %v6634_v30 }
 0x558   : > { %4761 = vmatprep.subr.mxu0 %v8524_v57 }
 0x559   : > { %4762 = vmatpush3.msra.mxu0 %v6632_v29 }
 0x55a   : > { %4763 = vmatprep.subr.mxu0 %v8524_v57 }
 0x55b   : > { %4764 = vmatpush3.msra.mxu0 %v6630_v28 }
 0x55c   : > { %4765 = vmatprep.subr.mxu0 %v8524_v57 }
 0x55d   : > { %4766 = vmatpush3.msra.mxu0 %v6628_v27 }
 0x55e   : > { %4767 = vmatprep.subr.mxu0 %v8524_v57 }
 0x55f   : > { %4768 = vmatpush3.msra.mxu0 %v6626_v26 }
 0x560   : > { %4769 = vmatprep.subr.mxu0 %v8524_v57 }
 0x561   : > { %4770 = vmatpush3.msra.mxu0 %v6624_v25 }
 0x562   : > { %4771 = vmatprep.subr.mxu0 %v8524_v57 }
 0x563   : > { %4772 = vmatpush3.msra.mxu0 %v6622_v24 }
 0x564   : > { %4773 = vmatprep.subr.mxu0 %v8524_v57 }
 0x565   : > { %4774 = vmatpush3.msra.mxu0 %v6620_v23 }
 0x566   : > { %4775 = vmatprep.subr.mxu0 %v8524_v57 }
 0x567   : > { %4776 = vmatpush3.msra.mxu0 %v6618_v22 }
 0x568   : > { %4777 = vmatprep.subr.mxu0 %v8524_v57 }
 0x569   : > { %4778 = vmatpush3.msra.mxu0 %v6616_v21 }
 0x56a   : > { %4779 = vmatprep.subr.mxu0 %v8524_v57 }
 0x56b   : > { %4780 = vmatpush3.msra.mxu0 %v6614_v20 }
 0x56c   : > { %4781 = vmatprep.subr.mxu0 %v8524_v57 }
 0x56d   : > { %4782 = vmatpush3.msra.mxu0 %v6612_v19 }
 0x56e   : > { %4821 = vmatprep.subr.mxu0 %v8524_v57 }
 0x60e   : > { %v1121_v45 = vpop.f32.mrf.mxu0 }
 0x60f   : > { %5979 = vlog2.f32 %v1121_v45 }
 0x610   : > { %v4715_v46 = vpop.f32.mrf.mxu0 }
 0x61c   : > { %v5980_v52 = vpop.eup %5979 }
 0x61d   : > { %v1126_v55 = vmul.f32 0.6931472, %v5980_v52  ;;  %v1318_v52 = vrot.slane %v6709_v39, 7 }
 0x61f   : > { %v1127_v53 = vadd.f32 %v1126_v55, %v1051_v59  ;;  %v1317_v55 = vsel %vm1136_vm1, %v6696_v63, %v1316_v54 }
 0x621   : > { %v1142_v41 = vadd.f32 %v6936_v62, %v1127_v53 }
 0x623   : > { %v1149_v37 = vsel %vm1148_vm3, %v1142_v41, %v6813_v47 }
 0x624   : > { %v1235_v38 = vsel %vm1048_vm13, %v1149_v37, -inf }
 0x625   : > { %1236 = vmax.xlane.f32.xlu1 %v1235_v38 }
 0x636   : > { %1323 = vperm.xlu1 %5934, %v6880_v58  }
 0x6ae   : > { %v1237_v45 = vpop.xlane.xlu1 %1236 }
 0x6af   : > { %v1238_v46 = vsub.f32 %v1149_v37, %v1237_v45 }
 0x6b1   : > { %v1239_v42 = vmul.f32 1.442695, %v1238_v46  ;;  %v6989_v46 = vsel %vm1139_vm2, %v1318_v52, %v1317_v55 }
 0x6b2   : > { %v6986_v38 = vpop.permute.xlu1 %1323 }
 0x6b3   : > { %5981 = vpow2.f32 %v1239_v42  ;;  %8616 = vst [vmem:[#allocation41_spill] sm:$0xff] %v6986_v38  ;;  %vm1325_vm4 = vcmp.eq.s32.totalorder %v6986_v38, 1 }
 0x6c0   : > { %v5982_v59 = vpop.eup %5981 }
 0x6c1   : > { %4784 = vmatmul.mubr.f32.vlgmr.msra.gmra.mxu0 %v5982_v59 }
 0x6c2   : > { %4822 = vmatpush3.msra.mxu0 %v6642_v34  ;;  %4853 = vmatprep.mubr.msk.f32.mxu0 %vm6292_vm14, %v8524_v57 }
 0x6c3   : > { %4823 = vmatprep.subr.mxu0 %v8524_v57 }
 0x6c4   : > { %4824 = vmatpush3.msra.mxu0 %v6640_v33 }
 0x6c5   : > { %4825 = vmatprep.subr.mxu0 %v8524_v57 }
 0x6c6   : > { %4826 = vmatpush3.msra.mxu0 %v6638_v32 }
 0x6c7   : > { %4827 = vmatprep.subr.mxu0 %v8524_v57 }
 0x6c8   : > { %4828 = vmatpush3.msra.mxu0 %v6636_v31 }
 0x6c9   : > { %4829 = vmatprep.subr.mxu0 %v8524_v57 }
 0x6ca   : > { %4830 = vmatpush3.msra.mxu0 %v6634_v30 }
 0x6cb   : > { %4831 = vmatprep.subr.mxu0 %v8524_v57 }
 0x6cc   : > { %4832 = vmatpush3.msra.mxu0 %v6632_v29 }
 0x6cd   : > { %4833 = vmatprep.subr.mxu0 %v8524_v57 }
 0x6ce   : > { %4834 = vmatpush3.msra.mxu0 %v6630_v28 }
 0x6cf   : > { %4835 = vmatprep.subr.mxu0 %v8524_v57 }
 0x6d0   : > { %4836 = vmatpush3.msra.mxu0 %v6628_v27 }
 0x6d1   : > { %4837 = vmatprep.subr.mxu0 %v8524_v57 }
 0x6d2   : > { %4838 = vmatpush3.msra.mxu0 %v6626_v26 }
 0x6d3   : > { %4839 = vmatprep.subr.mxu0 %v8524_v57 }
 0x6d4   : > { %4840 = vmatpush3.msra.mxu0 %v6624_v25 }
 0x6d5   : > { %4841 = vmatprep.subr.mxu0 %v8524_v57 }
 0x6d6   : > { %4842 = vmatpush3.msra.mxu0 %v6622_v24 }
 0x6d7   : > { %4843 = vmatprep.subr.mxu0 %v8524_v57 }
 0x6d8   : > { %4844 = vmatpush3.msra.mxu0 %v6620_v23 }
 0x6d9   : > { %4845 = vmatprep.subr.mxu0 %v8524_v57 }
 0x6da   : > { %4846 = vmatpush3.msra.mxu0 %v6618_v22 }
 0x6db   : > { %4847 = vmatprep.subr.mxu0 %v8524_v57 }
 0x6dc   : > { %4848 = vmatpush3.msra.mxu0 %v6616_v21 }
 0x6dd   : > { %4849 = vmatprep.subr.mxu0 %v8524_v57 }
 0x6de   : > { %4850 = vmatpush3.msra.mxu0 %v6614_v20 }
 0x6df   : > { %4851 = vmatprep.subr.mxu0 %v8524_v57 }
 0x6e0   : > { %4852 = vmatpush3.msra.mxu0 %v6612_v19 }
 0x6e1   : > { %4891 = vmatprep.subr.mxu0 %v8524_v57 }
 0x781   : > { %v1307_v47 = vpop.f32.mrf.mxu0 }
 0x782   : > { %5983 = vlog2.f32 %v1307_v47 }
 0x783   : > { %v4785_v50 = vpop.f32.mrf.mxu0 }
 0x78f   : > { %v5984_v53 = vpop.eup %5983 }
 0x790   : > { %v1312_v41 = vmul.f32 0.6931472, %v5984_v53  ;;  %v1490_v53 = vrot.slane %v6689_v56, 3 }
 0x792   : > { %v1313_v42 = vadd.f32 %v1312_v41, %v1237_v45  ;;  %v1491_v41 = vrot.slane %v6679_v51, 2 }
 0x794   : > { %v1321_v59 = vadd.f32 %v6989_v46, %v1313_v42  ;;  %v1493_v42 = vrot.slane %v6696_v63, 1 }
 0x796   : > { %v1326_v47 = vsel %vm1325_vm4, %v1321_v59, %v1149_v37  ;;  %v1492_v59 = vsel %vm1133_vm0, %v1491_v41, %v1490_v53  ;;  %v8520_v41 = vmov 4  }
 0x797   : > { %v1411_v50 = vsel %vm1048_vm13, %v1326_v47, -inf  ;;  %5936 = vset.pattern.permute.xlu1 %v8520_v41 }
 0x798   : > { %1412 = vmax.xlane.f32.xlu1 %v1411_v50  ;;  %v1494_v50 = vsel %vm1136_vm1, %v1493_v42, %v1492_v59 }
 0x799   : > { %v7041_v48 = vsel %vm1139_vm2, %v6709_v39, %v1494_v50 }
 0x79a   : > { %8618 = vst [vmem:[#allocation43_spill] sm:$0xff] %v7041_v48 }
 0x7a9   : > { %1676 = vperm.xlu1 %5936, %v6880_v58  }
 0x821   : > { %v1413_v49 = vpop.xlane.xlu1 %1412 }
 0x822   : > { %v1414_v54 = vsub.f32 %v1326_v47, %v1413_v49 }
 0x824   : > { %v1415_v52 = vmul.f32 1.442695, %v1414_v54 }
 0x825   : > { %v7090_v61 = vpop.permute.xlu1 %1676 }
 0x826   : > { %5985 = vpow2.f32 %v1415_v52  ;;  %8619 = vst [vmem:[#allocation44_spill] sm:$0xff] %v7090_v61  ;;  %vm1678_vm6 = vcmp.eq.s32.totalorder %v7090_v61, 1 }
 0x833   : > { %v5986_v45 = vpop.eup %5985 }
 0x834   : > { %4854 = vmatmul.mubr.f32.vlgmr.msra.gmra.mxu0 %v5986_v45  ;;  %v7037_v45 = vpop.permute.xlu0 %1499 }
 0x835   : > { %4892 = vmatpush3.msra.mxu0 %v6642_v34  ;;  %4923 = vmatprep.mubr.msk.f32.mxu0 %vm6292_vm14, %v8524_v57  ;;  %8617 = vst [vmem:[#allocation42_spill] sm:$0xff] %v7037_v45  ;;  %vm1501_vm5 = vcmp.eq.s32.totalorder %v7037_v45, 1 }
 0x836   : > { %4893 = vmatprep.subr.mxu0 %v8524_v57 }
 0x837   : > { %4894 = vmatpush3.msra.mxu0 %v6640_v33 }
 0x838   : > { %4895 = vmatprep.subr.mxu0 %v8524_v57 }
 0x839   : > { %4896 = vmatpush3.msra.mxu0 %v6638_v32 }
 0x83a   : > { %4897 = vmatprep.subr.mxu0 %v8524_v57 }
 0x83b   : > { %4898 = vmatpush3.msra.mxu0 %v6636_v31 }
 0x83c   : > { %4899 = vmatprep.subr.mxu0 %v8524_v57 }
 0x83d   : > { %4900 = vmatpush3.msra.mxu0 %v6634_v30 }
 0x83e   : > { %4901 = vmatprep.subr.mxu0 %v8524_v57 }
 0x83f   : > { %4902 = vmatpush3.msra.mxu0 %v6632_v29 }
 0x840   : > { %4903 = vmatprep.subr.mxu0 %v8524_v57 }
 0x841   : > { %4904 = vmatpush3.msra.mxu0 %v6630_v28 }
 0x842   : > { %4905 = vmatprep.subr.mxu0 %v8524_v57 }
 0x843   : > { %4906 = vmatpush3.msra.mxu0 %v6628_v27 }
 0x844   : > { %4907 = vmatprep.subr.mxu0 %v8524_v57 }
 0x845   : > { %4908 = vmatpush3.msra.mxu0 %v6626_v26 }
 0x846   : > { %4909 = vmatprep.subr.mxu0 %v8524_v57 }
 0x847   : > { %4910 = vmatpush3.msra.mxu0 %v6624_v25 }
 0x848   : > { %4911 = vmatprep.subr.mxu0 %v8524_v57 }
 0x849   : > { %4912 = vmatpush3.msra.mxu0 %v6622_v24 }
 0x84a   : > { %4913 = vmatprep.subr.mxu0 %v8524_v57 }
 0x84b   : > { %4914 = vmatpush3.msra.mxu0 %v6620_v23 }
 0x84c   : > { %4915 = vmatprep.subr.mxu0 %v8524_v57 }
 0x84d   : > { %4916 = vmatpush3.msra.mxu0 %v6618_v22 }
 0x84e   : > { %4917 = vmatprep.subr.mxu0 %v8524_v57 }
 0x84f   : > { %4918 = vmatpush3.msra.mxu0 %v6616_v21 }
 0x850   : > { %4919 = vmatprep.subr.mxu0 %v8524_v57 }
 0x851   : > { %4920 = vmatpush3.msra.mxu0 %v6614_v20 }
 0x852   : > { %4921 = vmatprep.subr.mxu0 %v8524_v57 }
 0x853   : > { %4922 = vmatpush3.msra.mxu0 %v6612_v19 }
 0x854   : > { %4961 = vmatprep.subr.mxu0 %v8524_v57 }
 0x8f4   : > { %v1483_v37 = vpop.f32.mrf.mxu0 }
 0x8f5   : > { %5987 = vlog2.f32 %v1483_v37 }
 0x8f6   : > { %v4855_v55 = vpop.f32.mrf.mxu0 }
 0x902   : > { %v5988_v54 = vpop.eup %5987 }
 0x903   : > { %v1488_v52 = vmul.f32 0.6931472, %v5988_v54 }
 0x905   : > { %v1489_v37 = vadd.f32 %v1488_v52, %v1413_v49  ;;  %v1666_v52 = vrot.slane %v6689_v56, 4 }
 0x907   : > { %v1497_v55 = vadd.f32 %v7041_v48, %v1489_v37  ;;  %v1667_v37 = vrot.slane %v6679_v51, 3 }
 0x909   : > { %v1502_v40 = vsel %vm1501_vm5, %v1497_v55, %v1326_v47  ;;  %v1669_v55 = vrot.slane %v6696_v63, 2 }
 0x90a   : > { %v1587_v53 = vsel %vm1048_vm13, %v1502_v40, -inf }
 0x90b   : > { %1588 = vmax.xlane.f32.xlu0 %v1587_v53  ;;  %v1668_v53 = vsel %vm1133_vm0, %v1667_v37, %v1666_v52  ;;  %v8527_v37 = vmov 5  }
 0x90c   : > { %5937 = vset.pattern.permute.xlu0 %v8527_v37 }
 0x921   : > { %1853 = vperm.xlu0 %5937, %v6880_v58  }
 0x994   : > { %v1589_v42 = vpop.xlane.xlu0 %1588 }
 0x995   : > { %v1590_v59 = vsub.f32 %v1502_v40, %v1589_v42 }
 0x997   : > { %v1591_v50 = vmul.f32 1.442695, %v1590_v59  ;;  %v1671_v59 = vrot.slane %v6709_v39, 1 }
 0x999   : > { %5989 = vpow2.f32 %v1591_v50  ;;  %v1670_v50 = vsel %vm1136_vm1, %v1669_v55, %v1668_v53 }
 0x99c   : > { %v7142_v61 = vpop.permute.xlu0 %1853 }
 0x99d   : > { %8621 = vst [vmem:[#allocation45_spill] sm:$0xff] %v7142_v61  ;;  %vm1855_vm7 = vcmp.eq.s32.totalorder %v7142_v61, 1 }
 0x9a6   : > { %v5990_v49 = vpop.eup %5989 }
 0x9a7   : > { %4924 = vmatmul.mubr.f32.vlgmr.msra.gmra.mxu0 %v5990_v49 }
 0x9a8   : > { %4962 = vmatpush3.msra.mxu0 %v6642_v34  ;;  %4993 = vmatprep.mubr.msk.f32.mxu0 %vm6292_vm14, %v8524_v57 }
 0x9a9   : > { %4963 = vmatprep.subr.mxu0 %v8524_v57 }
 0x9aa   : > { %4964 = vmatpush3.msra.mxu0 %v6640_v33 }
 0x9ab   : > { %4965 = vmatprep.subr.mxu0 %v8524_v57 }
 0x9ac   : > { %4966 = vmatpush3.msra.mxu0 %v6638_v32 }
 0x9ad   : > { %4967 = vmatprep.subr.mxu0 %v8524_v57 }
 0x9ae   : > { %4968 = vmatpush3.msra.mxu0 %v6636_v31 }
 0x9af   : > { %4969 = vmatprep.subr.mxu0 %v8524_v57 }
 0x9b0   : > { %4970 = vmatpush3.msra.mxu0 %v6634_v30 }
 0x9b1   : > { %4971 = vmatprep.subr.mxu0 %v8524_v57 }
 0x9b2   : > { %4972 = vmatpush3.msra.mxu0 %v6632_v29 }
 0x9b3   : > { %4973 = vmatprep.subr.mxu0 %v8524_v57 }
 0x9b4   : > { %4974 = vmatpush3.msra.mxu0 %v6630_v28 }
 0x9b5   : > { %4975 = vmatprep.subr.mxu0 %v8524_v57 }
 0x9b6   : > { %4976 = vmatpush3.msra.mxu0 %v6628_v27 }
 0x9b7   : > { %4977 = vmatprep.subr.mxu0 %v8524_v57 }
 0x9b8   : > { %4978 = vmatpush3.msra.mxu0 %v6626_v26 }
 0x9b9   : > { %4979 = vmatprep.subr.mxu0 %v8524_v57 }
 0x9ba   : > { %4980 = vmatpush3.msra.mxu0 %v6624_v25 }
 0x9bb   : > { %4981 = vmatprep.subr.mxu0 %v8524_v57 }
 0x9bc   : > { %4982 = vmatpush3.msra.mxu0 %v6622_v24 }
 0x9bd   : > { %4983 = vmatprep.subr.mxu0 %v8524_v57 }
 0x9be   : > { %4984 = vmatpush3.msra.mxu0 %v6620_v23 }
 0x9bf   : > { %4985 = vmatprep.subr.mxu0 %v8524_v57 }
 0x9c0   : > { %4986 = vmatpush3.msra.mxu0 %v6618_v22 }
 0x9c1   : > { %4987 = vmatprep.subr.mxu0 %v8524_v57 }
 0x9c2   : > { %4988 = vmatpush3.msra.mxu0 %v6616_v21 }
 0x9c3   : > { %4989 = vmatprep.subr.mxu0 %v8524_v57 }
 0x9c4   : > { %4990 = vmatpush3.msra.mxu0 %v6614_v20 }
 0x9c5   : > { %4991 = vmatprep.subr.mxu0 %v8524_v57 }
 0x9c6   : > { %4992 = vmatpush3.msra.mxu0 %v6612_v19 }
 0x9c7   : > { %5031 = vmatprep.subr.mxu0 %v8524_v57  ;;  %v7093_v57 = vsel %vm1139_vm2, %v1671_v59, %v1670_v50 }
 0xa67   : > { %v1659_v47 = vpop.f32.mrf.mxu0 }
 0xa68   : > { %5991 = vlog2.f32 %v1659_v47 }
 0xa69   : > { %v4925_v54 = vpop.f32.mrf.mxu0 }
 0xa75   : > { %v5992_v49 = vpop.eup %5991 }
 0xa76   : > { %v1664_v41 = vmul.f32 0.6931472, %v5992_v49  ;;  %v1843_v49 = vrot.slane %v6689_v56, 5 }
 0xa78   : > { %v1665_v47 = vadd.f32 %v1664_v41, %v1589_v42  ;;  %v8620_v42 = vmov 0.0  }
 0xa7a   : > { %v1674_v54 = vadd.f32 %v7093_v57, %v1665_v47  ;;  %v1844_v47 = vrot.slane %v6679_v51, 4 }
 0xa7c   : > { %v1679_v48 = vsel %vm1678_vm6, %v1674_v54, %v1502_v40  ;;  %v1846_v54 = vrot.slane %v6696_v63, 3 }
 0xa7d   : > { %v1764_v52 = vsel %vm1048_vm13, %v1679_v48, -inf }
 0xa7e   : > { %1765 = vmax.xlane.f32.xlu1 %v1764_v52  ;;  %v1845_v52 = vsel %vm1133_vm0, %v1844_v47, %v1843_v49  ;;  %v8532_v47 = vmov 6  }
 0xa7f   : > { %5938 = vset.pattern.permute.xlu1 %v8532_v47 }
 0xb07   : > { %v1766_v55 = vpop.xlane.xlu1 %1765 }
 0xb08   : > { %v1767_v53 = vsub.f32 %v1679_v48, %v1766_v55 }
 0xb0a   : > { %v1768_v59 = vmul.f32 1.442695, %v1767_v53  ;;  %v1848_v53 = vrot.slane %v6709_v39, 2 }
 0xb0c   : > { %5993 = vpow2.f32 %v1768_v59  ;;  %v1847_v59 = vsel %vm1136_vm1, %v1846_v54, %v1845_v52 }
 0xb0d   : > { %v7145_v45 = vsel %vm1139_vm2, %v1848_v53, %v1847_v59  ;;  %v2020_v59 = vrot.slane %v6689_v56, 6 }
 0xb0e   : > { %8622 = vst [vmem:[#allocation46_spill] sm:$0xff] %v7145_v45 }
 0xb19   : > { %v5994_v41 = vpop.eup %5993 }
 0xb1a   : > { %4994 = vmatmul.mubr.f32.vlgmr.msra.gmra.mxu0 %v5994_v41 }
 0xb1b   : > { %5032 = vmatpush3.msra.mxu0 %v6642_v34  ;;  %5063 = vmatprep.mubr.msk.f32.mxu0 %vm6292_vm14, %v8620_v42 }
 0xb1c   : > { %5033 = vmatprep.subr.mxu0 %v8620_v42 }
 0xb1d   : > { %5034 = vmatpush3.msra.mxu0 %v6640_v33 }
 0xb1e   : > { %5035 = vmatprep.subr.mxu0 %v8620_v42 }
 0xb1f   : > { %5036 = vmatpush3.msra.mxu0 %v6638_v32 }
 0xb20   : > { %5037 = vmatprep.subr.mxu0 %v8620_v42 }
 0xb21   : > { %5038 = vmatpush3.msra.mxu0 %v6636_v31 }
 0xb22   : > { %5039 = vmatprep.subr.mxu0 %v8620_v42 }
 0xb23   : > { %5040 = vmatpush3.msra.mxu0 %v6634_v30 }
 0xb24   : > { %5041 = vmatprep.subr.mxu0 %v8620_v42 }
 0xb25   : > { %5042 = vmatpush3.msra.mxu0 %v6632_v29 }
 0xb26   : > { %5043 = vmatprep.subr.mxu0 %v8620_v42 }
 0xb27   : > { %5044 = vmatpush3.msra.mxu0 %v6630_v28 }
 0xb28   : > { %5045 = vmatprep.subr.mxu0 %v8620_v42 }
 0xb29   : > { %5046 = vmatpush3.msra.mxu0 %v6628_v27 }
 0xb2a   : > { %5047 = vmatprep.subr.mxu0 %v8620_v42 }
 0xb2b   : > { %5048 = vmatpush3.msra.mxu0 %v6626_v26 }
 0xb2c   : > { %5049 = vmatprep.subr.mxu0 %v8620_v42 }
 0xb2d   : > { %5050 = vmatpush3.msra.mxu0 %v6624_v25 }
 0xb2e   : > { %5051 = vmatprep.subr.mxu0 %v8620_v42 }
 0xb2f   : > { %5052 = vmatpush3.msra.mxu0 %v6622_v24 }
 0xb30   : > { %5053 = vmatprep.subr.mxu0 %v8620_v42 }
 0xb31   : > { %5054 = vmatpush3.msra.mxu0 %v6620_v23 }
 0xb32   : > { %5055 = vmatprep.subr.mxu0 %v8620_v42 }
 0xb33   : > { %5056 = vmatpush3.msra.mxu0 %v6618_v22 }
 0xb34   : > { %5057 = vmatprep.subr.mxu0 %v8620_v42 }
 0xb35   : > { %5058 = vmatpush3.msra.mxu0 %v6616_v21 }
 0xb36   : > { %5059 = vmatprep.subr.mxu0 %v8620_v42 }
 0xb37   : > { %5060 = vmatpush3.msra.mxu0 %v6614_v20 }
 0xb38   : > { %5061 = vmatprep.subr.mxu0 %v8620_v42 }
 0xb39   : > { %5062 = vmatpush3.msra.mxu0 %v6612_v19 }
 0xb3a   : > { %5101 = vmatprep.subr.mxu0 %v8620_v42 }
 0xbda   : > { %v1836_v40 = vpop.f32.mrf.mxu0 }
 0xbdb   : > { %5995 = vlog2.f32 %v1836_v40 }
 0xbdc   : > { %v4995_v50 = vpop.f32.mrf.mxu0 }
 0xbe8   : > { %v5996_v41 = vpop.eup %5995 }
 0xbe9   : > { %v1841_v37 = vmul.f32 0.6931472, %v5996_v41  ;;  %v2021_v41 = vrot.slane %v6679_v51, 5 }
 0xbeb   : > { %v1842_v40 = vadd.f32 %v1841_v37, %v1766_v55 }
 0xbed   : > { %v1851_v50 = vadd.f32 %v7145_v45, %v1842_v40  ;;  %v2023_v40 = vrot.slane %v6696_v63, 4 }
 0xbef   : > { %v1856_v38 = vsel %vm1855_vm7, %v1851_v50, %v1679_v48  ;;  %v2022_v50 = vsel %vm1133_vm0, %v2021_v41, %v2020_v59  ;;  %v8536_v41 = vmov 7  }
 0xbf0   : > { %v1941_v49 = vsel %vm1048_vm13, %v1856_v38, -inf }
 0xbf1   : > { %1942 = vmax.xlane.f32.xlu1 %v1941_v49  ;;  %v2025_v49 = vrot.slane %v6709_v39, 3 }
 0xc02   : > { %2030 = vperm.xlu1 %5938, %v6880_v58  }
 0xc06   : > { %5939 = vset.pattern.permute.xlu1 %v8536_v41 }
 0xc07   : > { %2207 = vperm.xlu1 %5939, %v6880_v58  }
 0xc7a   : > { %v1943_v54 = vpop.xlane.xlu1 %1942 }
 0xc7b   : > { %v1944_v52 = vsub.f32 %v1856_v38, %v1943_v54 }
 0xc7d   : > { %v1945_v53 = vmul.f32 1.442695, %v1944_v52  ;;  %v2024_v52 = vsel %vm1136_vm1, %v2023_v40, %v2022_v50 }
 0xc7e   : > { %v7194_v47 = vpop.permute.xlu1 %2030  ;;  %v7197_v61 = vsel %vm1139_vm2, %v2025_v49, %v2024_v52 }
 0xc7f   : > { %5997 = vpow2.f32 %v1945_v53  ;;  %8623 = vst [vmem:[#allocation47_spill] sm:$0xff] %v7194_v47  ;;  %8624 = vst [vmem:[#allocation48_spill] sm:$0xff] %v7197_v61  ;;  %vm2032_vm8 = vcmp.eq.s32.totalorder %v7194_v47, 1 }
 0xc82   : > { %v7246_v41 = vpop.permute.xlu1 %2207 }
 0xc83   : > { %8625 = vst [vmem:[#allocation49_spill] sm:$0xff] %v7246_v41  ;;  %vm2209_vm9 = vcmp.eq.s32.totalorder %v7246_v41, 1 }
 0xc8c   : > { %v5998_v37 = vpop.eup %5997 }
 0xc8d   : > { %5064 = vmatmul.mubr.f32.vlgmr.msra.gmra.mxu0 %v5998_v37 }
 0xc8e   : > { %5102 = vmatpush3.msra.mxu0 %v6642_v34  ;;  %5133 = vmatprep.mubr.msk.f32.mxu0 %vm6292_vm14, %v8620_v42 }
 0xc8f   : > { %5103 = vmatprep.subr.mxu0 %v8620_v42 }
 0xc90   : > { %5104 = vmatpush3.msra.mxu0 %v6640_v33 }
 0xc91   : > { %5105 = vmatprep.subr.mxu0 %v8620_v42 }
 0xc92   : > { %5106 = vmatpush3.msra.mxu0 %v6638_v32 }
 0xc93   : > { %5107 = vmatprep.subr.mxu0 %v8620_v42 }
 0xc94   : > { %5108 = vmatpush3.msra.mxu0 %v6636_v31 }
 0xc95   : > { %5109 = vmatprep.subr.mxu0 %v8620_v42 }
 0xc96   : > { %5110 = vmatpush3.msra.mxu0 %v6634_v30 }
 0xc97   : > { %5111 = vmatprep.subr.mxu0 %v8620_v42 }
 0xc98   : > { %5112 = vmatpush3.msra.mxu0 %v6632_v29 }
 0xc99   : > { %5113 = vmatprep.subr.mxu0 %v8620_v42 }
 0xc9a   : > { %5114 = vmatpush3.msra.mxu0 %v6630_v28 }
 0xc9b   : > { %5115 = vmatprep.subr.mxu0 %v8620_v42 }
 0xc9c   : > { %5116 = vmatpush3.msra.mxu0 %v6628_v27 }
 0xc9d   : > { %5117 = vmatprep.subr.mxu0 %v8620_v42 }
 0xc9e   : > { %5118 = vmatpush3.msra.mxu0 %v6626_v26 }
 0xc9f   : > { %5119 = vmatprep.subr.mxu0 %v8620_v42 }
 0xca0   : > { %5120 = vmatpush3.msra.mxu0 %v6624_v25 }
 0xca1   : > { %5121 = vmatprep.subr.mxu0 %v8620_v42 }
 0xca2   : > { %5122 = vmatpush3.msra.mxu0 %v6622_v24 }
 0xca3   : > { %5123 = vmatprep.subr.mxu0 %v8620_v42 }
 0xca4   : > { %5124 = vmatpush3.msra.mxu0 %v6620_v23 }
 0xca5   : > { %5125 = vmatprep.subr.mxu0 %v8620_v42 }
 0xca6   : > { %5126 = vmatpush3.msra.mxu0 %v6618_v22 }
 0xca7   : > { %5127 = vmatprep.subr.mxu0 %v8620_v42 }
 0xca8   : > { %5128 = vmatpush3.msra.mxu0 %v6616_v21 }
 0xca9   : > { %5129 = vmatprep.subr.mxu0 %v8620_v42 }
 0xcaa   : > { %5130 = vmatpush3.msra.mxu0 %v6614_v20 }
 0xcab   : > { %5131 = vmatprep.subr.mxu0 %v8620_v42 }
 0xcac   : > { %5132 = vmatpush3.msra.mxu0 %v6612_v19 }
 0xcad   : > { %5171 = vmatprep.subr.mxu0 %v8620_v42 }
 0xd4d   : > { %v2013_v48 = vpop.f32.mrf.mxu0 }
 0xd4e   : > { %5999 = vlog2.f32 %v2013_v48 }
 0xd4f   : > { %v5065_v55 = vpop.f32.mrf.mxu0 }
 0xd5b   : > { %v6000_v53 = vpop.eup %5999 }
 0xd5c   : > { %v2018_v37 = vmul.f32 0.6931472, %v6000_v53  ;;  %v2197_v53 = vrot.slane %v6689_v56, 7 }
 0xd5e   : > { %v2019_v48 = vadd.f32 %v2018_v37, %v1943_v54  ;;  %v2198_v37 = vrot.slane %v6679_v51, 6 }
 0xd60   : > { %v2028_v55 = vadd.f32 %v7197_v61, %v2019_v48  ;;  %v2200_v48 = vrot.slane %v6696_v63, 5 }
 0xd62   : > { %v2033_v45 = vsel %vm2032_vm8, %v2028_v55, %v1856_v38  ;;  %v2199_v55 = vsel %vm1133_vm0, %v2198_v37, %v2197_v53 }
 0xd63   : > { %v2118_v59 = vsel %vm1048_vm13, %v2033_v45, -inf }
 0xd64   : > { %2119 = vmax.xlane.f32.xlu0 %v2118_v59  ;;  %v2202_v59 = vrot.slane %v6709_v39, 4  ;;  %v8543_v39 = vmov 8  }
 0xd65   : > { %5940 = vset.pattern.permute.xlu0 %v8543_v39  ;;  %v2731_v39 = vrot.slane %v6686_v60, 1 }
 0xd7a   : > { %2387 = vperm.xlu0 %5940, %v6880_v58  }
 0xded   : > { %v2120_v40 = vpop.xlane.xlu0 %2119 }
 0xdee   : > { %v2121_v50 = vsub.f32 %v2033_v45, %v2120_v40 }
 0xdf0   : > { %v2122_v49 = vmul.f32 1.442695, %v2121_v50  ;;  %v2201_v50 = vsel %vm1136_vm1, %v2200_v48, %v2199_v55  ;;  %v2378_v55 = vrot.slane %v6686_v60, 7 }
 0xdf1   : > { %v7249_v47 = vsel %vm1139_vm2, %v2202_v59, %v2201_v50  ;;  %v2380_v59 = vrot.slane %v6706_v43, 6 }
 0xdf2   : > { %6001 = vpow2.f32 %v2122_v49  ;;  %8626 = vst [vmem:[#allocation50_spill] sm:$0xff] %v7249_v47  ;;  %v2379_v50 = vsel %vm1133_vm0, %v2378_v55, %v6701_v36  ;;  %v8539_v55 = vmov 9  }
 0xdf3   : > { %5941 = vset.pattern.permute.xlu1 %v8539_v55 }
 0xdff   : > { %v6002_v54 = vpop.eup %6001 }
 0xe00   : > { %5134 = vmatmul.mubr.f32.vlgmr.msra.gmra.mxu0 %v6002_v54 }
 0xe01   : > { %5172 = vmatpush3.msra.mxu0 %v6642_v34  ;;  %5203 = vmatprep.mubr.msk.f32.mxu0 %vm6292_vm14, %v8620_v42 }
 0xe02   : > { %5173 = vmatprep.subr.mxu0 %v8620_v42 }
 0xe03   : > { %5174 = vmatpush3.msra.mxu0 %v6640_v33 }
 0xe04   : > { %5175 = vmatprep.subr.mxu0 %v8620_v42 }
 0xe05   : > { %5176 = vmatpush3.msra.mxu0 %v6638_v32 }
 0xe06   : > { %5177 = vmatprep.subr.mxu0 %v8620_v42 }
 0xe07   : > { %5178 = vmatpush3.msra.mxu0 %v6636_v31 }
 0xe08   : > { %5179 = vmatprep.subr.mxu0 %v8620_v42 }
 0xe09   : > { %5180 = vmatpush3.msra.mxu0 %v6634_v30 }
 0xe0a   : > { %5181 = vmatprep.subr.mxu0 %v8620_v42 }
 0xe0b   : > { %5182 = vmatpush3.msra.mxu0 %v6632_v29 }
 0xe0c   : > { %5183 = vmatprep.subr.mxu0 %v8620_v42 }
 0xe0d   : > { %5184 = vmatpush3.msra.mxu0 %v6630_v28 }
 0xe0e   : > { %5185 = vmatprep.subr.mxu0 %v8620_v42 }
 0xe0f   : > { %5186 = vmatpush3.msra.mxu0 %v6628_v27 }
 0xe10   : > { %5187 = vmatprep.subr.mxu0 %v8620_v42 }
 0xe11   : > { %5188 = vmatpush3.msra.mxu0 %v6626_v26 }
 0xe12   : > { %5189 = vmatprep.subr.mxu0 %v8620_v42 }
 0xe13   : > { %5190 = vmatpush3.msra.mxu0 %v6624_v25 }
 0xe14   : > { %5191 = vmatprep.subr.mxu0 %v8620_v42 }
 0xe15   : > { %5192 = vmatpush3.msra.mxu0 %v6622_v24 }
 0xe16   : > { %5193 = vmatprep.subr.mxu0 %v8620_v42 }
 0xe17   : > { %5194 = vmatpush3.msra.mxu0 %v6620_v23 }
 0xe18   : > { %5195 = vmatprep.subr.mxu0 %v8620_v42 }
 0xe19   : > { %5196 = vmatpush3.msra.mxu0 %v6618_v22 }
 0xe1a   : > { %5197 = vmatprep.subr.mxu0 %v8620_v42 }
 0xe1b   : > { %5198 = vmatpush3.msra.mxu0 %v6616_v21 }
 0xe1c   : > { %5199 = vmatprep.subr.mxu0 %v8620_v42 }
 0xe1d   : > { %5200 = vmatpush3.msra.mxu0 %v6614_v20 }
 0xe1e   : > { %5201 = vmatprep.subr.mxu0 %v8620_v42 }
 0xe1f   : > { %5202 = vmatpush3.msra.mxu0 %v6612_v19 }
 0xe20   : > { %5241 = vmatprep.subr.mxu0 %v8620_v42 }
 0xec0   : > { %v2190_v38 = vpop.f32.mrf.mxu0 }
 0xec1   : > { %6003 = vlog2.f32 %v2190_v38 }
 0xec2   : > { %v5135_v52 = vpop.f32.mrf.mxu0 }
 0xece   : > { %v6004_v49 = vpop.eup %6003 }
 0xecf   : > { %v2195_v54 = vmul.f32 0.6931472, %v6004_v49  ;;  %v2382_v49 = vrot.slane %v6716_v44, 5 }
 0xed1   : > { %v2196_v38 = vadd.f32 %v2195_v54, %v2120_v40  ;;  %v2381_v54 = vsel %vm1136_vm1, %v2380_v59, %v2379_v50 }
 0xed3   : > { %v2205_v51 = vadd.f32 %v7249_v47, %v2196_v38 }
 0xed5   : > { %v2210_v56 = vsel %vm2209_vm9, %v2205_v51, %v2033_v45 }
 0xed6   : > { %v2295_v63 = vsel %vm1048_vm13, %v2210_v56, -inf }
 0xed7   : > { %2296 = vmax.xlane.f32.xlu1 %v2295_v63  ;;  %v7298_v63 = vpop.permute.xlu0 %2387 }
 0xed8   : > { %8627 = vst [vmem:[#allocation51_spill] sm:$0xff] %v7298_v63  ;;  %vm8566_vm10 = vcmp.eq.s32.totalorder %v7298_v63, 1 }
 0xf60   : > { %v2297_v52 = vpop.xlane.xlu1 %2296 }
 0xf61   : > { %v2298_v53 = vsub.f32 %v2210_v56, %v2297_v52 }
 0xf63   : > { %v2299_v37 = vmul.f32 1.442695, %v2298_v53  ;;  %v7301_v53 = vsel %vm1139_vm2, %v2382_v49, %v2381_v54 }
 0xf64   : > { %8628 = vst [vmem:[#allocation52_spill] sm:$0xff] %v7301_v53 }
 0xf65   : > { %6005 = vpow2.f32 %v2299_v37 }
 0xf72   : > { %v6006_v40 = vpop.eup %6005 }
 0xf73   : > { %5204 = vmatmul.mubr.f32.vlgmr.msra.gmra.mxu0 %v6006_v40 }
 0xf74   : > { %5242 = vmatpush3.msra.mxu0 %v6642_v34  ;;  %5273 = vmatprep.mubr.msk.f32.mxu0 %vm6292_vm14, %v8620_v42 }
 0xf75   : > { %5243 = vmatprep.subr.mxu0 %v8620_v42 }
 0xf76   : > { %5244 = vmatpush3.msra.mxu0 %v6640_v33 }
 0xf77   : > { %5245 = vmatprep.subr.mxu0 %v8620_v42 }
 0xf78   : > { %5246 = vmatpush3.msra.mxu0 %v6638_v32 }
 0xf79   : > { %5247 = vmatprep.subr.mxu0 %v8620_v42 }
 0xf7a   : > { %5248 = vmatpush3.msra.mxu0 %v6636_v31 }
 0xf7b   : > { %5249 = vmatprep.subr.mxu0 %v8620_v42 }
 0xf7c   : > { %5250 = vmatpush3.msra.mxu0 %v6634_v30 }
 0xf7d   : > { %5251 = vmatprep.subr.mxu0 %v8620_v42 }
 0xf7e   : > { %5252 = vmatpush3.msra.mxu0 %v6632_v29 }
 0xf7f   : > { %5253 = vmatprep.subr.mxu0 %v8620_v42 }
 0xf80   : > { %5254 = vmatpush3.msra.mxu0 %v6630_v28 }
 0xf81   : > { %5255 = vmatprep.subr.mxu0 %v8620_v42 }
 0xf82   : > { %5256 = vmatpush3.msra.mxu0 %v6628_v27 }
 0xf83   : > { %5257 = vmatprep.subr.mxu0 %v8620_v42 }
 0xf84   : > { %5258 = vmatpush3.msra.mxu0 %v6626_v26 }
 0xf85   : > { %5259 = vmatprep.subr.mxu0 %v8620_v42 }
 0xf86   : > { %5260 = vmatpush3.msra.mxu0 %v6624_v25 }
 0xf87   : > { %5261 = vmatprep.subr.mxu0 %v8620_v42 }
 0xf88   : > { %5262 = vmatpush3.msra.mxu0 %v6622_v24 }
 0xf89   : > { %5263 = vmatprep.subr.mxu0 %v8620_v42 }
 0xf8a   : > { %5264 = vmatpush3.msra.mxu0 %v6620_v23 }
 0xf8b   : > { %5265 = vmatprep.subr.mxu0 %v8620_v42 }
 0xf8c   : > { %5266 = vmatpush3.msra.mxu0 %v6618_v22 }
 0xf8d   : > { %5267 = vmatprep.subr.mxu0 %v8620_v42 }
 0xf8e   : > { %5268 = vmatpush3.msra.mxu0 %v6616_v21 }
 0xf8f   : > { %5269 = vmatprep.subr.mxu0 %v8620_v42 }
 0xf90   : > { %5270 = vmatpush3.msra.mxu0 %v6614_v20 }
 0xf91   : > { %5271 = vmatprep.subr.mxu0 %v8620_v42 }
 0xf92   : > { %5272 = vmatpush3.msra.mxu0 %v6612_v19 }
 0xf93   : > { %5311 = vmatprep.subr.mxu0 %v8620_v42 }
0x1033   : > { %v2367_v45 = vpop.f32.mrf.mxu0 }
0x1034   : > { %6007 = vlog2.f32 %v2367_v45 }
0x1035   : > { %v5205_v48 = vpop.f32.mrf.mxu0 }
0x1041   : > { %v6008_v38 = vpop.eup %6007 }
0x1042   : > { %v2372_v51 = vmul.f32 0.6931472, %v6008_v38 }
0x1044   : > { %v2373_v37 = vadd.f32 %v2372_v51, %v2297_v52  ;;  %v2554_v51 = vrot.slane %v6701_v36, 1 }
0x1046   : > { %v2385_v40 = vadd.f32 %v7301_v53, %v2373_v37  ;;  %v2556_v37 = vrot.slane %v6706_v43, 7 }
0x1048   : > { %v7307_v45 = vsel %vm8566_vm10, %v2385_v40, %v2210_v56  ;;  %v8541_v56 = vmov 11   ;;  %v2555_v40 = vsel %vm1133_vm0, %v6686_v60, %v2554_v51 }
0x1049   : > { %v2475_v48 = vsel %vm1048_vm13, %v7307_v45, -inf }
0x104a   : > { %2476 = vmax.xlane.f32.xlu1 %v2475_v48  ;;  %v2558_v48 = vrot.slane %v6716_v44, 6 }
0x105b   : > { %2563 = vperm.xlu1 %5941, %v6880_v58  }
0x105f   : > { %5943 = vset.pattern.permute.xlu1 %v8541_v56 }
0x10d3   : > { %v2477_v59 = vpop.xlane.xlu1 %2476 }
0x10d4   : > { %v2478_v52 = vsub.f32 %v7307_v45, %v2477_v59 }
0x10d6   : > { %v2479_v50 = vmul.f32 1.442695, %v2478_v52  ;;  %v2557_v52 = vsel %vm1136_vm1, %v2556_v37, %v2555_v40  ;;  %v8545_v40 = vmov 12  }
0x10d7   : > { %v7355_v55 = vpop.permute.xlu1 %2563  ;;  %v7358_v56 = vsel %vm1139_vm2, %v2558_v48, %v2557_v52  ;;  %v8632_v48 = vmov 2   ;;  %v8633_v52 = vmov 3  }
0x10d8   : > { %6009 = vpow2.f32 %v2479_v50  ;;  %8629 = vst [vmem:[#allocation53_spill] sm:$0xff] %v7355_v55  ;;  %8630 = vst [vmem:[#allocation54_spill] sm:$0xff] %v7358_v56  ;;  %vm8565_vm11 = vcmp.eq.s32.totalorder %v7355_v55, 1 }
0x10e5   : > { %v6010_v49 = vpop.eup %6009 }
0x10e6   : > { %5274 = vmatmul.mubr.f32.vlgmr.msra.gmra.mxu0 %v6010_v49 }
0x10e7   : > { %5312 = vmatpush3.msra.mxu0 %v6642_v34  ;;  %5343 = vmatprep.mubr.msk.f32.mxu0 %vm6292_vm14, %v8620_v42 }
0x10e8   : > { %5313 = vmatprep.subr.mxu0 %v8620_v42 }
0x10e9   : > { %5314 = vmatpush3.msra.mxu0 %v6640_v33 }
0x10ea   : > { %5315 = vmatprep.subr.mxu0 %v8620_v42 }
0x10eb   : > { %5316 = vmatpush3.msra.mxu0 %v6638_v32 }
0x10ec   : > { %5317 = vmatprep.subr.mxu0 %v8620_v42 }
0x10ed   : > { %5318 = vmatpush3.msra.mxu0 %v6636_v31 }
0x10ee   : > { %5319 = vmatprep.subr.mxu0 %v8620_v42 }
0x10ef   : > { %5320 = vmatpush3.msra.mxu0 %v6634_v30 }
0x10f0   : > { %5321 = vmatprep.subr.mxu0 %v8620_v42 }
0x10f1   : > { %5322 = vmatpush3.msra.mxu0 %v6632_v29 }
0x10f2   : > { %5323 = vmatprep.subr.mxu0 %v8620_v42 }
0x10f3   : > { %5324 = vmatpush3.msra.mxu0 %v6630_v28 }
0x10f4   : > { %5325 = vmatprep.subr.mxu0 %v8620_v42 }
0x10f5   : > { %5326 = vmatpush3.msra.mxu0 %v6628_v27 }
0x10f6   : > { %5327 = vmatprep.subr.mxu0 %v8620_v42 }
0x10f7   : > { %5328 = vmatpush3.msra.mxu0 %v6626_v26 }
0x10f8   : > { %5329 = vmatprep.subr.mxu0 %v8620_v42 }
0x10f9   : > { %5330 = vmatpush3.msra.mxu0 %v6624_v25 }
0x10fa   : > { %5331 = vmatprep.subr.mxu0 %v8620_v42 }
0x10fb   : > { %5332 = vmatpush3.msra.mxu0 %v6622_v24 }
0x10fc   : > { %5333 = vmatprep.subr.mxu0 %v8620_v42 }
0x10fd   : > { %5334 = vmatpush3.msra.mxu0 %v6620_v23 }
0x10fe   : > { %5335 = vmatprep.subr.mxu0 %v8620_v42 }
0x10ff   : > { %5336 = vmatpush3.msra.mxu0 %v6618_v22 }
0x1100   : > { %5337 = vmatprep.subr.mxu0 %v8620_v42 }
0x1101   : > { %5338 = vmatpush3.msra.mxu0 %v6616_v21 }
0x1102   : > { %5339 = vmatprep.subr.mxu0 %v8620_v42 }
0x1103   : > { %5340 = vmatpush3.msra.mxu0 %v6614_v20 }
0x1104   : > { %5341 = vmatprep.subr.mxu0 %v8620_v42 }
0x1105   : > { %5342 = vmatpush3.msra.mxu0 %v6612_v19 }
0x1106   : > { %5381 = vmatprep.subr.mxu0 %v8620_v42 }
0x11a6   : > { %v2547_v54 = vpop.f32.mrf.mxu0 }
0x11a7   : > { %6011 = vlog2.f32 %v2547_v54 }
0x11a8   : > { %v5275_v38 = vpop.f32.mrf.mxu0 }
0x11b4   : > { %v6012_v50 = vpop.eup %6011 }
0x11b5   : > { %v2552_v49 = vmul.f32 0.6931472, %v6012_v50  ;;  %v8634_v50 = vmov 5  }
0x11b7   : > { %v2553_v54 = vadd.f32 %v2552_v49, %v2477_v59  ;;  %v8631_v59 = vmov 1  }
0x11b9   : > { %v2561_v38 = vadd.f32 %v7358_v56, %v2553_v54 }
0x11bb   : > { %v7365_v51 = vsel %vm8565_vm11, %v2561_v38, %v7307_v45  ;;  %v8547_v45 = vmov 10  }
0x11bc   : > { %v2651_v37 = vsel %vm1048_vm13, %v7365_v51, -inf  ;;  %5942 = vset.pattern.permute.xlu0 %v8547_v45  ;;  %v2734_v45 = vrot.slane %v6716_v44, 7 }
0x11bd   : > { %2652 = vmax.xlane.f32.xlu1 %v2651_v37  ;;  %2739 = vperm.xlu0 %5942, %v6880_v58  }
0x11ce   : > { %2915 = vperm.xlu1 %5943, %v6880_v58  }
0x11d2   : > { %5944 = vset.pattern.permute.xlu1 %v8545_v40 }
0x11d3   : > { %3092 = vperm.xlu1 %5944, %v6880_v58  }
0x11d7   : > { %5945 = vset.pattern.permute.xlu1 %v8631_v59 }
0x11d8   : > { %1043 = vperm.xlu1 %5945, %v6571_v0  }
0x11dc   : > { %5947 = vset.pattern.permute.xlu1 %v8632_v48 }
0x11dd   : > { %1230 = vperm.xlu1 %5947, %v6571_v0  }
0x11e1   : > { %5948 = vset.pattern.permute.xlu1 %v8633_v52 }
0x11e2   : > { %1406 = vperm.xlu1 %5948, %v6571_v0  }
0x11e6   : > { %5950 = vset.pattern.permute.xlu1 %v8634_v50 }
0x1238   : > { %v7422_v56 = vpop.permute.xlu0 %2739 }
0x1239   : > { %8635 = vst [vmem:[#allocation55_spill] sm:$0xff] %v7422_v56  ;;  %vm8564_vm12 = vcmp.eq.s32.totalorder %v7422_v56, 1 }
0x1246   : > { %v2653_v49 = vpop.xlane.xlu1 %2652 }
0x1247   : > { %v2654_v54 = vsub.f32 %v7365_v51, %v2653_v49 }
0x1249   : > { %v2655_v38 = vmul.f32 1.442695, %v2654_v54 }
0x124b   : > { %6013 = vpow2.f32 %v2655_v38 }
0x1258   : > { %v6014_v37 = vpop.eup %6013 }
0x1259   : > { %5344 = vmatmul.mubr.f32.vlgmr.msra.gmra.mxu0 %v6014_v37  ;;  %v2730_v37 = vrot.slane %v6701_v36, 2 }
0x125a   : > { %5382 = vmatpush3.msra.mxu0 %v6642_v34  ;;  %5413 = vmatprep.mubr.msk.f32.mxu0 %vm6292_vm14, %v8620_v42 }
0x125b   : > { %5383 = vmatprep.subr.mxu0 %v8620_v42  ;;  %v2732_v40 = vsel %vm1133_vm0, %v2731_v39, %v2730_v37 }
0x125c   : > { %5384 = vmatpush3.msra.mxu0 %v6640_v33  ;;  %v2733_v55 = vsel %vm1136_vm1, %v6706_v43, %v2732_v40 }
0x125d   : > { %5385 = vmatprep.subr.mxu0 %v8620_v42  ;;  %v7425_v53 = vsel %vm1139_vm2, %v2734_v45, %v2733_v55  ;;  %v2907_v55 = vrot.slane %v6686_v60, 2 }
0x125e   : > { %5386 = vmatpush3.msra.mxu0 %v6638_v32  ;;  %8636 = vst [vmem:[#allocation56_spill] sm:$0xff] %v7425_v53 }
0x125f   : > { %5387 = vmatprep.subr.mxu0 %v8620_v42 }
0x1260   : > { %5388 = vmatpush3.msra.mxu0 %v6636_v31 }
0x1261   : > { %5389 = vmatprep.subr.mxu0 %v8620_v42 }
0x1262   : > { %5390 = vmatpush3.msra.mxu0 %v6634_v30 }
0x1263   : > { %5391 = vmatprep.subr.mxu0 %v8620_v42 }
0x1264   : > { %5392 = vmatpush3.msra.mxu0 %v6632_v29 }
0x1265   : > { %5393 = vmatprep.subr.mxu0 %v8620_v42 }
0x1266   : > { %5394 = vmatpush3.msra.mxu0 %v6630_v28 }
0x1267   : > { %5395 = vmatprep.subr.mxu0 %v8620_v42 }
0x1268   : > { %5396 = vmatpush3.msra.mxu0 %v6628_v27 }
0x1269   : > { %5397 = vmatprep.subr.mxu0 %v8620_v42 }
0x126a   : > { %5398 = vmatpush3.msra.mxu0 %v6626_v26 }
0x126b   : > { %5399 = vmatprep.subr.mxu0 %v8620_v42 }
0x126c   : > { %5400 = vmatpush3.msra.mxu0 %v6624_v25 }
0x126d   : > { %5401 = vmatprep.subr.mxu0 %v8620_v42 }
0x126e   : > { %5402 = vmatpush3.msra.mxu0 %v6622_v24 }
0x126f   : > { %5403 = vmatprep.subr.mxu0 %v8620_v42 }
0x1270   : > { %5404 = vmatpush3.msra.mxu0 %v6620_v23 }
0x1271   : > { %5405 = vmatprep.subr.mxu0 %v8620_v42 }
0x1272   : > { %5406 = vmatpush3.msra.mxu0 %v6618_v22 }
0x1273   : > { %5407 = vmatprep.subr.mxu0 %v8620_v42 }
0x1274   : > { %5408 = vmatpush3.msra.mxu0 %v6616_v21 }
0x1275   : > { %5409 = vmatprep.subr.mxu0 %v8620_v42 }
0x1276   : > { %5410 = vmatpush3.msra.mxu0 %v6614_v20 }
0x1277   : > { %5411 = vmatprep.subr.mxu0 %v8620_v42 }
0x1278   : > { %5412 = vmatpush3.msra.mxu0 %v6612_v19 }
0x1279   : > { %5451 = vmatprep.subr.mxu0 %v8620_v42 }
0x1319   : > { %v2723_v54 = vpop.f32.mrf.mxu0 }
0x131a   : > { %6015 = vlog2.f32 %v2723_v54 }
0x131b   : > { %v5345_v38 = vpop.f32.mrf.mxu0 }
0x1327   : > { %v6016_v63 = vpop.eup %6015 }
0x1328   : > { %v2728_v41 = vmul.f32 0.6931472, %v6016_v63 }
0x132a   : > { %v2729_v54 = vadd.f32 %v2728_v41, %v2653_v49  ;;  %v2906_v41 = vrot.slane %v6701_v36, 3 }
0x132c   : > { %v2737_v38 = vadd.f32 %v7425_v53, %v2729_v54  ;;  %v2908_v45 = vsel %vm1133_vm0, %v2907_v55, %v2906_v41 }
0x132e   : > { %v2742_v39 = vsel %vm8564_vm12, %v2737_v38, %v7365_v51  ;;  %v2909_v51 = vrot.slane %v6706_v43, 1 }
0x132f   : > { %v2827_v37 = vsel %vm1048_vm13, %v2742_v39, -inf }
0x1330   : > { %2828 = vmax.xlane.f32.xlu0 %v2827_v37  ;;  %v2910_v49 = vsel %vm1136_vm1, %v2909_v51, %v2908_v45 }
0x1331   : > { %v7474_v37 = vsel %vm1139_vm2, %v6716_v44, %v2910_v49 }
0x1332   : > { %8637 = vst [vmem:[#allocation57_spill] sm:$0xff] %v7474_v37 }
0x13b9   : > { %v2829_v40 = vpop.xlane.xlu0 %2828 }
0x13ba   : > { %v2830_v61 = vsub.f32 %v2742_v39, %v2829_v40 }
0x13bc   : > { %v2831_v63 = vmul.f32 1.442695, %v2830_v61 }
0x13be   : > { %6017 = vpow2.f32 %v2831_v63  ;;  %v7476_v63 = vpop.permute.xlu1 %2915 }
0x13bf   : > { %8638 = vst [vmem:[#allocation58_spill] sm:$0xff] %v7476_v63  ;;  %vm8561_vm15 = vcmp.eq.s32.totalorder %v7476_v63, 1 }
0x13cb   : > { %v6018_v47 = vpop.eup %6017 }
0x13cc   : > { %5414 = vmatmul.mubr.f32.vlgmr.msra.gmra.mxu0 %v6018_v47 }
0x13cd   : > { %5452 = vmatpush3.msra.mxu0 %v6642_v34  ;;  %5483 = vmatprep.mubr.msk.f32.mxu0 %vm6292_vm14, %v8620_v42 }
0x13ce   : > { %5453 = vmatprep.subr.mxu0 %v8620_v42 }
0x13cf   : > { %5454 = vmatpush3.msra.mxu0 %v6640_v33 }
0x13d0   : > { %5455 = vmatprep.subr.mxu0 %v8620_v42 }
0x13d1   : > { %5456 = vmatpush3.msra.mxu0 %v6638_v32 }
0x13d2   : > { %5457 = vmatprep.subr.mxu0 %v8620_v42 }
0x13d3   : > { %5458 = vmatpush3.msra.mxu0 %v6636_v31 }
0x13d4   : > { %5459 = vmatprep.subr.mxu0 %v8620_v42 }
0x13d5   : > { %5460 = vmatpush3.msra.mxu0 %v6634_v30 }
0x13d6   : > { %5461 = vmatprep.subr.mxu0 %v8620_v42 }
0x13d7   : > { %5462 = vmatpush3.msra.mxu0 %v6632_v29 }
0x13d8   : > { %5463 = vmatprep.subr.mxu0 %v8620_v42 }
0x13d9   : > { %5464 = vmatpush3.msra.mxu0 %v6630_v28 }
0x13da   : > { %5465 = vmatprep.subr.mxu0 %v8620_v42 }
0x13db   : > { %5466 = vmatpush3.msra.mxu0 %v6628_v27 }
0x13dc   : > { %5467 = vmatprep.subr.mxu0 %v8620_v42 }
0x13dd   : > { %5468 = vmatpush3.msra.mxu0 %v6626_v26 }
0x13de   : > { %5469 = vmatprep.subr.mxu0 %v8620_v42 }
0x13df   : > { %5470 = vmatpush3.msra.mxu0 %v6624_v25 }
0x13e0   : > { %5471 = vmatprep.subr.mxu0 %v8620_v42 }
0x13e1   : > { %5472 = vmatpush3.msra.mxu0 %v6622_v24 }
0x13e2   : > { %5473 = vmatprep.subr.mxu0 %v8620_v42 }
0x13e3   : > { %5474 = vmatpush3.msra.mxu0 %v6620_v23 }
0x13e4   : > { %5475 = vmatprep.subr.mxu0 %v8620_v42 }
0x13e5   : > { %5476 = vmatpush3.msra.mxu0 %v6618_v22 }
0x13e6   : > { %5477 = vmatprep.subr.mxu0 %v8620_v42 }
0x13e7   : > { %5478 = vmatpush3.msra.mxu0 %v6616_v21 }
0x13e8   : > { %5479 = vmatprep.subr.mxu0 %v8620_v42 }
0x13e9   : > { %5480 = vmatpush3.msra.mxu0 %v6614_v20 }
0x13ea   : > { %5481 = vmatprep.subr.mxu0 %v8620_v42 }
0x13eb   : > { %5482 = vmatpush3.msra.mxu0 %v6612_v19 }
0x13ec   : > { %5521 = vmatprep.subr.mxu0 %v8620_v42 }
0x148c   : > { %v2899_v61 = vpop.f32.mrf.mxu0 }
0x148d   : > { %6019 = vlog2.f32 %v2899_v61 }
0x148e   : > { %v5415_v47 = vpop.f32.mrf.mxu0 }
0x149a   : > { %v6020_v54 = vpop.eup %6019 }
0x149b   : > { %v2904_v38 = vmul.f32 0.6931472, %v6020_v54 }
0x149d   : > { %v2905_v61 = vadd.f32 %v2904_v38, %v2829_v40  ;;  %v3082_v38 = vrot.slane %v6701_v36, 4 }
0x149f   : > { %v2913_v47 = vadd.f32 %v7474_v37, %v2905_v61  ;;  %v3083_v61 = vrot.slane %v6686_v60, 3 }
0x14a1   : > { %v2918_v56 = vsel %vm8561_vm15, %v2913_v47, %v2742_v39  ;;  %v8559_v39 = vmov 13   ;;  %v3085_v47 = vrot.slane %v6706_v43, 2 }
0x14a2   : > { %v3003_v41 = vsel %vm1048_vm13, %v2918_v56, -inf  ;;  %5946 = vset.pattern.permute.xlu0 %v8559_v39  ;;  %v7527_v39 = vpop.permute.xlu1 %3092 }
0x14a3   : > { %3004 = vmax.xlane.f32.xlu0 %v3003_v41  ;;  %v3084_v41 = vsel %vm1133_vm0, %v3083_v61, %v3082_v38  ;;  %8640 = vst [vmem:[#allocation60_spill] sm:$0xff] %v7527_v39  ;;  %vm8563_vm15 = vcmp.eq.s32.totalorder %v7527_v39, 1  ;;  %v8641_v61 = vmov 4  }
0x152c   : > { %v3005_v55 = vpop.xlane.xlu0 %3004 }
0x152d   : > { %v3006_v51 = vsub.f32 %v2918_v56, %v3005_v55 }
0x152f   : > { %v3007_v45 = vmul.f32 1.442695, %v3006_v51  ;;  %v3087_v51 = vrot.slane %v6716_v44, 1 }
0x1531   : > { %6021 = vpow2.f32 %v3007_v45  ;;  %v3086_v45 = vsel %vm1136_vm1, %v3085_v47, %v3084_v41  ;;  %v1041_v47 = vld [vmem:[#allocation5] sm:$0xf]  ;;  %v8645_v41 = vmov 12  }
0x1532   : > { %v7525_v37 = vsel %vm1139_vm2, %v3087_v51, %v3086_v45  ;;  %4749 = vmatmul.mubr.f32.vlgmr.msra.gmra.mxu1 %v1041_v47  ;;  %v8646_v51 = vmov 13   ;;  %v8569_v45 = vmov 14  }
0x1533   : > { %8639 = vst [vmem:[#allocation59_spill] sm:$0xff] %v7525_v37  ;;  %4787 = vmatpush3.msra.mxu1 %v6610_v18  ;;  %4818 = vmatprep.mubr.msk.f32.mxu1 %vm6292_vm14, %v8620_v42 }
0x1534   : > { %4788 = vmatprep.subr.mxu1 %v8620_v42 }
0x1535   : > { %4789 = vmatpush3.msra.mxu1 %v6608_v17 }
0x1536   : > { %4790 = vmatprep.subr.mxu1 %v8620_v42 }
0x1537   : > { %4791 = vmatpush3.msra.mxu1 %v6606_v16 }
0x1538   : > { %4792 = vmatprep.subr.mxu1 %v8620_v42 }
0x1539   : > { %4793 = vmatpush3.msra.mxu1 %v6604_v15 }
0x153a   : > { %4794 = vmatprep.subr.mxu1 %v8620_v42 }
0x153b   : > { %4795 = vmatpush3.msra.mxu1 %v6602_v14 }
0x153c   : > { %4796 = vmatprep.subr.mxu1 %v8620_v42 }
0x153d   : > { %4797 = vmatpush3.msra.mxu1 %v6600_v13 }
0x153e   : > { %v6022_v54 = vpop.eup %6021  ;;  %4798 = vmatprep.subr.mxu1 %v8620_v42 }
0x153f   : > { %5484 = vmatmul.mubr.f32.vlgmr.msra.gmra.mxu0 %v6022_v54  ;;  %4799 = vmatpush3.msra.mxu1 %v6598_v12 }
0x1540   : > { %5522 = vmatpush3.msra.mxu0 %v6642_v34  ;;  %5553 = vmatprep.mubr.msk.f32.mxu0 %vm6292_vm14, %v8620_v42 }
0x1541   : > { %5523 = vmatprep.subr.mxu0 %v8620_v42  ;;  %4800 = vmatprep.subr.mxu1 %v8620_v42 }
0x1542   : > { %5524 = vmatpush3.msra.mxu0 %v6640_v33  ;;  %4801 = vmatpush3.msra.mxu1 %v6596_v11 }
0x1543   : > { %5525 = vmatprep.subr.mxu0 %v8620_v42  ;;  %4802 = vmatprep.subr.mxu1 %v8620_v42 }
0x1544   : > { %5526 = vmatpush3.msra.mxu0 %v6638_v32  ;;  %4803 = vmatpush3.msra.mxu1 %v6594_v10 }
0x1545   : > { %5527 = vmatprep.subr.mxu0 %v8620_v42  ;;  %4804 = vmatprep.subr.mxu1 %v8620_v42 }
0x1546   : > { %5528 = vmatpush3.msra.mxu0 %v6636_v31  ;;  %4805 = vmatpush3.msra.mxu1 %v6592_v9 }
0x1547   : > { %5529 = vmatprep.subr.mxu0 %v8620_v42  ;;  %4806 = vmatprep.subr.mxu1 %v8620_v42 }
0x1548   : > { %5530 = vmatpush3.msra.mxu0 %v6634_v30  ;;  %4807 = vmatpush3.msra.mxu1 %v6590_v8 }
0x1549   : > { %5531 = vmatprep.subr.mxu0 %v8620_v42  ;;  %4808 = vmatprep.subr.mxu1 %v8620_v42 }
0x154a   : > { %5532 = vmatpush3.msra.mxu0 %v6632_v29  ;;  %4809 = vmatpush3.msra.mxu1 %v6588_v7 }
0x154b   : > { %5533 = vmatprep.subr.mxu0 %v8620_v42  ;;  %4810 = vmatprep.subr.mxu1 %v8620_v42 }
0x154c   : > { %5534 = vmatpush3.msra.mxu0 %v6630_v28  ;;  %4811 = vmatpush3.msra.mxu1 %v6586_v6 }
0x154d   : > { %5535 = vmatprep.subr.mxu0 %v8620_v42  ;;  %4812 = vmatprep.subr.mxu1 %v8620_v42 }
0x154e   : > { %5536 = vmatpush3.msra.mxu0 %v6628_v27  ;;  %4813 = vmatpush3.msra.mxu1 %v6584_v5 }
0x154f   : > { %5537 = vmatprep.subr.mxu0 %v8620_v42  ;;  %4814 = vmatprep.subr.mxu1 %v8620_v42 }
0x1550   : > { %5538 = vmatpush3.msra.mxu0 %v6626_v26  ;;  %4815 = vmatpush3.msra.mxu1 %v6582_v4 }
0x1551   : > { %5539 = vmatprep.subr.mxu0 %v8620_v42  ;;  %4816 = vmatprep.subr.mxu1 %v8620_v42 }
0x1552   : > { %5540 = vmatpush3.msra.mxu0 %v6624_v25  ;;  %4817 = vmatpush3.msra.mxu1 %v6580_v3 }
0x1553   : > { %5541 = vmatprep.subr.mxu0 %v8620_v42  ;;  %4856 = vmatprep.subr.mxu1 %v8620_v42 }
0x1554   : > { %5542 = vmatpush3.msra.mxu0 %v6622_v24 }
0x1555   : > { %5543 = vmatprep.subr.mxu0 %v8620_v42 }
0x1556   : > { %5544 = vmatpush3.msra.mxu0 %v6620_v23 }
0x1557   : > { %5545 = vmatprep.subr.mxu0 %v8620_v42 }
0x1558   : > { %5546 = vmatpush3.msra.mxu0 %v6618_v22 }
0x1559   : > { %5547 = vmatprep.subr.mxu0 %v8620_v42 }
0x155a   : > { %5548 = vmatpush3.msra.mxu0 %v6616_v21 }
0x155b   : > { %5549 = vmatprep.subr.mxu0 %v8620_v42 }
0x155c   : > { %5550 = vmatpush3.msra.mxu0 %v6614_v20 }
0x155d   : > { %5551 = vmatprep.subr.mxu0 %v8620_v42 }
0x155e   : > { %5552 = vmatpush3.msra.mxu0 %v6612_v19 }
0x155f   : > { %5591 = vmatprep.subr.mxu0 %v8620_v42 }
0x15ff   : > { %v3075_v40 = vpop.f32.mrf.mxu0 }
0x1600   : > { %6023 = vlog2.f32 %v3075_v40 }
0x1601   : > { %v5485_v49 = vpop.f32.mrf.mxu0 }
0x160d   : > { %v6024_v54 = vpop.eup %6023 }
0x160e   : > { %v3080_v63 = vmul.f32 0.6931472, %v6024_v54  ;;  %v7580_v54 = vpop.permute.xlu1 %1043 }
0x1610   : > { %v3081_v40 = vadd.f32 %v3080_v63, %v3005_v55  ;;  %v8643_v63 = vmov 7   ;;  %v8644_v55 = vmov 10  }
0x1612   : > { %v3090_v49 = vadd.f32 %v7525_v37, %v3081_v40  ;;  %v8567_v40 = vmov 1.0  }
0x1614   : > { %v7533_v53 = vsel %vm8563_vm15, %v3090_v49, %v2918_v56  ;;  %v8642_v56 = vmov 6   ;;  %vm1045_vm15 = vcmp.eq.s32.totalorder %v7580_v54, %v6675_v35 }
0x1615   : > { %v3180_v38 = vsel %vm1048_vm13, %v7533_v53, -inf  ;;  %4819 = vmatmul.mubr.msk.f32.vlgmr.msra.gmra.mxu1 %vm1045_vm15, %v8567_v40 }
0x1616   : > { %3181 = vmax.xlane.f32.xlu0 %v3180_v38  ;;  %4857 = vmatpush3.msra.mxu1 %v6610_v18 }
0x1617   : > { %4888 = vmatprep.mubr.msk.f32.mxu1 %vm6292_vm14, %v8620_v42  ;;  %4858 = vmatprep.subr.mxu1 %v8620_v42 }
0x1618   : > { %4859 = vmatpush3.msra.mxu1 %v6608_v17 }
0x1619   : > { %4860 = vmatprep.subr.mxu1 %v8620_v42 }
0x161a   : > { %4861 = vmatpush3.msra.mxu1 %v6606_v16 }
0x161b   : > { %4862 = vmatprep.subr.mxu1 %v8620_v42 }
0x161c   : > { %4863 = vmatpush3.msra.mxu1 %v6604_v15 }
0x161d   : > { %4864 = vmatprep.subr.mxu1 %v8620_v42 }
0x161e   : > { %4865 = vmatpush3.msra.mxu1 %v6602_v14 }
0x161f   : > { %4866 = vmatprep.subr.mxu1 %v8620_v42 }
0x1620   : > { %4867 = vmatpush3.msra.mxu1 %v6600_v13 }
0x1621   : > { %4868 = vmatprep.subr.mxu1 %v8620_v42 }
0x1622   : > { %4869 = vmatpush3.msra.mxu1 %v6598_v12 }
0x1623   : > { %4870 = vmatprep.subr.mxu1 %v8620_v42 }
0x1624   : > { %4871 = vmatpush3.msra.mxu1 %v6596_v11 }
0x1625   : > { %4872 = vmatprep.subr.mxu1 %v8620_v42 }
0x1626   : > { %4873 = vmatpush3.msra.mxu1 %v6594_v10 }
0x1627   : > { %4874 = vmatprep.subr.mxu1 %v8620_v42 }
0x1628   : > { %4875 = vmatpush3.msra.mxu1 %v6592_v9 }
0x1629   : > { %4876 = vmatprep.subr.mxu1 %v8620_v42 }
0x162a   : > { %4877 = vmatpush3.msra.mxu1 %v6590_v8 }
0x162b   : > { %4878 = vmatprep.subr.mxu1 %v8620_v42 }
0x162c   : > { %3269 = vperm.xlu0 %5946, %v6880_v58   ;;  %4879 = vmatpush3.msra.mxu1 %v6588_v7 }
0x162d   : > { %4880 = vmatprep.subr.mxu1 %v8620_v42 }
0x162e   : > { %4881 = vmatpush3.msra.mxu1 %v6586_v6 }
0x162f   : > { %4882 = vmatprep.subr.mxu1 %v8620_v42 }
0x1630   : > { %5949 = vset.pattern.permute.xlu0 %v8641_v61  ;;  %4883 = vmatpush3.msra.mxu1 %v6584_v5 }
0x1631   : > { %1582 = vperm.xlu0 %5949, %v6571_v0   ;;  %4884 = vmatprep.subr.mxu1 %v8620_v42 }
0x1632   : > { %4885 = vmatpush3.msra.mxu1 %v6582_v4 }
0x1633   : > { %4886 = vmatprep.subr.mxu1 %v8620_v42 }
0x1634   : > { %4887 = vmatpush3.msra.mxu1 %v6580_v3 }
0x1635   : > { %5951 = vset.pattern.permute.xlu0 %v8642_v56  ;;  %4926 = vmatprep.subr.mxu1 %v8620_v42 }
0x1636   : > { %1936 = vperm.xlu0 %5951, %v6571_v0  }
0x163a   : > { %5952 = vset.pattern.permute.xlu0 %v8643_v63 }
0x163b   : > { %2113 = vperm.xlu0 %5952, %v6571_v0  }
0x163f   : > { %5955 = vset.pattern.permute.xlu0 %v8644_v55 }
0x1640   : > { %2646 = vperm.xlu0 %5955, %v6571_v0  }
0x1644   : > { %5958 = vset.pattern.permute.xlu0 %v8645_v41 }
0x1645   : > { %2998 = vperm.xlu0 %5958, %v6571_v0  }
0x1649   : > { %5959 = vset.pattern.permute.xlu0 %v8646_v51 }
0x164a   : > { %3175 = vperm.xlu0 %5959, %v6571_v0  }
0x164e   : > { %5960 = vset.pattern.permute.xlu0 %v8569_v45 }
0x164f   : > { %3352 = vperm.xlu0 %5960, %v6571_v0  }
0x1653   : > { %5961 = vset.pattern.permute.xlu0 %v8631_v59  ;;  %v7635_v59 = vpop.permute.xlu1 %1230 }
0x1654   : > { %1152 = vperm.xlu0 %5961, %v6573_v1   ;;  %vm1232_vm12 = vcmp.eq.s32.totalorder %v7635_v59, %v6675_v35  ;;  %v3264_v59 = vrot.slane %v6716_v44, 2 }
0x1655   : > { %4889 = vmatmul.mubr.msk.f32.vlgmr.msra.gmra.mxu1 %vm1232_vm12, %v8567_v40 }
0x1656   : > { %4927 = vmatpush3.msra.mxu1 %v6610_v18  ;;  %4958 = vmatprep.mubr.msk.f32.mxu1 %vm6292_vm14, %v8620_v42 }
0x1657   : > { %4928 = vmatprep.subr.mxu1 %v8620_v42 }
0x1658   : > { %5962 = vset.pattern.permute.xlu0 %v8632_v48  ;;  %4929 = vmatpush3.msra.mxu1 %v6608_v17  ;;  %v7679_v48 = vpop.permute.xlu1 %1406 }
0x1659   : > { %1328 = vperm.xlu0 %5962, %v6573_v1   ;;  %4930 = vmatprep.subr.mxu1 %v8620_v42  ;;  %vm1408_vm11 = vcmp.eq.s32.totalorder %v7679_v48, %v6675_v35 }
0x165a   : > { %4931 = vmatpush3.msra.mxu1 %v6606_v16 }
0x165b   : > { %4932 = vmatprep.subr.mxu1 %v8620_v42 }
0x165c   : > { %4933 = vmatpush3.msra.mxu1 %v6604_v15 }
0x165d   : > { %5964 = vset.pattern.permute.xlu0 %v8641_v61  ;;  %4934 = vmatprep.subr.mxu1 %v8620_v42 }
0x165e   : > { %1681 = vperm.xlu0 %5964, %v6573_v1   ;;  %4935 = vmatpush3.msra.mxu1 %v6602_v14 }
0x165f   : > { %4936 = vmatprep.subr.mxu1 %v8620_v42 }
0x1660   : > { %4937 = vmatpush3.msra.mxu1 %v6600_v13 }
0x1661   : > { %4938 = vmatprep.subr.mxu1 %v8620_v42 }
0x1662   : > { %5965 = vset.pattern.permute.xlu0 %v8634_v50  ;;  %4939 = vmatpush3.msra.mxu1 %v6598_v12 }
0x1663   : > { %1858 = vperm.xlu0 %5965, %v6573_v1   ;;  %4940 = vmatprep.subr.mxu1 %v8620_v42 }
0x1664   : > { %4941 = vmatpush3.msra.mxu1 %v6596_v11 }
0x1665   : > { %4942 = vmatprep.subr.mxu1 %v8620_v42 }
0x1666   : > { %4943 = vmatpush3.msra.mxu1 %v6594_v10 }
0x1667   : > { %5967 = vset.pattern.permute.xlu0 %v8643_v63  ;;  %4944 = vmatprep.subr.mxu1 %v8620_v42 }
0x1668   : > { %2212 = vperm.xlu0 %5967, %v6573_v1   ;;  %4945 = vmatpush3.msra.mxu1 %v6592_v9 }
0x1669   : > { %4946 = vmatprep.subr.mxu1 %v8620_v42 }
0x166a   : > { %4947 = vmatpush3.msra.mxu1 %v6590_v8 }
0x166b   : > { %4948 = vmatprep.subr.mxu1 %v8620_v42 }
0x166c   : > { %5970 = vset.pattern.permute.xlu0 %v8644_v55  ;;  %4949 = vmatpush3.msra.mxu1 %v6588_v7 }
0x166d   : > { %2744 = vperm.xlu0 %5970, %v6573_v1   ;;  %4950 = vmatprep.subr.mxu1 %v8620_v42 }
0x166e   : > { %4951 = vmatpush3.msra.mxu1 %v6586_v6 }
0x166f   : > { %4952 = vmatprep.subr.mxu1 %v8620_v42 }
0x1670   : > { %4953 = vmatpush3.msra.mxu1 %v6584_v5 }
0x1671   : > { %5973 = vset.pattern.permute.xlu0 %v8646_v51  ;;  %4954 = vmatprep.subr.mxu1 %v8620_v42  ;;  %v1222_v51 = vpop.f32.mrf.mxu1 }
0x1672   : > { %3274 = vperm.xlu0 %5973, %v6573_v1   ;;  %4955 = vmatpush3.msra.mxu1 %v6582_v4  ;;  %v1223_v56 = vadd.f32 %v1222_v51, %v6936_v62  ;;  %v4009_v1 = vsel %vm1045_vm15, 1.0, %v8620_v42 }
0x1673   : > { %4956 = vmatprep.subr.mxu1 %v8620_v42 }
0x1674   : > { %4957 = vmatpush3.msra.mxu1 %v6580_v3 }
0x1675   : > { %4959 = vmatmul.mubr.msk.f32.vlgmr.msra.gmra.mxu1 %vm1408_vm11, %v8567_v40  ;;  %4996 = vmatprep.subr.mxu1 %v8620_v42 }
0x1676   : > { %4997 = vmatpush3.msra.mxu1 %v6610_v18  ;;  %5028 = vmatprep.mubr.msk.f32.mxu1 %vm6292_vm14, %v8620_v42 }
0x1677   : > { %4998 = vmatprep.subr.mxu1 %v8620_v42 }
0x1678   : > { %4999 = vmatpush3.msra.mxu1 %v6608_v17 }
0x1679   : > { %5000 = vmatprep.subr.mxu1 %v8620_v42 }
0x167a   : > { %5001 = vmatpush3.msra.mxu1 %v6606_v16 }
0x167b   : > { %5002 = vmatprep.subr.mxu1 %v8620_v42 }
0x167c   : > { %5003 = vmatpush3.msra.mxu1 %v6604_v15 }
0x167d   : > { %5004 = vmatprep.subr.mxu1 %v8620_v42 }
0x167e   : > { %5005 = vmatpush3.msra.mxu1 %v6602_v14 }
0x167f   : > { %5006 = vmatprep.subr.mxu1 %v8620_v42 }
0x1680   : > { %5007 = vmatpush3.msra.mxu1 %v6600_v13 }
0x1681   : > { %5008 = vmatprep.subr.mxu1 %v8620_v42 }
0x1682   : > { %5009 = vmatpush3.msra.mxu1 %v6598_v12 }
0x1683   : > { %5010 = vmatprep.subr.mxu1 %v8620_v42 }
0x1684   : > { %5011 = vmatpush3.msra.mxu1 %v6596_v11 }
0x1685   : > { %5012 = vmatprep.subr.mxu1 %v8620_v42 }
0x1686   : > { %5013 = vmatpush3.msra.mxu1 %v6594_v10 }
0x1687   : > { %5014 = vmatprep.subr.mxu1 %v8620_v42 }
0x1688   : > { %5015 = vmatpush3.msra.mxu1 %v6592_v9 }
0x1689   : > { %5016 = vmatprep.subr.mxu1 %v8620_v42 }
0x168a   : > { %5017 = vmatpush3.msra.mxu1 %v6590_v8 }
0x168b   : > { %5018 = vmatprep.subr.mxu1 %v8620_v42 }
0x168c   : > { %5019 = vmatpush3.msra.mxu1 %v6588_v7 }
0x168d   : > { %5020 = vmatprep.subr.mxu1 %v8620_v42 }
0x168e   : > { %5021 = vmatpush3.msra.mxu1 %v6586_v6 }
0x168f   : > { %5022 = vmatprep.subr.mxu1 %v8620_v42 }
0x1690   : > { %5023 = vmatpush3.msra.mxu1 %v6584_v5 }
0x1691   : > { %5024 = vmatprep.subr.mxu1 %v8620_v42 }
0x1692   : > { %5025 = vmatpush3.msra.mxu1 %v6582_v4 }
0x1693   : > { %5026 = vmatprep.subr.mxu1 %v8620_v42 }
0x1694   : > { %5027 = vmatpush3.msra.mxu1 %v6580_v3 }
0x1695   : > { %5066 = vmatprep.subr.mxu1 %v8620_v42 }
0x169f   : > { %v7704_v50 = vpop.xlane.xlu0 %3181 }
0x16a0   : > { %v3183_v49 = vsub.f32 %v7533_v53, %v7704_v50 }
0x16a2   : > { %v3184_v38 = vmul.f32 1.442695, %v3183_v49  ;;  %v4750_v49 = vpop.f32.mrf.mxu1 }
0x16a4   : > { %6025 = vpow2.f32 %v3184_v38 }
0x16a7   : > { %v7719_v61 = vpop.permute.xlu0 %3269 }
0x16a8   : > { %8647 = vst [vmem:[#allocation61_spill] sm:$0xff] %v7719_v61 }
0x16ac   : > { %v7727_v47 = vpop.permute.xlu0 %1582 }
0x16ad   : > { %vm1584_vm10 = vcmp.eq.s32.totalorder %v7727_v47, %v6675_v35  ;;  %v7878_v47 = vsel %vm1408_vm11, 1.0, %v8620_v42 }
0x16ae   : > { %5029 = vmatmul.mubr.msk.f32.vlgmr.msra.gmra.mxu1 %vm1584_vm10, %v8567_v40 }
0x16af   : > { %5067 = vmatpush3.msra.mxu1 %v6610_v18  ;;  %5098 = vmatprep.mubr.msk.f32.mxu1 %vm6292_vm14, %v8620_v42 }
0x16b0   : > { %5068 = vmatprep.subr.mxu1 %v8620_v42 }
0x16b1   : > { %v6026_v63 = vpop.eup %6025  ;;  %5069 = vmatpush3.msra.mxu1 %v6608_v17  ;;  %v7808_v55 = vpop.permute.xlu0 %1936 }
0x16b2   : > { %5554 = vmatmul.mubr.f32.vlgmr.msra.gmra.mxu0 %v6026_v63  ;;  %5070 = vmatprep.subr.mxu1 %v8620_v42 }
0x16b3   : > { %5592 = vmatpush3.msra.mxu0 %v6642_v34  ;;  %5071 = vmatpush3.msra.mxu1 %v6606_v16 }
0x16b4   : > { %5593 = vmatprep.subr.mxu0 %v8620_v42  ;;  %5072 = vmatprep.subr.mxu1 %v8620_v42 }
0x16b5   : > { %5594 = vmatpush3.msra.mxu0 %v6640_v33  ;;  %5073 = vmatpush3.msra.mxu1 %v6604_v15 }
0x16b6   : > { %5595 = vmatprep.subr.mxu0 %v8620_v42  ;;  %5074 = vmatprep.subr.mxu1 %v8620_v42  ;;  %v7810_v38 = vpop.permute.xlu0 %2113 }
0x16b7   : > { %5596 = vmatpush3.msra.mxu0 %v6638_v32  ;;  %5075 = vmatpush3.msra.mxu1 %v6602_v14  ;;  %8648 = vst [vmem:[#allocation62_spill] sm:$0xff] %v7810_v38  ;;  %v1039_v38 = vld [vmem:[#allocation3] sm:$0xf] }
0x16b8   : > { %5597 = vmatprep.subr.mxu0 %v8620_v42  ;;  %5076 = vmatprep.subr.mxu1 %v8620_v42 }
0x16b9   : > { %5598 = vmatpush3.msra.mxu0 %v6636_v31  ;;  %5077 = vmatpush3.msra.mxu1 %v6600_v13 }
0x16ba   : > { %5599 = vmatprep.subr.mxu0 %v8620_v42  ;;  %5078 = vmatprep.subr.mxu1 %v8620_v42 }
0x16bb   : > { %5600 = vmatpush3.msra.mxu0 %v6634_v30  ;;  %5079 = vmatpush3.msra.mxu1 %v6598_v12  ;;  %v7812_v45 = vpop.permute.xlu0 %2646 }
0x16bc   : > { %5601 = vmatprep.subr.mxu0 %v8620_v42  ;;  %5080 = vmatprep.subr.mxu1 %v8620_v42  ;;  %8649 = vst [vmem:[#allocation63_spill] sm:$0xff] %v7812_v45 }
0x16bd   : > { %5602 = vmatpush3.msra.mxu0 %v6632_v29  ;;  %5081 = vmatpush3.msra.mxu1 %v6596_v11 }
0x16be   : > { %5603 = vmatprep.subr.mxu0 %v8620_v42  ;;  %5082 = vmatprep.subr.mxu1 %v8620_v42 }
0x16bf   : > { %5604 = vmatpush3.msra.mxu0 %v6630_v28  ;;  %5083 = vmatpush3.msra.mxu1 %v6594_v10 }
0x16c0   : > { %5605 = vmatprep.subr.mxu0 %v8620_v42  ;;  %5084 = vmatprep.subr.mxu1 %v8620_v42  ;;  %v7814_v39 = vpop.permute.xlu0 %2998 }
0x16c1   : > { %5606 = vmatpush3.msra.mxu0 %v6628_v27  ;;  %5085 = vmatpush3.msra.mxu1 %v6592_v9  ;;  %8650 = vst [vmem:[#allocation64_spill] sm:$0xff] %v7814_v39 }
0x16c2   : > { %5607 = vmatprep.subr.mxu0 %v8620_v42  ;;  %5086 = vmatprep.subr.mxu1 %v8620_v42 }
0x16c3   : > { %5608 = vmatpush3.msra.mxu0 %v6626_v26  ;;  %5087 = vmatpush3.msra.mxu1 %v6590_v8 }
0x16c4   : > { %5609 = vmatprep.subr.mxu0 %v8620_v42  ;;  %5088 = vmatprep.subr.mxu1 %v8620_v42 }
0x16c5   : > { %5610 = vmatpush3.msra.mxu0 %v6624_v25  ;;  %5089 = vmatpush3.msra.mxu1 %v6588_v7  ;;  %v7816_v37 = vpop.permute.xlu0 %3175 }
0x16c6   : > { %5611 = vmatprep.subr.mxu0 %v8620_v42  ;;  %5090 = vmatprep.subr.mxu1 %v8620_v42  ;;  %8651 = vst [vmem:[#allocation65_spill] sm:$0xff] %v7816_v37  ;;  %v4010_v37 = vsel %vm1232_vm12, 1.0, %v8620_v42  ;;  %vm3271_vm12 = vcmp.eq.s32.totalorder %v7719_v61, 1 }
0x16c7   : > { %5612 = vmatpush3.msra.mxu0 %v6622_v24  ;;  %5091 = vmatpush3.msra.mxu1 %v6586_v6 }
0x16c8   : > { %5613 = vmatprep.subr.mxu0 %v8620_v42  ;;  %5092 = vmatprep.subr.mxu1 %v8620_v42 }
0x16c9   : > { %5614 = vmatpush3.msra.mxu0 %v6620_v23  ;;  %5093 = vmatpush3.msra.mxu1 %v6584_v5 }
0x16ca   : > { %5615 = vmatprep.subr.mxu0 %v8620_v42  ;;  %5094 = vmatprep.subr.mxu1 %v8620_v42  ;;  %v7818_v41 = vpop.permute.xlu0 %3352 }
0x16cb   : > { %5616 = vmatpush3.msra.mxu0 %v6618_v22  ;;  %5095 = vmatpush3.msra.mxu1 %v6582_v4  ;;  %8652 = vst [vmem:[#allocation66_spill] sm:$0xff] %v7818_v41 }
0x16cc   : > { %5617 = vmatprep.subr.mxu0 %v8620_v42  ;;  %5096 = vmatprep.subr.mxu1 %v8620_v42 }
0x16cd   : > { %5618 = vmatpush3.msra.mxu0 %v6616_v21  ;;  %5097 = vmatpush3.msra.mxu1 %v6580_v3 }
0x16ce   : > { %5619 = vmatprep.subr.mxu0 %v8620_v42  ;;  %5136 = vmatprep.subr.mxu1 %v8620_v42 }
0x16cf   : > { %5620 = vmatpush3.msra.mxu0 %v6614_v20  ;;  %5623 = vmatprep.mubr.msk.f32.mxu0 %vm6292_vm14, %v8620_v42  ;;  %v1153_v49 = vpop.permute.xlu0 %1152 }
0x16d0   : > { %5621 = vmatprep.subr.mxu0 %v8620_v42 }
0x16d1   : > { %5622 = vmatpush3.msra.mxu0 %v6612_v19  ;;  %v1155_v19 = vmul.f32 %v4009_v1, %v1153_v49  ;;  %v3259_v49 = vrot.slane %v6701_v36, 5 }
0x16d2   : > { %5661 = vmatprep.subr.mxu0 %v8620_v42 }
0x16d3   : > { %v1226_v20 = vmul.f32 %v1223_v56, %v1155_v19  ;;  %v3260_v19 = vrot.slane %v6686_v60, 4 }
0x16d4   : > { %v1329_v39 = vpop.permute.xlu0 %1328 }
0x16d5   : > { %v1398_v63 = vpop.f32.mrf.mxu1  ;;  %v1227_v41 = vadd.f32 %v1226_v20, %v1039_v38  ;;  %v1331_v45 = vmul.f32 %v4010_v37, %v1329_v39  ;;  %v3261_v56 = vsel %vm1133_vm0, %v3260_v19, %v3259_v49 }
0x16d7   : > { %v4820_v40 = vpop.f32.mrf.mxu1 }
0x16d8   : > { %v1399_v40 = vadd.f32 %v1398_v63, %v6989_v46  ;;  %v3262_v46 = vrot.slane %v6706_v43, 3 }
0x16da   : > { %v1402_v62 = vmul.f32 %v1399_v40, %v1331_v45  ;;  %v3263_v63 = vsel %vm1136_vm1, %v3262_v46, %v3261_v56  ;;  %v4014_v56 = vsel %vm1584_vm10, 1.0, %v8620_v42 }
0x16dc   : > { %v7830_v51 = vadd.f32 %v1402_v62, %v1227_v41  ;;  %v7839_v41 = vsel %vm1139_vm2, %v3264_v59, %v3263_v63  ;;  %v8655_v62 = vmov 8   ;;  %v1682_v59 = vpop.permute.xlu0 %1681 }
0x16dd   : > { %8654 = vst [vmem:[#allocation68_spill] sm:$0xff] %v7839_v41 }
0x16de   : > { %8653 = vst [vmem:[#allocation67_spill] sm:$0xff] %v7830_v51  ;;  %v8663_v51 = vmov 1.0  }
0x1715   : > { %v7861_v49 = vpop.f32.mrf.mxu1 }
0x1717   : > { %v4890_v19 = vpop.f32.mrf.mxu1 }
0x1735   : > { %v1751_v46 = vpop.f32.mrf.mxu1 }
0x1736   : > { %v1752_v63 = vadd.f32 %v1751_v46, %v7093_v57 }
0x1772   : > { %v3252_v21 = vpop.f32.mrf.mxu0 }
0x1773   : > { %6027 = vlog2.f32 %v3252_v21 }
0x1774   : > { %v5555_v54 = vpop.f32.mrf.mxu0 }
0x1775   : > { %v8657_v54 = vmov 14  }
0x1780   : > { %v6028_v20 = vpop.eup %6027 }
0x1781   : > { %v3257_v39 = vmul.f32 0.6931472, %v6028_v20  ;;  %v1684_v20 = vmul.f32 %v4014_v56, %v1682_v59  ;;  %v3437_v59 = vrot.slane %v6686_v60, 5 }
0x1783   : > { %v3258_v21 = vadd.f32 %v3257_v39, %v7704_v50  ;;  %v8656_v50 = vmov 9   ;;  %v4960_v39 = vpop.f32.mrf.mxu1 }
0x1784   : > { %v1859_v39 = vpop.permute.xlu0 %1858 }
0x1785   : > { %v3267_v45 = vadd.f32 %v7839_v41, %v3258_v21  ;;  %v7868_v21 = vmul.f32 %v1752_v63, %v1684_v20  ;;  %v1040_v41 = vld [vmem:[#allocation4] sm:$0xf] }
0x1786   : > { %v1228_v57 = vsel %vm1148_vm3, %v4009_v1, %v1040_v41  ;;  %vm1938_vm3 = vcmp.eq.s32.totalorder %v7808_v55, %v6675_v35  ;;  %v8682_v55 = vld [vmem:[#allocation52_spill] sm:$0xff] }
0x1787   : > { %v7847_v38 = vsel %vm3271_vm12, %v3267_v45, %v7533_v53  ;;  %v8658_v53 = vmov 11   ;;  %8659 = vst [vmem:[#allocation69_spill] sm:$0xff] %v7868_v21  ;;  %v1928_v45 = vpop.f32.mrf.mxu1  ;;  %v1404_v63 = vsel %vm1325_vm4, %v4010_v37, %v1228_v57 }
0x1788   : > { %v3357_v40 = vsel %vm1048_vm13, %v7847_v38, -inf  ;;  %v1580_v48 = vsel %vm1501_vm5, %v7878_v47, %v1404_v63  ;;  %v3439_v63 = vrot.slane %v6706_v43, 4 }
0x1789   : > { %3358 = vmax.xlane.f32.xlu1 %v3357_v40  ;;  %v5030_v40 = vpop.f32.mrf.mxu1  ;;  %v1757_v41 = vsel %vm1678_vm6, %v4014_v56, %v1580_v48 }
0x178a   : > { %v8661_v40 = vld [vmem:[#allocation46_spill] sm:$0xff] }
0x178b   : > { %v1929_v61 = vadd.f32 %v1928_v45, %v8661_v40 }
0x179a   : > { %1759 = vperm.xlu1 %5950, %v6571_v0  }
0x179e   : > { %5953 = vset.pattern.permute.xlu1 %v8655_v62 }
0x179f   : > { %2290 = vperm.xlu1 %5953, %v6571_v0  }
0x17a3   : > { %5954 = vset.pattern.permute.xlu1 %v8656_v50 }
0x17a4   : > { %2470 = vperm.xlu1 %5954, %v6571_v0  }
0x17a8   : > { %5956 = vset.pattern.permute.xlu1 %v8657_v54 }
0x17a9   : > { %3446 = vperm.xlu1 %5956, %v6880_v58  }
0x17ad   : > { %5957 = vset.pattern.permute.xlu1 %v8658_v53 }
0x17ae   : > { %2822 = vperm.xlu1 %5957, %v6571_v0  }
0x17b2   : > { %5963 = vset.pattern.permute.xlu1 %v8633_v52 }
0x1812   : > { %v7870_v52 = vpop.xlane.xlu1 %3358 }
0x1813   : > { %v3360_v19 = vsub.f32 %v7847_v38, %v7870_v52 }
0x1815   : > { %v3361_v46 = vmul.f32 1.442695, %v3360_v19  ;;  %v8672_v19 = vld [vmem:[#allocation64_spill] sm:$0xff] }
0x1816   : > { %v1760_v20 = vpop.permute.xlu1 %1759  ;;  %vm3000_vm15 = vcmp.eq.s32.totalorder %v8672_v19, %v6675_v35 }
0x1817   : > { %6029 = vpow2.f32 %v3361_v46  ;;  %vm1761_vm10 = vcmp.eq.s32.totalorder %v1760_v20, %v6675_v35  ;;  %v3436_v46 = vrot.slane %v6701_v36, 6 }
0x1818   : > { %5099 = vmatmul.mubr.msk.f32.vlgmr.msra.gmra.mxu1 %vm1761_vm10, %v8663_v51  ;;  %v4016_v2 = vsel %vm1761_vm10, 1.0, %v8620_v42 }
0x1819   : > { %5137 = vmatpush3.msra.mxu1 %v6610_v18  ;;  %5168 = vmatprep.mubr.msk.f32.mxu1 %vm6292_vm14, %v8620_v42  ;;  %v1861_v37 = vmul.f32 %v4016_v2, %v1859_v39  ;;  %v7898_v45 = vsel %vm1855_vm7, %v4016_v2, %v1757_v41  ;;  %v3438_v20 = vsel %vm1133_vm0, %v3437_v59, %v3436_v46  ;;  %v3441_v39 = vrot.slane %v6716_v44, 3  ;;  %v2213_v41 = vpop.permute.xlu0 %2212  ;;  %v8675_v59 = vld [vmem:[#allocation65_spill] sm:$0xff] }
0x181a   : > { %5138 = vmatprep.subr.mxu1 %v8620_v42  ;;  %v3440_v40 = vsel %vm1136_vm1, %v3439_v63, %v3438_v20 }
0x181b   : > { %5139 = vmatpush3.msra.mxu1 %v6608_v17  ;;  %v7902_v21 = vmul.f32 %v1929_v61, %v1861_v37  ;;  %v8222_v1 = vsel %vm1139_vm2, %v3441_v39, %v3440_v40 }
0x181c   : > { %5140 = vmatprep.subr.mxu1 %v8620_v42 }
0x181d   : > { %5141 = vmatpush3.msra.mxu1 %v6606_v16 }
0x181e   : > { %5142 = vmatprep.subr.mxu1 %v8620_v42 }
0x181f   : > { %5143 = vmatpush3.msra.mxu1 %v6604_v15 }
0x1820   : > { %5144 = vmatprep.subr.mxu1 %v8620_v42 }
0x1821   : > { %5145 = vmatpush3.msra.mxu1 %v6602_v14 }
0x1822   : > { %5146 = vmatprep.subr.mxu1 %v8620_v42 }
0x1823   : > { %5147 = vmatpush3.msra.mxu1 %v6600_v13 }
0x1824   : > { %v6030_v56 = vpop.eup %6029  ;;  %5148 = vmatprep.subr.mxu1 %v8620_v42 }
0x1825   : > { %5149 = vmatpush3.msra.mxu1 %v6598_v12  ;;  %5624 = vmatmul.mubr.f32.vlgmr.msra.gmra.mxu0 %v6030_v56 }
0x1826   : > { %5150 = vmatprep.subr.mxu1 %v8620_v42  ;;  %5662 = vmatpush3.msra.mxu0 %v6642_v34 }
0x1827   : > { %5151 = vmatpush3.msra.mxu1 %v6596_v11  ;;  %5663 = vmatprep.subr.mxu0 %v8620_v42 }
0x1828   : > { %5152 = vmatprep.subr.mxu1 %v8620_v42  ;;  %5664 = vmatpush3.msra.mxu0 %v6640_v33 }
0x1829   : > { %5153 = vmatpush3.msra.mxu1 %v6594_v10  ;;  %5665 = vmatprep.subr.mxu0 %v8620_v42 }
0x182a   : > { %5154 = vmatprep.subr.mxu1 %v8620_v42  ;;  %5666 = vmatpush3.msra.mxu0 %v6638_v32 }
0x182b   : > { %5155 = vmatpush3.msra.mxu1 %v6592_v9  ;;  %5667 = vmatprep.subr.mxu0 %v8620_v42 }
0x182c   : > { %5156 = vmatprep.subr.mxu1 %v8620_v42  ;;  %5668 = vmatpush3.msra.mxu0 %v6636_v31 }
0x182d   : > { %5157 = vmatpush3.msra.mxu1 %v6590_v8  ;;  %5669 = vmatprep.subr.mxu0 %v8620_v42 }
0x182e   : > { %5158 = vmatprep.subr.mxu1 %v8620_v42  ;;  %5670 = vmatpush3.msra.mxu0 %v6634_v30  ;;  %v8671_v30 = vld [vmem:[#allocation63_spill] sm:$0xff] }
0x182f   : > { %5159 = vmatpush3.msra.mxu1 %v6588_v7  ;;  %5671 = vmatprep.subr.mxu0 %v8620_v42  ;;  %vm2648_vm7 = vcmp.eq.s32.totalorder %v8671_v30, %v6675_v35 }
0x1830   : > { %5160 = vmatprep.subr.mxu1 %v8620_v42  ;;  %5672 = vmatpush3.msra.mxu0 %v6632_v29  ;;  %v8670_v29 = vld [vmem:[#allocation37_spill] sm:$0xff] }
0x1831   : > { %5161 = vmatpush3.msra.mxu1 %v6586_v6  ;;  %5673 = vmatprep.subr.mxu0 %v8620_v42 }
0x1832   : > { %5162 = vmatprep.subr.mxu1 %v8620_v42  ;;  %5674 = vmatpush3.msra.mxu0 %v6630_v28  ;;  %v6309_v28 = vmov 15  }
0x1833   : > { %5163 = vmatpush3.msra.mxu1 %v6584_v5  ;;  %5675 = vmatprep.subr.mxu0 %v8620_v42 }
0x1834   : > { %5164 = vmatprep.subr.mxu1 %v8620_v42  ;;  %5676 = vmatpush3.msra.mxu0 %v6628_v27 }
0x1835   : > { %5165 = vmatpush3.msra.mxu1 %v6582_v4  ;;  %5677 = vmatprep.subr.mxu0 %v8620_v42 }
0x1836   : > { %5166 = vmatprep.subr.mxu1 %v8620_v42  ;;  %5678 = vmatpush3.msra.mxu0 %v6626_v26  ;;  %v8041_v26 = vpop.permute.xlu1 %2290 }
0x1837   : > { %5167 = vmatpush3.msra.mxu1 %v6580_v3  ;;  %5679 = vmatprep.subr.mxu0 %v8620_v42  ;;  %vm2292_vm5 = vcmp.eq.s32.totalorder %v8041_v26, %v6675_v35 }
0x1838   : > { %5169 = vmatmul.mubr.msk.f32.vlgmr.msra.gmra.mxu1 %vm1938_vm3, %v8663_v51  ;;  %5206 = vmatprep.subr.mxu1 %v8620_v42 }
0x1839   : > { %5207 = vmatpush3.msra.mxu1 %v6610_v18  ;;  %5238 = vmatprep.mubr.msk.f32.mxu1 %vm6292_vm14, %v8620_v42 }
0x183a   : > { %5208 = vmatprep.subr.mxu1 %v8620_v42  ;;  %5680 = vmatpush3.msra.mxu0 %v6624_v25  ;;  %v8669_v25 = vld [vmem:[#allocation62_spill] sm:$0xff]  ;;  %v8083_v27 = vpop.permute.xlu1 %2470 }
0x183b   : > { %5209 = vmatpush3.msra.mxu1 %v6608_v17  ;;  %5681 = vmatprep.subr.mxu0 %v8620_v42  ;;  %vm2115_vm4 = vcmp.eq.s32.totalorder %v8669_v25, %v6675_v35  ;;  %vm2472_vm6 = vcmp.eq.s32.totalorder %v8083_v27, %v6675_v35 }
0x183c   : > { %5210 = vmatprep.subr.mxu1 %v8620_v42  ;;  %5682 = vmatpush3.msra.mxu0 %v6622_v24  ;;  %v8666_v24 = vld [vmem:[#allocation40_spill] sm:$0xff]  ;;  %v8233_v56 = vsel %vm2115_vm4, 1.0, %v8620_v42 }
0x183d   : > { %5211 = vmatpush3.msra.mxu1 %v6606_v16  ;;  %5683 = vmatprep.subr.mxu0 %v8620_v42 }
0x183e   : > { %5212 = vmatprep.subr.mxu1 %v8620_v42  ;;  %5684 = vmatpush3.msra.mxu0 %v6620_v23  ;;  %v8667_v23 = vld [vmem:[#allocation39_spill] sm:$0xff]  ;;  %v8161_v31 = vpop.permute.xlu1 %3446 }
0x183f   : > { %5213 = vmatpush3.msra.mxu1 %v6604_v15  ;;  %5685 = vmatprep.subr.mxu0 %v8620_v42  ;;  %vm3448_vm10 = vcmp.eq.s32.totalorder %v8161_v31, 1 }
0x1840   : > { %5214 = vmatprep.subr.mxu1 %v8620_v42  ;;  %5686 = vmatpush3.msra.mxu0 %v6618_v22  ;;  %v8668_v22 = vld [vmem:[#allocation38_spill] sm:$0xff] }
0x1841   : > { %5215 = vmatpush3.msra.mxu1 %v6602_v14  ;;  %5687 = vmatprep.subr.mxu0 %v8620_v42 }
0x1842   : > { %5216 = vmatprep.subr.mxu1 %v8620_v42  ;;  %5688 = vmatpush3.msra.mxu0 %v8666_v24  ;;  %v8169_v32 = vpop.permute.xlu1 %2822 }
0x1843   : > { %5217 = vmatpush3.msra.mxu1 %v6600_v13  ;;  %5689 = vmatprep.subr.mxu0 %v8620_v42  ;;  %vm2824_vm11 = vcmp.eq.s32.totalorder %v8169_v32, %v6675_v35 }
0x1844   : > { %5218 = vmatprep.subr.mxu1 %v8620_v42  ;;  %5690 = vmatpush3.msra.mxu0 %v8667_v23  ;;  %v2215_v23 = vmul.f32 %v8233_v56, %v2213_v41 }
0x1845   : > { %5219 = vmatpush3.msra.mxu1 %v6598_v12  ;;  %5691 = vmatprep.subr.mxu0 %v8620_v42 }
0x1846   : > { %5220 = vmatprep.subr.mxu1 %v8620_v42  ;;  %5692 = vmatpush3.msra.mxu0 %v8668_v22  ;;  %v8673_v22 = vld [vmem:[#allocation50_spill] sm:$0xff] }
0x1847   : > { %5221 = vmatpush3.msra.mxu1 %v6596_v11  ;;  %5693 = vmatprep.mubr.msk.f32.mxu0 %vm6292_vm14, %v8620_v42 }
0x1848   : > { %5222 = vmatprep.subr.mxu1 %v8620_v42  ;;  %5976 = vset.pattern.permute.xlu0 %v6309_v28 }
0x1849   : > { %5223 = vmatpush3.msra.mxu1 %v6594_v10  ;;  %3628 = vperm.xlu0 %5976, %v8670_v29  }
0x184a   : > { %5224 = vmatprep.subr.mxu1 %v8620_v42 }
0x184b   : > { %5225 = vmatpush3.msra.mxu1 %v6592_v9 }
0x184c   : > { %5226 = vmatprep.subr.mxu1 %v8620_v42 }
0x184d   : > { %5227 = vmatpush3.msra.mxu1 %v6590_v8 }
0x184e   : > { %5228 = vmatprep.subr.mxu1 %v8620_v42 }
0x184f   : > { %5229 = vmatpush3.msra.mxu1 %v6588_v7 }
0x1850   : > { %5230 = vmatprep.subr.mxu1 %v8620_v42 }
0x1851   : > { %5231 = vmatpush3.msra.mxu1 %v6586_v6 }
0x1852   : > { %5232 = vmatprep.subr.mxu1 %v8620_v42 }
0x1853   : > { %5233 = vmatpush3.msra.mxu1 %v6584_v5 }
0x1854   : > { %5234 = vmatprep.subr.mxu1 %v8620_v42 }
0x1855   : > { %5235 = vmatpush3.msra.mxu1 %v6582_v4 }
0x1856   : > { %5236 = vmatprep.subr.mxu1 %v8620_v42 }
0x1857   : > { %5237 = vmatpush3.msra.mxu1 %v6580_v3 }
0x1858   : > { %5276 = vmatprep.subr.mxu1 %v8620_v42  ;;  %5239 = vmatmul.mubr.msk.f32.vlgmr.msra.gmra.mxu1 %vm2115_vm4, %v8663_v51  ;;  %vm3177_vm4 = vcmp.eq.s32.totalorder %v8675_v59, %v6675_v35 }
0x1859   : > { %5277 = vmatpush3.msra.mxu1 %v6610_v18  ;;  %5308 = vmatprep.mubr.msk.f32.mxu1 %vm6292_vm14, %v8620_v42  ;;  %v4032_v19 = vsel %vm3177_vm4, 1.0, %v8620_v42 }
0x185a   : > { %5278 = vmatprep.subr.mxu1 %v8620_v42 }
0x185b   : > { %5279 = vmatpush3.msra.mxu1 %v6608_v17 }
0x185c   : > { %5280 = vmatprep.subr.mxu1 %v8620_v42 }
0x185d   : > { %5281 = vmatpush3.msra.mxu1 %v6606_v16 }
0x185e   : > { %5282 = vmatprep.subr.mxu1 %v8620_v42 }
0x185f   : > { %5283 = vmatpush3.msra.mxu1 %v6604_v15 }
0x1860   : > { %5284 = vmatprep.subr.mxu1 %v8620_v42 }
0x1861   : > { %5285 = vmatpush3.msra.mxu1 %v6602_v14 }
0x1862   : > { %5286 = vmatprep.subr.mxu1 %v8620_v42 }
0x1863   : > { %5287 = vmatpush3.msra.mxu1 %v6600_v13 }
0x1864   : > { %5288 = vmatprep.subr.mxu1 %v8620_v42 }
0x1865   : > { %5289 = vmatpush3.msra.mxu1 %v6598_v12 }
0x1866   : > { %5290 = vmatprep.subr.mxu1 %v8620_v42 }
0x1867   : > { %5291 = vmatpush3.msra.mxu1 %v6596_v11 }
0x1868   : > { %5292 = vmatprep.subr.mxu1 %v8620_v42 }
0x1869   : > { %5293 = vmatpush3.msra.mxu1 %v6594_v10 }
0x186a   : > { %5294 = vmatprep.subr.mxu1 %v8620_v42 }
0x186b   : > { %5295 = vmatpush3.msra.mxu1 %v6592_v9 }
0x186c   : > { %5296 = vmatprep.subr.mxu1 %v8620_v42 }
0x186d   : > { %5297 = vmatpush3.msra.mxu1 %v6590_v8 }
0x186e   : > { %5298 = vmatprep.subr.mxu1 %v8620_v42 }
0x186f   : > { %5299 = vmatpush3.msra.mxu1 %v6588_v7 }
0x1870   : > { %5300 = vmatprep.subr.mxu1 %v8620_v42 }
0x1871   : > { %5301 = vmatpush3.msra.mxu1 %v6586_v6 }
0x1872   : > { %5302 = vmatprep.subr.mxu1 %v8620_v42 }
0x1873   : > { %5303 = vmatpush3.msra.mxu1 %v6584_v5 }
0x1874   : > { %5304 = vmatprep.subr.mxu1 %v8620_v42 }
0x1875   : > { %5305 = vmatpush3.msra.mxu1 %v6582_v4 }
0x1876   : > { %5306 = vmatprep.subr.mxu1 %v8620_v42 }
0x1877   : > { %5307 = vmatpush3.msra.mxu1 %v6580_v3 }
0x1878   : > { %5346 = vmatprep.subr.mxu1 %v8620_v42  ;;  %5309 = vmatmul.mubr.msk.f32.vlgmr.msra.gmra.mxu1 %vm2292_vm5, %v8663_v51 }
0x1879   : > { %5347 = vmatpush3.msra.mxu1 %v6610_v18  ;;  %5378 = vmatprep.mubr.msk.f32.mxu1 %vm6292_vm14, %v8620_v42 }
0x187a   : > { %5348 = vmatprep.subr.mxu1 %v8620_v42 }
0x187b   : > { %5349 = vmatpush3.msra.mxu1 %v6608_v17 }
0x187c   : > { %5350 = vmatprep.subr.mxu1 %v8620_v42 }
0x187d   : > { %5351 = vmatpush3.msra.mxu1 %v6606_v16 }
0x187e   : > { %5352 = vmatprep.subr.mxu1 %v8620_v42 }
0x187f   : > { %5353 = vmatpush3.msra.mxu1 %v6604_v15 }
0x1880   : > { %5354 = vmatprep.subr.mxu1 %v8620_v42 }
0x1881   : > { %5355 = vmatpush3.msra.mxu1 %v6602_v14 }
0x1882   : > { %5356 = vmatprep.subr.mxu1 %v8620_v42 }
0x1883   : > { %5357 = vmatpush3.msra.mxu1 %v6600_v13 }
0x1884   : > { %5358 = vmatprep.subr.mxu1 %v8620_v42 }
0x1885   : > { %5359 = vmatpush3.msra.mxu1 %v6598_v12 }
0x1886   : > { %5360 = vmatprep.subr.mxu1 %v8620_v42 }
0x1887   : > { %5361 = vmatpush3.msra.mxu1 %v6596_v11 }
0x1888   : > { %5362 = vmatprep.subr.mxu1 %v8620_v42 }
0x1889   : > { %5363 = vmatpush3.msra.mxu1 %v6594_v10 }
0x188a   : > { %5364 = vmatprep.subr.mxu1 %v8620_v42 }
0x188b   : > { %5365 = vmatpush3.msra.mxu1 %v6592_v9 }
0x188c   : > { %5366 = vmatprep.subr.mxu1 %v8620_v42 }
0x188d   : > { %5367 = vmatpush3.msra.mxu1 %v6590_v8 }
0x188e   : > { %5368 = vmatprep.subr.mxu1 %v8620_v42 }
0x188f   : > { %5369 = vmatpush3.msra.mxu1 %v6588_v7 }
0x1890   : > { %5370 = vmatprep.subr.mxu1 %v8620_v42 }
0x1891   : > { %5371 = vmatpush3.msra.mxu1 %v6586_v6 }
0x1892   : > { %5372 = vmatprep.subr.mxu1 %v8620_v42 }
0x1893   : > { %5373 = vmatpush3.msra.mxu1 %v6584_v5 }
0x1894   : > { %5374 = vmatprep.subr.mxu1 %v8620_v42 }
0x1895   : > { %5375 = vmatpush3.msra.mxu1 %v6582_v4 }
0x1896   : > { %5376 = vmatprep.subr.mxu1 %v8620_v42 }
0x1897   : > { %5377 = vmatpush3.msra.mxu1 %v6580_v3 }
0x1898   : > { %5379 = vmatmul.mubr.msk.f32.vlgmr.msra.gmra.mxu1 %vm2472_vm6, %v8663_v51  ;;  %5416 = vmatprep.subr.mxu1 %v8620_v42 }
0x1899   : > { %5417 = vmatpush3.msra.mxu1 %v6610_v18  ;;  %5448 = vmatprep.mubr.msk.f32.mxu1 %vm6292_vm14, %v8620_v42 }
0x189a   : > { %5418 = vmatprep.subr.mxu1 %v8620_v42 }
0x189b   : > { %5419 = vmatpush3.msra.mxu1 %v6608_v17 }
0x189c   : > { %5420 = vmatprep.subr.mxu1 %v8620_v42 }
0x189d   : > { %5421 = vmatpush3.msra.mxu1 %v6606_v16 }
0x189e   : > { %5422 = vmatprep.subr.mxu1 %v8620_v42 }
0x189f   : > { %5423 = vmatpush3.msra.mxu1 %v6604_v15 }
0x18a0   : > { %5424 = vmatprep.subr.mxu1 %v8620_v42 }
0x18a1   : > { %5425 = vmatpush3.msra.mxu1 %v6602_v14 }
0x18a2   : > { %5426 = vmatprep.subr.mxu1 %v8620_v42 }
0x18a3   : > { %5427 = vmatpush3.msra.mxu1 %v6600_v13 }
0x18a4   : > { %5428 = vmatprep.subr.mxu1 %v8620_v42 }
0x18a5   : > { %5429 = vmatpush3.msra.mxu1 %v6598_v12 }
0x18a6   : > { %5430 = vmatprep.subr.mxu1 %v8620_v42 }
0x18a7   : > { %5431 = vmatpush3.msra.mxu1 %v6596_v11 }
0x18a8   : > { %5432 = vmatprep.subr.mxu1 %v8620_v42 }
0x18a9   : > { %5433 = vmatpush3.msra.mxu1 %v6594_v10 }
0x18aa   : > { %5434 = vmatprep.subr.mxu1 %v8620_v42 }
0x18ab   : > { %5435 = vmatpush3.msra.mxu1 %v6592_v9 }
0x18ac   : > { %5436 = vmatprep.subr.mxu1 %v8620_v42 }
0x18ad   : > { %5437 = vmatpush3.msra.mxu1 %v6590_v8 }
0x18ae   : > { %5438 = vmatprep.subr.mxu1 %v8620_v42 }
0x18af   : > { %5439 = vmatpush3.msra.mxu1 %v6588_v7 }
0x18b0   : > { %5440 = vmatprep.subr.mxu1 %v8620_v42 }
0x18b1   : > { %5441 = vmatpush3.msra.mxu1 %v6586_v6 }
0x18b2   : > { %5442 = vmatprep.subr.mxu1 %v8620_v42 }
0x18b3   : > { %5443 = vmatpush3.msra.mxu1 %v6584_v5 }
0x18b4   : > { %5444 = vmatprep.subr.mxu1 %v8620_v42 }
0x18b5   : > { %5445 = vmatpush3.msra.mxu1 %v6582_v4 }
0x18b6   : > { %5446 = vmatprep.subr.mxu1 %v8620_v42 }
0x18b7   : > { %5447 = vmatpush3.msra.mxu1 %v6580_v3 }
0x18b8   : > { %5486 = vmatprep.subr.mxu1 %v8620_v42  ;;  %5449 = vmatmul.mubr.msk.f32.vlgmr.msra.gmra.mxu1 %vm2648_vm7, %v8663_v51 }
0x18b9   : > { %5487 = vmatpush3.msra.mxu1 %v6610_v18  ;;  %5518 = vmatprep.mubr.msk.f32.mxu1 %vm6292_vm14, %v8620_v42 }
0x18ba   : > { %5488 = vmatprep.subr.mxu1 %v8620_v42 }
0x18bb   : > { %5489 = vmatpush3.msra.mxu1 %v6608_v17 }
0x18bc   : > { %5490 = vmatprep.subr.mxu1 %v8620_v42 }
0x18bd   : > { %5491 = vmatpush3.msra.mxu1 %v6606_v16 }
0x18be   : > { %5492 = vmatprep.subr.mxu1 %v8620_v42 }
0x18bf   : > { %5493 = vmatpush3.msra.mxu1 %v6604_v15 }
0x18c0   : > { %5494 = vmatprep.subr.mxu1 %v8620_v42 }
0x18c1   : > { %5495 = vmatpush3.msra.mxu1 %v6602_v14 }
0x18c2   : > { %5496 = vmatprep.subr.mxu1 %v8620_v42 }
0x18c3   : > { %5497 = vmatpush3.msra.mxu1 %v6600_v13 }
0x18c4   : > { %5498 = vmatprep.subr.mxu1 %v8620_v42 }
0x18c5   : > { %5499 = vmatpush3.msra.mxu1 %v6598_v12 }
0x18c6   : > { %5500 = vmatprep.subr.mxu1 %v8620_v42 }
0x18c7   : > { %5501 = vmatpush3.msra.mxu1 %v6596_v11 }
0x18c8   : > { %5502 = vmatprep.subr.mxu1 %v8620_v42 }
0x18c9   : > { %5503 = vmatpush3.msra.mxu1 %v6594_v10 }
0x18ca   : > { %5504 = vmatprep.subr.mxu1 %v8620_v42 }
0x18cb   : > { %5505 = vmatpush3.msra.mxu1 %v6592_v9 }
0x18cc   : > { %5506 = vmatprep.subr.mxu1 %v8620_v42 }
0x18cd   : > { %5507 = vmatpush3.msra.mxu1 %v6590_v8 }
0x18ce   : > { %5508 = vmatprep.subr.mxu1 %v8620_v42 }
0x18cf   : > { %5509 = vmatpush3.msra.mxu1 %v6588_v7 }
0x18d0   : > { %5510 = vmatprep.subr.mxu1 %v8620_v42 }
0x18d1   : > { %5511 = vmatpush3.msra.mxu1 %v6586_v6 }
0x18d2   : > { %5512 = vmatprep.subr.mxu1 %v8620_v42 }
0x18d3   : > { %5513 = vmatpush3.msra.mxu1 %v6584_v5 }
0x18d4   : > { %5514 = vmatprep.subr.mxu1 %v8620_v42 }
0x18d5   : > { %5515 = vmatpush3.msra.mxu1 %v6582_v4 }
0x18d6   : > { %5516 = vmatprep.subr.mxu1 %v8620_v42 }
0x18d7   : > { %5517 = vmatpush3.msra.mxu1 %v6580_v3 }
0x18d8   : > { %5556 = vmatprep.subr.mxu1 %v8620_v42  ;;  %5519 = vmatmul.mubr.msk.f32.vlgmr.msra.gmra.mxu1 %vm2824_vm11, %v8663_v51  ;;  %v8182_v33 = vpop.f32.mrf.mxu1 }
0x18d9   : > { %5557 = vmatpush3.msra.mxu1 %v6610_v18  ;;  %5588 = vmatprep.mubr.msk.f32.mxu1 %vm6292_vm14, %v8620_v42 }
0x18da   : > { %5558 = vmatprep.subr.mxu1 %v8620_v42  ;;  %v5100_v34 = vpop.f32.mrf.mxu1 }
0x18db   : > { %5559 = vmatpush3.msra.mxu1 %v6608_v17 }
0x18dc   : > { %5560 = vmatprep.subr.mxu1 %v8620_v42 }
0x18dd   : > { %5561 = vmatpush3.msra.mxu1 %v6606_v16 }
0x18de   : > { %5562 = vmatprep.subr.mxu1 %v8620_v42 }
0x18df   : > { %5563 = vmatpush3.msra.mxu1 %v6604_v15 }
0x18e0   : > { %5564 = vmatprep.subr.mxu1 %v8620_v42 }
0x18e1   : > { %5565 = vmatpush3.msra.mxu1 %v6602_v14 }
0x18e2   : > { %5566 = vmatprep.subr.mxu1 %v8620_v42 }
0x18e3   : > { %5567 = vmatpush3.msra.mxu1 %v6600_v13 }
0x18e4   : > { %5568 = vmatprep.subr.mxu1 %v8620_v42 }
0x18e5   : > { %5569 = vmatpush3.msra.mxu1 %v6598_v12  ;;  %v3429_v61 = vpop.f32.mrf.mxu0 }
0x18e6   : > { %5570 = vmatprep.subr.mxu1 %v8620_v42  ;;  %6031 = vlog2.f32 %v3429_v61 }
0x18e7   : > { %5571 = vmatpush3.msra.mxu1 %v6596_v11  ;;  %v5625_v57 = vpop.f32.mrf.mxu0 }
0x18e8   : > { %5572 = vmatprep.subr.mxu1 %v8620_v42 }
0x18e9   : > { %5573 = vmatpush3.msra.mxu1 %v6594_v10 }
0x18ea   : > { %5574 = vmatprep.subr.mxu1 %v8620_v42 }
0x18eb   : > { %5575 = vmatpush3.msra.mxu1 %v6592_v9 }
0x18ec   : > { %5576 = vmatprep.subr.mxu1 %v8620_v42 }
0x18ed   : > { %5577 = vmatpush3.msra.mxu1 %v6590_v8 }
0x18ee   : > { %5578 = vmatprep.subr.mxu1 %v8620_v42 }
0x18ef   : > { %5579 = vmatpush3.msra.mxu1 %v6588_v7 }
0x18f0   : > { %5580 = vmatprep.subr.mxu1 %v8620_v42 }
0x18f1   : > { %5581 = vmatpush3.msra.mxu1 %v6586_v6 }
0x18f2   : > { %5582 = vmatprep.subr.mxu1 %v8620_v42 }
0x18f3   : > { %v6032_v48 = vpop.eup %6031  ;;  %5583 = vmatpush3.msra.mxu1 %v6584_v5 }
0x18f4   : > { %v3434_v2 = vmul.f32 0.6931472, %v6032_v48  ;;  %5584 = vmatprep.subr.mxu1 %v8620_v42 }
0x18f5   : > { %5585 = vmatpush3.msra.mxu1 %v6582_v4 }
0x18f6   : > { %v3435_v37 = vadd.f32 %v3434_v2, %v7870_v52  ;;  %5586 = vmatprep.subr.mxu1 %v8620_v42 }
0x18f7   : > { %5587 = vmatpush3.msra.mxu1 %v6580_v3 }
0x18f8   : > { %v2282_v24 = vpop.f32.mrf.mxu1  ;;  %5589 = vmatmul.mubr.msk.f32.vlgmr.msra.gmra.mxu1 %vm3000_vm15, %v8663_v51  ;;  %5626 = vmatprep.subr.mxu1 %v8620_v42  ;;  %v3444_v52 = vadd.f32 %v8222_v1, %v3435_v37  ;;  %v8683_v37 = vld [vmem:[#allocation54_spill] sm:$0xff] }
0x18f9   : > { %v2283_v34 = vadd.f32 %v2282_v24, %v8673_v22  ;;  %5627 = vmatpush3.msra.mxu1 %v6610_v18  ;;  %5658 = vmatprep.mubr.msk.f32.mxu1 %vm6292_vm14, %v8620_v42  ;;  %v2745_v22 = vpop.permute.xlu0 %2744 }
0x18fa   : > { %5628 = vmatprep.subr.mxu1 %v8620_v42  ;;  %v8251_v25 = vsel %vm3448_vm10, %v3444_v52, %v7847_v38  ;;  %v5170_v61 = vpop.f32.mrf.mxu1  ;;  %v8674_v38 = vmov 6  }
0x18fb   : > { %v8253_v57 = vmul.f32 %v2283_v34, %v2215_v23  ;;  %5629 = vmatpush3.msra.mxu1 %v6608_v17  ;;  %v3534_v46 = vsel %vm1048_vm13, %v8251_v25, -inf  ;;  %v8684_v34 = vld [vmem:[#allocation56_spill] sm:$0xff] }
0x18fc   : > { %5630 = vmatprep.subr.mxu1 %v8620_v42  ;;  %3535 = vmax.xlane.f32.xlu1 %v3534_v46 }
0x18fd   : > { %5631 = vmatpush3.msra.mxu1 %v6606_v16 }
0x18fe   : > { %5632 = vmatprep.subr.mxu1 %v8620_v42 }
0x18ff   : > { %5633 = vmatpush3.msra.mxu1 %v6604_v15 }
0x1900   : > { %5634 = vmatprep.subr.mxu1 %v8620_v42 }
0x1901   : > { %5635 = vmatpush3.msra.mxu1 %v6602_v14 }
0x1902   : > { %5636 = vmatprep.subr.mxu1 %v8620_v42 }
0x1903   : > { %5637 = vmatpush3.msra.mxu1 %v6600_v13 }
0x1904   : > { %5638 = vmatprep.subr.mxu1 %v8620_v42 }
0x1905   : > { %5639 = vmatpush3.msra.mxu1 %v6598_v12 }
0x1906   : > { %5640 = vmatprep.subr.mxu1 %v8620_v42 }
0x1907   : > { %5641 = vmatpush3.msra.mxu1 %v6596_v11 }
0x1908   : > { %5642 = vmatprep.subr.mxu1 %v8620_v42 }
0x1909   : > { %5643 = vmatpush3.msra.mxu1 %v6594_v10 }
0x190a   : > { %5644 = vmatprep.subr.mxu1 %v8620_v42 }
0x190b   : > { %5645 = vmatpush3.msra.mxu1 %v6592_v9 }
0x190c   : > { %5646 = vmatprep.subr.mxu1 %v8620_v42 }
0x190d   : > { %5647 = vmatpush3.msra.mxu1 %v6590_v8  ;;  %1504 = vperm.xlu1 %5963, %v8670_v29  }
0x190e   : > { %5648 = vmatprep.subr.mxu1 %v8620_v42 }
0x190f   : > { %5649 = vmatpush3.msra.mxu1 %v6588_v7 }
0x1910   : > { %5650 = vmatprep.subr.mxu1 %v8620_v42 }
0x1911   : > { %5651 = vmatpush3.msra.mxu1 %v6586_v6  ;;  %5966 = vset.pattern.permute.xlu1 %v8674_v38 }
0x1912   : > { %5652 = vmatprep.subr.mxu1 %v8620_v42  ;;  %2035 = vperm.xlu1 %5966, %v8670_v29  }
0x1913   : > { %5653 = vmatpush3.msra.mxu1 %v6584_v5 }
0x1914   : > { %5654 = vmatprep.subr.mxu1 %v8620_v42 }
0x1915   : > { %5655 = vmatpush3.msra.mxu1 %v6582_v4 }
0x1916   : > { %5656 = vmatprep.subr.mxu1 %v8620_v42  ;;  %5968 = vset.pattern.permute.xlu1 %v8655_v62 }
0x1917   : > { %5657 = vmatpush3.msra.mxu1 %v6580_v3  ;;  %2392 = vperm.xlu1 %5968, %v8670_v29  }
0x1918   : > { %5659 = vmatmul.mubr.msk.f32.vlgmr.msra.gmra.mxu1 %vm3177_vm4, %v8663_v51  ;;  %5696 = vmatprep.subr.mxu1 %v8620_v42  ;;  %v8298_v63 = vpop.f32.mrf.mxu1 }
0x1919   : > { %5697 = vmatpush3.msra.mxu1 %v6610_v18  ;;  %5728 = vmatprep.mubr.msk.f32.mxu1 %vm6292_vm14, %v8620_v42  ;;  %v4018_v18 = vsel %vm1938_vm3, 1.0, %v8620_v42  ;;  %v2463_v48 = vadd.f32 %v8298_v63, %v8682_v55 }
0x191a   : > { %5698 = vmatprep.subr.mxu1 %v8620_v42  ;;  %v5240_v62 = vpop.f32.mrf.mxu1 }
0x191b   : > { %5699 = vmatpush3.msra.mxu1 %v6608_v17  ;;  %5969 = vset.pattern.permute.xlu1 %v8656_v50  ;;  %v4026_v62 = vsel %vm2648_vm7, 1.0, %v8620_v42 }
0x191c   : > { %5700 = vmatprep.subr.mxu1 %v8620_v42  ;;  %2568 = vperm.xlu1 %5969, %v8670_v29  }
0x191d   : > { %5701 = vmatpush3.msra.mxu1 %v6606_v16  ;;  %v8676_v16 = vmov 12  }
0x191e   : > { %5702 = vmatprep.subr.mxu1 %v8620_v42 }
0x191f   : > { %5703 = vmatpush3.msra.mxu1 %v6604_v15 }
0x1920   : > { %5704 = vmatprep.subr.mxu1 %v8620_v42  ;;  %5971 = vset.pattern.permute.xlu1 %v8658_v53 }
0x1921   : > { %5705 = vmatpush3.msra.mxu1 %v6602_v14  ;;  %2920 = vperm.xlu1 %5971, %v8670_v29   ;;  %v8678_v14 = vld [vmem:[#allocation43_spill] sm:$0xff] }
0x1922   : > { %5706 = vmatprep.subr.mxu1 %v8620_v42 }
0x1923   : > { %5707 = vmatpush3.msra.mxu1 %v6600_v13 }
0x1924   : > { %5708 = vmatprep.subr.mxu1 %v8620_v42 }
0x1925   : > { %5709 = vmatpush3.msra.mxu1 %v6598_v12  ;;  %5972 = vset.pattern.permute.xlu1 %v8676_v16 }
0x1926   : > { %5710 = vmatprep.subr.mxu1 %v8620_v42  ;;  %3097 = vperm.xlu1 %5972, %v8670_v29  }
0x1927   : > { %5711 = vmatpush3.msra.mxu1 %v6596_v11 }
0x1928   : > { %5712 = vmatprep.subr.mxu1 %v8620_v42 }
0x1929   : > { %5713 = vmatpush3.msra.mxu1 %v6594_v10 }
0x192a   : > { %5714 = vmatprep.subr.mxu1 %v8620_v42  ;;  %5974 = vset.pattern.permute.xlu1 %v8657_v54  ;;  %v8680_v54 = vld [vmem:[#allocation67_spill] sm:$0xff] }
0x192b   : > { %5715 = vmatpush3.msra.mxu1 %v6592_v9  ;;  %3451 = vperm.xlu1 %5974, %v8670_v29   ;;  %v8681_v29 = vld [vmem:[#allocation69_spill] sm:$0xff] }
0x192c   : > { %5716 = vmatprep.subr.mxu1 %v8620_v42 }
0x192d   : > { %5717 = vmatpush3.msra.mxu1 %v6590_v8 }
0x192e   : > { %5718 = vmatprep.subr.mxu1 %v8620_v42 }
0x192f   : > { %5719 = vmatpush3.msra.mxu1 %v6588_v7  ;;  %5975 = vset.pattern.permute.xlu1 %v6309_v28  ;;  %v8677_v7 = vld [vmem:[#allocation66_spill] sm:$0xff] }
0x1930   : > { %5720 = vmatprep.subr.mxu1 %v8620_v42  ;;  %3529 = vperm.xlu1 %5975, %v6571_v0   ;;  %vm3354_vm14 = vcmp.eq.s32.totalorder %v8677_v7, %v6675_v35 }
0x1931   : > { %5721 = vmatpush3.msra.mxu1 %v6586_v6 }
0x1932   : > { %5722 = vmatprep.subr.mxu1 %v8620_v42 }
0x1933   : > { %5723 = vmatpush3.msra.mxu1 %v6584_v5 }
0x1934   : > { %5724 = vmatprep.subr.mxu1 %v8620_v42  ;;  %3623 = vperm.xlu1 %5975, %v6880_v58  }
0x1935   : > { %5725 = vmatpush3.msra.mxu1 %v6582_v4 }
0x1936   : > { %5726 = vmatprep.subr.mxu1 %v8620_v42 }
0x1937   : > { %5727 = vmatpush3.msra.mxu1 %v6580_v3  ;;  %v1575_v3 = vadd.f32 %v7861_v49, %v8678_v14 }
0x1938   : > { %5729 = vmatmul.mubr.msk.f32.vlgmr.msra.gmra.mxu1 %vm3354_vm14, %v8663_v51  ;;  %v2638_v0 = vpop.f32.mrf.mxu1  ;;  %v8679_v51 = vld [vmem:[#allocation48_spill] sm:$0xff] }
0x1939   : > { %v2106_v50 = vadd.f32 %v8182_v33, %v8679_v51  ;;  %v2639_v24 = vadd.f32 %v2638_v0, %v8683_v37  ;;  %v4034_v37 = vsel %vm3354_vm14, 1.0, %v8620_v42 }
0x193a   : > { %v5310_v5 = vpop.f32.mrf.mxu1 }
0x193b   : > { %v8685_v5 = vld [vmem:[#allocation57_spill] sm:$0xff] }
0x1958   : > { %v2814_v6 = vpop.f32.mrf.mxu1 }
0x1959   : > { %v2815_v61 = vadd.f32 %v2814_v6, %v8684_v34  ;;  %v8700_v34 = vld [vmem:[#allocation68_spill] sm:$0xff] }
0x195a   : > { %v5380_v8 = vpop.f32.mrf.mxu1 }
0x1978   : > { %v2990_v9 = vpop.f32.mrf.mxu1 }
0x1979   : > { %v2991_v8 = vadd.f32 %v2990_v9, %v8685_v5  ;;  %v8688_v9 = vld [vmem:[#allocation59_spill] sm:$0xff]  ;;  %v3616_v5 = vrot.slane %v6706_v43, 5 }
0x197a   : > { %v5450_v10 = vpop.f32.mrf.mxu1 }
0x1985   : > { %v8350_v11 = vpop.xlane.xlu1 %3535 }
0x1986   : > { %v3537_v4 = vsub.f32 %v8251_v25, %v8350_v11 }
0x1988   : > { %v3538_v12 = vmul.f32 1.442695, %v3537_v4  ;;  %v2111_v4 = vsel %vm2032_vm8, %v4018_v18, %v7898_v45  ;;  %v4030_v45 = vsel %vm3000_vm15, 1.0, %v8620_v42 }
0x1989   : > { %v1505_v13 = vpop.permute.xlu1 %1504 }
0x198a   : > { %6033 = vpow2.f32 %v3538_v12  ;;  %v1507_v15 = vmul.f32 %v7878_v47, %v1505_v13  ;;  %v4022_v47 = vsel %vm2292_vm5, 1.0, %v8620_v42  ;;  %v4028_v12 = vsel %vm2824_vm11, 1.0, %v8620_v42 }
0x198c   : > { %v1578_v17 = vmul.f32 %v1575_v3, %v1507_v15  ;;  %v2288_v15 = vsel %vm2209_vm9, %v8233_v56, %v2111_v4 }
0x198d   : > { %v2036_v58 = vpop.permute.xlu1 %2035 }
0x198e   : > { %v1579_v53 = vadd.f32 %v1578_v17, %v8680_v54  ;;  %v2038_v28 = vmul.f32 %v4018_v18, %v2036_v58 }
0x1990   : > { %v1756_v20 = vadd.f32 %v8681_v29, %v1579_v53  ;;  %v2109_v39 = vmul.f32 %v2106_v50, %v2038_v28  ;;  %v8689_v50 = vld [vmem:[#allocation51_spill] sm:$0xff]  ;;  %v8691_v53 = vld [vmem:[#allocation53_spill] sm:$0xff] }
0x1991   : > { %vm8690_vm8 = vcmp.eq.s32.totalorder %v8689_v50, 1  ;;  %vm8692_vm3 = vcmp.eq.s32.totalorder %v8691_v53, 1 }
0x1992   : > { %v1933_v49 = vadd.f32 %v7902_v21, %v1756_v20  ;;  %v2393_v40 = vpop.permute.xlu1 %2392  ;;  %v4024_v21 = vsel %vm2472_vm6, 1.0, %v8620_v42  ;;  %v2468_v32 = vsel %vm8690_vm8, %v4022_v47, %v2288_v15  ;;  %v8693_v20 = vld [vmem:[#allocation55_spill] sm:$0xff] }
0x1993   : > { %v2395_v2 = vmul.f32 %v4022_v47, %v2393_v40  ;;  %v2644_v28 = vsel %vm8692_vm3, %v4024_v21, %v2468_v32  ;;  %vm8694_vm9 = vcmp.eq.s32.totalorder %v8693_v20, 1  ;;  %v8695_v40 = vld [vmem:[#allocation58_spill] sm:$0xff] }
0x1994   : > { %v2110_v41 = vadd.f32 %v2109_v39, %v1933_v49  ;;  %v2820_v56 = vsel %vm8694_vm9, %v4026_v62, %v2644_v28  ;;  %vm8696_vm5 = vcmp.eq.s32.totalorder %v8695_v40, 1 }
0x1995   : > { %v2466_v33 = vmul.f32 %v2463_v48, %v2395_v2  ;;  %v2996_v55 = vsel %vm8696_vm5, %v4028_v12, %v2820_v56  ;;  %v8697_v48 = vld [vmem:[#allocation60_spill] sm:$0xff] }
0x1996   : > { %v2287_v52 = vadd.f32 %v8253_v57, %v2110_v41  ;;  %v2747_v57 = vmul.f32 %v4026_v62, %v2745_v22  ;;  %vm8698_vm6 = vcmp.eq.s32.totalorder %v8697_v48, 1 }
0x1997   : > { %v6034_v23 = vpop.eup %6033  ;;  %v2569_v26 = vpop.permute.xlu1 %2568  ;;  %v3173_v47 = vsel %vm8698_vm6, %v4030_v45, %v2996_v55 }
0x1998   : > { %v2467_v46 = vadd.f32 %v2466_v33, %v2287_v52  ;;  %v2571_v38 = vmul.f32 %v4024_v21, %v2569_v26  ;;  %5694 = vmatmul.mubr.f32.vlgmr.msra.gmra.mxu0 %v6034_v23  ;;  %v3167_v63 = vpop.f32.mrf.mxu1  ;;  %v2818_v10 = vmul.f32 %v2815_v61, %v2747_v57  ;;  %v3350_v33 = vsel %vm3271_vm12, %v4032_v19, %v3173_v47  ;;  %v3275_v26 = vpop.permute.xlu0 %3274 }
0x1999   : > { %v3168_v58 = vadd.f32 %v3167_v63, %v8688_v9  ;;  %v3527_v59 = vsel %vm3448_vm10, %v4034_v37, %v3350_v33 }
0x199a   : > { %v2642_v16 = vmul.f32 %v2639_v24, %v2571_v38  ;;  %v5520_v0 = vpop.f32.mrf.mxu1 }
0x199b   : > { %v3614_v0 = vrot.slane %v6686_v60, 6 }
0x199c   : > { %v2643_v6 = vadd.f32 %v2642_v16, %v2467_v46  ;;  %v2921_v13 = vpop.permute.xlu1 %2920  ;;  %v3277_v46 = vmul.f32 %v4032_v19, %v3275_v26  ;;  %v3613_v16 = vrot.slane %v6701_v36, 7  ;;  %v3629_v4 = vpop.permute.xlu0 %3628 }
0x199d   : > { %v2923_v14 = vmul.f32 %v4028_v12, %v2921_v13 }
0x199e   : > { %v2819_v30 = vadd.f32 %v2818_v10, %v2643_v6  ;;  %v3618_v10 = vrot.slane %v6716_v44, 4 }
0x199f   : > { %v2994_v17 = vmul.f32 %v2991_v8, %v2923_v14  ;;  %v3615_v8 = vsel %vm1133_vm0, %v3614_v0, %v3613_v16 }
0x19a0   : > { %v3617_v27 = vsel %vm1136_vm1, %v3616_v5, %v3615_v8 }
0x19a1   : > { %v2995_v51 = vadd.f32 %v2994_v17, %v2819_v30  ;;  %v3098_v18 = vpop.permute.xlu1 %3097  ;;  %v3619_v6 = vsel %vm1139_vm2, %v3618_v10, %v3617_v27 }
0x19a2   : > { %v3100_v54 = vmul.f32 %v4030_v45, %v3098_v18 }
0x19a4   : > { %v3171_v29 = vmul.f32 %v3168_v58, %v3100_v54 }
0x19a6   : > { %v3172_v39 = vadd.f32 %v3171_v29, %v2995_v51  ;;  %v3452_v49 = vpop.permute.xlu1 %3451 }
0x19a7   : > { %v3454_v7 = vmul.f32 %v4034_v37, %v3452_v49 }
0x19ab   : > { %v3530_v2 = vpop.permute.xlu1 %3529 }
0x19ac   : > { %vm3531_vm7 = vcmp.eq.s32.totalorder %v3530_v2, %v6675_v35 }
0x19ad   : > { %v4036_v24 = vsel %vm3531_vm7, 1.0, %v8620_v42 }
0x19ae   : > { %3708 = vst [vmem:[#allocation5] sm:$0xf] %v4036_v24 }
0x19af   : > { %v3624_v52 = vpop.permute.xlu1 %3623 }
0x19b0   : > { %vm3625_vm11 = vcmp.eq.s32.totalorder %v3624_v52, 1 }
0x19b1   : > { %v3704_v23 = vsel %vm3625_vm11, %v4036_v24, %v3527_v59 }
0x19b2   : > { %3707 = vst [vmem:[#allocation4] sm:$0xf] %v3704_v23 }
0x19b8   : > { %v3344_v22 = vpop.f32.mrf.mxu1 }
0x19b9   : > { %v3345_v61 = vadd.f32 %v3344_v22, %v8700_v34 }
0x19ba   : > { %v5590_v21 = vpop.f32.mrf.mxu1 }
0x19bb   : > { %v3348_v38 = vmul.f32 %v3345_v61, %v3277_v46 }
0x19bd   : > { %v3349_v62 = vadd.f32 %v3348_v38, %v3172_v39 }
0x19d8   : > { %v3521_v35 = vpop.f32.mrf.mxu1 }
0x19d9   : > { %v3522_v42 = vadd.f32 %v3521_v35, %v8222_v1  ;;  %v3631_v1 = vmul.f32 %v4036_v24, %v3629_v4 }
0x19da   : > { %v5660_v63 = vpop.f32.mrf.mxu1 }
0x19db   : > { %v3525_v57 = vmul.f32 %v3522_v42, %v3454_v7 }
0x19dd   : > { %v3526_v31 = vadd.f32 %v3525_v57, %v3349_v62 }
0x19f8   : > { %v3698_v12 = vpop.f32.mrf.mxu1 }
0x19f9   : > { %v3699_v13 = vadd.f32 %v3698_v12, %v3619_v6 }
0x19fa   : > { %v5730_v14 = vpop.f32.mrf.mxu1 }
0x19fb   : > { %v3702_v30 = vmul.f32 %v3699_v13, %v3631_v1 }
0x19fd   : > { %v3703_v3 = vadd.f32 %v3702_v30, %v3526_v31 }
0x19ff   : > { %3706 = vst [vmem:[#allocation3] sm:$0xf] %v3703_v3 }
0x1a58   : > { %v3606_v36 = vpop.f32.mrf.mxu0 }
0x1a59   : > { %6035 = vlog2.f32 %v3606_v36 }
0x1a5a   : > { %v5695_v60 = vpop.f32.mrf.mxu0 }
0x1a66   : > { %v6036_v43 = vpop.eup %6035 }
0x1a67   : > { %v3611_v15 = vmul.f32 0.6931472, %v6036_v43 }
0x1a69   : > { %v3612_v17 = vadd.f32 %v3611_v15, %v8350_v11 }
0x1a6a   : > { %3712 = sbr.rel (%p4038_p3) target bundleno = 7093 (0x1bb5), region = 92 }
0x1a6b   : > { %v3621_v44 = vadd.f32 %v3619_v6, %v3612_v17 }
0x1a6d   : > { %v3626_v9 = vsel %vm3625_vm11, %v3621_v44, %v8251_v25 }
0x1a6e   : > { %3705 = vst [vmem:[#allocation2] sm:$0xf] %v3626_v9 }
0x1a6f   : > { %v4039_v58 = vld [vmem:[%s8503_s6] ss:$0 sm:$0xff]  ;;  %v3714_v50 = vld [vmem:[#allocation3] sm:$0xf]  ;;  %v3715_v32 = vld [vmem:[#allocation4] sm:$0xf] }
0x1a70   : > { %v3722_v11 = vmul.f32 %v4039_v58, %v3715_v32 }
0x1a72   : > { %v3723_v54 = vadd.f32 %v3722_v11, %v3714_v50 }
0x1a74   : > { %v3724_v53 = vsel %vm1048_vm13, %v3723_v54, 0.0 }
0x1a75   : > { %v3727_v51 = vld [vmem:[#allocation2] sm:$0xf]  ;;  %3725 = vadd.xlane.f32.xlu1 %v3724_v53 }
0x1a76   : > { %v3728_v45 = vadd.f32 %v4039_v58, %v3727_v51 }
0x1a78   : > { %v3729_v18 = vsel %vm1048_vm13, %v3728_v45, -inf }
0x1a79   : > { %3730 = vmax.xlane.f32.xlu0 %v3729_v18 }
0x1afe   : > { %v3726_v55 = vpop.xlane.xlu1 %3725 }
0x1b02   : > { %v3731_v25 = vpop.xlane.xlu0 %3730 }
0x1b03   : > { %v3732_v28 = vsub.f32 %v3728_v45, %v3731_v25 }
0x1b05   : > { %v3733_v29 = vmul.f32 1.442695, %v3732_v28 }
0x1b07   : > { %6037 = vpow2.f32 %v3733_v29 }
0x1b14   : > { %v6038_v20 = vpop.eup %6037 }
0x1b15   : > { %v3735_v56 = vsel %vm1048_vm13, %v6038_v20, 0.0 }
0x1b16   : > { %3736 = vadd.xlane.f32.xlu0 %v3735_v56 }
0x1b9f   : > { %v3737_v39 = vpop.xlane.xlu0 %3736 }
0x1ba0   : > { %6039 = vlog2.f32 %v3737_v39 }
0x1bad   : > { %v6040_v49 = vpop.eup %6039 }
0x1bae   : > { %v3739_v40 = vmul.f32 0.6931472, %v6040_v49 }
0x1bb0   : > { %v3740_v19 = vadd.f32 %v3739_v40, %v3731_v25 }
0x1bb2   : > { %v3741_v48 = vsub.f32 %v3726_v55, %v3740_v19 }
0x1bb4   : > { %3742 = vst [vmem:[#allocation16] sm:$0xf] %v3741_v48 }
0x1bb5 PF: > { %s6310_s1 = smov [#allocation16]   ;;  %p8701_p10 = scmp.eq.s32.totalorder %s6404_s19, 1 }
0x1bb6   : > { %s3757_s8 = sshll.u32 %s6310_s1, 4  ;;  %s3758_s8 = int_to_ptr.vmem [resolvable:$true] %s3757_s8 }
0x1bb7   : > { %s6171_s30 = scalar_lea.vmem %s3758_s8, 64  ;;  %p6178_p0 = scmp.lt.s32.totalorder %s3758_s8, %s3758_s8 }
0x1bb8   : > { %p6172_p7 = scmp.ne.s32.totalorder %s3758_s8, %s6171_s30  ;;  %p6179_p13 = scmp.lt.s32.totalorder %s6171_s30, %s6171_s30 }
0x1bba   : > { %p6173_p5 = pnand %p6172_p7, %p8701_p10  ;;  %p6180_p6 = por %p6179_p13, %p6178_p0 }
0x1bbc   : > { %p6174_p4 = pneg %p6173_p5 }
0x1bbe   : > { %p6181_p12 = pnand %p6180_p6, %p6174_p4 }
0x1bc0   : > { %6184 = shalt.err (!%p6181_p12)
}
0x1bc1   : > { %p8702_p1 = pmov %p8701_p10  ;;  %s3744_s15 = scalar_lea.sflag [#allocation18], %s6545_s7 }
0x1bc3   : > { %5761 = dma.vmem_to_hbm [thread:$0]  (%p8702_p1), %s3758_s8, 64, %s8506_s9, [#allocation8]  }
0x1bc4   : > { %s4048_s12 = sshll.u32 %s6261_s16, 8  ;;  %s3783_s22 = sshll.u32 %s6681_s13, 4  ;;  %s3784_s22 = int_to_ptr.vmem [resolvable:$true] %s3783_s22 }
0x1bc5   : > { %s8703_s10 = sld [smem:[#allocation74_spill]]  ;;  %s6311_s25 = smov 256  }
0x1bc6   : > { %5762 = sst [smem:[#allocation22]] (%p6432_p9), %s6311_s25  ;;  %s6312_s7 = smov 512  }
0x1bc7   : > { %5763 = sst [smem:[#allocation22 + $0x1]] (%p6432_p9), %s6312_s7  ;;  %s6313_s27 = smov 2  }
0x1bc8   : > { %5764 = sst [smem:[#allocation22 + $0x2]] (%p6432_p9), %s6313_s27  ;;  %s6314_s24 = smov 128  }
0x1bc9   : > { %5765 = sst [smem:[#allocation22 + $0x3]] (%p6432_p9), %s6314_s24  ;;  %s6315_s16 = smov 8  }
0x1bca   : > { %5766 = sst [smem:[#allocation22 + $0x4]] (%p6432_p9), %s6314_s24  ;;  %s6316_s21 = smov 131072  }
0x1bcb   : > { %s3772_s20 = scalar_lea.hbm %s8703_s10, %s4048_s12  ;;  %5767 = sst [smem:[#allocation22 + $0x5]] (%p6432_p9), %s6315_s16 }
0x1bcc   : > { %s6317_s13 = smov 0   ;;  %p8704_p8 = pmov %p8702_p1 }
0x1bcd   : > { %5768 = dma.general (%p6432_p9), %s3784_s22, 1024, %s3772_s20, %s3744_s15, %s6316_s21, [#allocation22], %s6317_s13, 0  }
0x1bce   : > { %6240 = dma.done.wait (%p8704_p8), [#allocation8], 64   ;;  %p8705_p2 = pmov %p8702_p1 }
0x1bd0   : > { %6242 = vsyncadd (%p8705_p2), [#allocation8], 4294967232 }
0x1bd1 PF: > { %s8706_s18 = sld [smem:[#allocation31_spill]] }
0x1bd2   : > { %s8707_s28 = sld [smem:[#allocation36_spill]] }
0x1bd3   : > { %s8708_s1 = sld [smem:[#allocation33_spill]] }
0x1bd7   : > { %s3815_s8 = sand.u32 1, %s8706_s18  }
0x1bd8   : > { %p8709_p3 = scmp.ne.s32.totalorder %s8707_s28, 0  ;;  %s3816_s30 = scalar_lea.sflag [#allocation18], %s3815_s8 }
0x1bda   : > { %p5783_p7 = pnand %p3975_p11, %p8709_p3 }
0x1bdc   : > { %p5784_p10 = pneg %p5783_p7 }
0x1bde   : > { %6244 = dma.done.wait (%p5784_p10), %s3816_s30, 1024  }
0x1bdf   : > { %6246 = vsyncadd (%p5784_p10), %s3816_s30, 4294966272  ;;  %s30_s18 = sadd.s32 1, %s8708_s1   ;;  %s8710_s26 = sld [smem:[#allocation32_spill]] }
0x1be0   : > { %p27_p9 = scmp.ge.s32.totalorder %s30_s18, 4   ;;  %s8711_s15 = sld [smem:[#allocation35_spill]] }
0x1be1   : > { %s8712_s19 = sld [smem:[#allocation34_spill]]  ;;  %s8713_s13 = smov %s6253_s14 }
0x1be2   : > { %s8715_s16 = smov %s6265_s17 }
0x1be3   :  { %29 = sbr.rel (!%p27_p9) target bundleno = 15 (0xf), region = 167 }
0x1be5   : > { %s8714_s14 = smov %s8710_s26 }
0x1be7   : > { %s8716_s17 = smov %s8712_s19 }
0x1be8   :  { %3821 = vsyncpa [#allocation7], 1 }
0x1be9   :  { %3823 = vsyncpa [#allocation7 + $0x1], 1 }
0x1bea   :  { %3824 = vsyncpa [#allocation10], 1 }
0x1beb   :  { %3825 = vsyncpa [#allocation15], 1 }
0x1bec   :  { %3826 = vsyncpa [#allocation8], 1 }
0x1bed   :  { %3828 = vsyncpa [#allocation8 + $0x1], 1 }
0x1bee   :  { %3829 = vsyncpa [#allocation18], 1 }
0x1bef   :  { %3831 = vsyncpa [#allocation18 + $0x1], 1 }

</bundles_post_ra>
